<compile_context>
chip_gen: v5e
topology: v5e:2x2
jax: 0.10.0
libtpu: 0.0.40
codegen_flags: <defaults>
</compile_context>

<pallas_src>
import functools

import numpy as np

import jax
import jax.numpy as jnp
from jax import lax
from jax.experimental import pallas as pl
from jax.experimental.pallas import tpu as pltpu


# ---------------------------------------------------------------------------
# Fused Pallas kernel: conv1+bn1+relu -> conv2(3x3)+bn2+relu -> conv3+bn3
#                      -> residual add -> relu
# ---------------------------------------------------------------------------
def _bottleneck_kernel(xp_ref, mask_ref, w1_ref, b1_ref, w2_ref, b2_ref,
                       w3_ref, b3_ref, o_ref, *, H, W):
    Wp = W + 2                       # padded row length
    P = xp_ref.shape[1]              # (H + 3) * Wp padded pixels per image
    Q = H * Wp                       # over-computed output pixels per image
    width = w1_ref.shape[1]

    xp = xp_ref[0]                                   # (P, Cin) bf16

    # ---- conv1 (1x1) + folded bn1 + relu, on the padded pixel grid --------
    y1 = jnp.dot(xp, w1_ref[...], preferred_element_type=jnp.float32)
    # Mask (static 0/1 constant) zeroes the spatial-padding rows so conv2
    # sees a properly zero-padded y1 (otherwise they hold relu(b1) != 0).
    y1 = jnp.maximum(y1 + b1_ref[...], 0.0) * mask_ref[...]
    y1b = y1.astype(jnp.bfloat16)                    # single f32->bf16 pass

    # ---- conv2 (3x3, pad=1), f32 accumulation ------------------------------
    taps = [y1b[dy * Wp + dx:dy * Wp + dx + Q, :]
            for dy in range(3) for dx in range(3)]   # 9 x (Q, width) bf16 views
    if width >= 256:
        # K=width already fills the MXU: per-tap matmuls, acc seeded by tap 0.
        acc = jnp.dot(taps[0], w2_ref[0:width, :],
                      preferred_element_type=jnp.float32)
        for t in range(1, 9):
            acc = acc + jnp.dot(taps[t], w2_ref[t * width:(t + 1) * width, :],
                                preferred_element_type=jnp.float32)
    else:
        # In-VMEM im2col: one (Q, 9*width) x (9*width, width) matmul.
        lhs = jnp.concatenate(taps, axis=1)          # (Q, 9*width) bf16
        acc = jnp.dot(lhs, w2_ref[...], preferred_element_type=jnp.float32)
    y2 = jnp.maximum(acc + b2_ref[...], 0.0).astype(jnp.bfloat16)

    # ---- conv3 (1x1) + folded bn3 + residual add + relu --------------------
    y3 = jnp.dot(y2, w3_ref[...], preferred_element_type=jnp.float32)
    y3 = y3 + b3_ref[...]
    identity = xp[W + 3:W + 3 + Q, :].astype(jnp.float32)   # Cin == Cout
    o_ref[0] = jnp.maximum(y3 + identity, 0.0)


# ---------------------------------------------------------------------------
# Bottleneck forward (NCHW in / NCHW out, like the PyTorch module)
# ---------------------------------------------------------------------------
def bottleneck_forward(x_nchw, params):
    w1, w2, w3 = params["w1"], params["w2"], params["w3"]   # bf16, BN folded
    b1, b2, b3 = params["b1"], params["b2"], params["b3"]   # f32 (1, C)

    n, cin, h, w = x_nchw.shape
    width = w1.shape[1]
    cout = w3.shape[1]
    assert cin == cout, "identity add requires inplanes == planes * expansion"

    wp = w + 2
    p_rows = (h + 3) * wp            # 1 top + 2 bottom halo rows, 1 col each side
    q_rows = h * wp                  # over-computed output rows (2 junk cols/row)

    # NCHW -> padded flattened NHWC (bf16), one XLA pass.  In a full network
    # the activations would stay in this layout end-to-end (the back-transpose
    # below is pure interface overhead for the NCHW contract).
    x_nhwc = jnp.transpose(x_nchw, (0, 2, 3, 1)).astype(jnp.bfloat16)
    x_pad = jnp.pad(x_nhwc, ((0, 0), (1, 2), (1, 1), (0, 0)))
    xp_flat = x_pad.reshape(n, p_rows, cin)

    # Static zero-padding mask (trace-time numpy constant, shipped as input).
    ii = np.arange(p_rows) // wp
    jj = np.arange(p_rows) % wp
    mask_np = ((ii >= 1) & (ii <= h) & (jj >= 1) & (jj <= w))
    mask = jnp.asarray(mask_np.astype(np.float32).reshape(p_rows, 1))

    flops = 2 * n * (p_rows * cin * width
                     + 9 * q_rows * width * width
                     + q_rows * width * cout)
    bytes_accessed = int(xp_flat.size * 2 + mask.size * 4
                         + (w1.size + w2.size + w3.size) * 2
                         + (b1.size + b2.size + b3.size) * 4
                         + n * q_rows * cout * 4)

    # VMEM budget derived from the real footprint, capped for v7x (64 MiB/TC).
    per_img_in = p_rows * cin * 2
    per_img_out = q_rows * cout * 4
    weight_bytes = ((w1.size + w2.size + w3.size) * 2
                    + (b1.size + b2.size + b3.size) * 4 + mask.size * 4)
    interm = (p_rows * width * 4 + p_rows * width * 2       # y1 f32 + bf16
              + q_rows * 9 * width * 2                      # im2col LHS
              + q_rows * width * 4 + q_rows * width * 2     # acc + y2
              + q_rows * cout * 4 + q_rows * cin * 4)       # y3 + identity
    vmem_est = 2 * (per_img_in + per_img_out + weight_bytes) + interm
    vmem_limit = int(min(max(2 * vmem_est, 32 * 1024 * 1024), 64 * 1024 * 1024))

    kernel = functools.partial(_bottleneck_kernel, H=h, W=w)
    out_flat = pl.pallas_call(
        kernel,
        out_shape=jax.ShapeDtypeStruct((n, q_rows, cout), jnp.float32),
        grid=(n,),
        in_specs=[
            pl.BlockSpec((1, p_rows, cin), lambda b: (b, 0, 0)),   # x (padded, flat)
            pl.BlockSpec(mask.shape, lambda b: (0, 0)),            # pad mask
            pl.BlockSpec(w1.shape, lambda b: (0, 0)),              # w1 (Cin, width)
            pl.BlockSpec(b1.shape, lambda b: (0, 0)),              # b1
            pl.BlockSpec(w2.shape, lambda b: (0, 0)),              # w2 (9*width, width)
            pl.BlockSpec(b2.shape, lambda b: (0, 0)),              # b2
            pl.BlockSpec(w3.shape, lambda b: (0, 0)),              # w3 (width, Cout)
            pl.BlockSpec(b3.shape, lambda b: (0, 0)),              # b3
        ],
        out_specs=pl.BlockSpec((1, q_rows, cout), lambda b: (b, 0, 0)),
        compiler_params=pltpu.CompilerParams(
            dimension_semantics=("parallel",),
            vmem_limit_bytes=vmem_limit),
        cost_estimate=pl.CostEstimate(flops=flops, transcendentals=0,
                                      bytes_accessed=bytes_accessed),
    )(xp_flat, mask, w1, b1, w2, b2, w3, b3)

    # Drop the 2 over-computed columns per row; fused with the NCHW transpose.
    out = out_flat.reshape(n, h, wp, cout)[:, :, :w, :]
    return jnp.transpose(out, (0, 3, 1, 2))


# ---------------------------------------------------------------------------
# Deterministic parameters (shapes from Bottleneck.__init__), BN pre-folded
# ---------------------------------------------------------------------------
def make_params(key, inplanes, planes, base_width=64, groups=1):
    width = int(planes * (base_width / 64.0)) * groups
    cout = planes * 4  # expansion
    ks = jax.random.split(key, 15)

    def bn_fold(kg, kb, km, kv, c):
        gamma = 1.0 + 0.1 * jax.random.normal(kg, (c,))
        beta = 0.1 * jax.random.normal(kb, (c,))
        mean = 0.1 * jax.random.normal(km, (c,))
        var = jnp.abs(jax.random.normal(kv, (c,))) + 0.5
        scale = gamma / jnp.sqrt(var + 1e-5)
        bias = beta - mean * scale
        return scale.astype(jnp.float32), bias.astype(jnp.float32)

    # Conv weights in channel-matmul layouts:
    #   w1: (Cin, width)          == torch (width, Cin, 1, 1) transposed
    #   w2: (9*width, width)      HWIO (3,3,width,width) flattened over (dy,dx,i)
    #   w3: (width, Cout)         == torch (Cout, width, 1, 1) transposed
    w1 = (0.1 * jax.random.normal(ks[0], (inplanes, width))).astype(jnp.float32)
    w2 = (0.1 * jax.random.normal(ks[1], (3, 3, width, width))).astype(jnp.float32)
    w3 = (0.1 * jax.random.normal(ks[2], (width, cout))).astype(jnp.float32)
    s1, b1 = bn_fold(ks[3], ks[4], ks[5], ks[6], width)
    s2, b2 = bn_fold(ks[7], ks[8], ks[9], ks[10], width)
    s3, b3 = bn_fold(ks[11], ks[12], ks[13], ks[14], cout)

    # Fold BN scales into the conv weights (inference), cast to bf16 for MXU.
    w1f = (w1 * s1[None, :]).astype(jnp.bfloat16)
    w2f = (w2 * s2[None, None, None, :]).reshape(9 * width, width).astype(jnp.bfloat16)
    w3f = (w3 * s3[None, :]).astype(jnp.bfloat16)
    return dict(w1=w1f, w2=w2f, w3=w3f,
                b1=b1.reshape(1, width), b2=b2.reshape(1, width),
                b3=b3.reshape(1, cout))


# ---------------------------------------------------------------------------
# Pure-JAX reference (lax.conv) with the same bf16-input / f32-acc precision
# ---------------------------------------------------------------------------
def reference_forward(x_nchw, params):
    dn = ("NHWC", "HWIO", "NHWC")
    w1, w2, w3 = params["w1"], params["w2"], params["w3"]
    b1, b2, b3 = params["b1"], params["b2"], params["b3"]
    cin, width = w1.shape
    cout = w3.shape[1]

    def conv(inp, w_hwio, pad):
        return lax.conv_general_dilated(
            inp.astype(jnp.bfloat16), w_hwio, (1, 1), pad,
            dimension_numbers=dn, preferred_element_type=jnp.float32)

    # The kernel receives x in bf16; mirror that (including for the residual).
    x = jnp.transpose(x_nchw, (0, 2, 3, 1)).astype(jnp.bfloat16)
    identity = x.astype(jnp.float32)
    y = conv(x, w1.reshape(1, 1, cin, width), ((0, 0), (0, 0)))
    y = jnp.maximum(y + b1, 0.0)
    y = conv(y, w2.reshape(3, 3, width, width), ((1, 1), (1, 1)))
    y = jnp.maximum(y + b2, 0.0)
    y = conv(y, w3.reshape(1, 1, width, cout), ((0, 0), (0, 0)))
    y = y + b3
    y = jnp.maximum(y + identity, 0.0)
    return jnp.transpose(y, (0, 3, 1, 2))


if __name__ == "__main__":
    key = jax.random.PRNGKey(0)
    k_x, k_p = jax.random.split(key)

    planes = 32
    inplanes = planes * 4          # 128: residual shape-valid, lane-dense Cin/Cout
    n, h, w = 2, 16, 16

    x = jax.random.normal(k_x, (n, inplanes, h, w), dtype=jnp.float32)  # NCHW
    params = make_params(k_p, inplanes, planes)

    out = jax.block_until_ready(bottleneck_forward(x, params))
    ref = jax.block_until_ready(reference_forward(x, params))

    assert out.shape == (n, planes * 4, h, w)
    max_err = float(jnp.max(jnp.abs(out - ref)))
    assert max_err < 2e-2, f"mismatch vs reference: {max_err}"
    print("KERNEL_OK")
</pallas_src>

<mosaic_0001>
module attributes {stable_mosaic.version = 11 : i64} {
  func.func @_bottleneck_kernel(%arg0: i32, %arg1: memref<1x342x128xbf16, #tpu.memory_space<vmem>>, %arg2: memref<342x1xf32, #tpu.memory_space<vmem>>, %arg3: memref<128x32xbf16, #tpu.memory_space<vmem>>, %arg4: memref<1x32xf32, #tpu.memory_space<vmem>>, %arg5: memref<288x32xbf16, #tpu.memory_space<vmem>>, %arg6: memref<1x32xf32, #tpu.memory_space<vmem>>, %arg7: memref<32x128xbf16, #tpu.memory_space<vmem>>, %arg8: memref<1x128xf32, #tpu.memory_space<vmem>>, %arg9: memref<1x288x128xf32, #tpu.memory_space<vmem>>) attributes {dimension_semantics = [#tpu.dimension_semantics<parallel>], iteration_bounds = array<i64: 2>, scalar_prefetch = 0 : i64, scratch_operands = 0 : i64, tpu.core_type = #tpu.core_type<tc>, window_params = [{transform_indices = @transform_0, window_bounds = array<i64: 1, 342, 128>}, {pipeline_mode = #tpu.pipeline_mode<synchronous>, transform_indices = @transform_1, window_bounds = array<i64: 342, 1>}, {pipeline_mode = #tpu.pipeline_mode<synchronous>, transform_indices = @transform_2, window_bounds = array<i64: 128, 32>}, {pipeline_mode = #tpu.pipeline_mode<synchronous>, transform_indices = @transform_3, window_bounds = array<i64: 1, 32>}, {pipeline_mode = #tpu.pipeline_mode<synchronous>, transform_indices = @transform_4, window_bounds = array<i64: 288, 32>}, {pipeline_mode = #tpu.pipeline_mode<synchronous>, transform_indices = @transform_5, window_bounds = array<i64: 1, 32>}, {pipeline_mode = #tpu.pipeline_mode<synchronous>, transform_indices = @transform_6, window_bounds = array<i64: 32, 128>}, {pipeline_mode = #tpu.pipeline_mode<synchronous>, transform_indices = @transform_7, window_bounds = array<i64: 1, 128>}, {transform_indices = @transform_8, window_bounds = array<i64: 1, 288, 128>}]} {
    %c0 = arith.constant 0 : index
    %c0_0 = arith.constant 0 : index
    %c0_1 = arith.constant 0 : index
    %0 = vector.load %arg1[%c0, %c0_0, %c0_1] : memref<1x342x128xbf16, #tpu.memory_space<vmem>>, vector<1x342x128xbf16>
    %1 = vector.shape_cast %0 : vector<1x342x128xbf16> to vector<342x128xbf16>
    %c0_2 = arith.constant 0 : index
    %c0_3 = arith.constant 0 : index
    %2 = vector.load %arg3[%c0_2, %c0_3] : memref<128x32xbf16, #tpu.memory_space<vmem>>, vector<128x32xbf16>
    %cst = arith.constant dense<0.000000e+00> : vector<342x32xf32>
    %3 = tpu.matmul %1, %2, %cst {dimension_numbers = #tpu.dot_dimension_numbers<[1], [0], [0], [1], [0, 0, 1, 1], [], []>} : vector<342x128xbf16>, vector<128x32xbf16>, vector<342x32xf32> -> vector<342x32xf32>
    %c0_4 = arith.constant 0 : index
    %c0_5 = arith.constant 0 : index
    %4 = vector.load %arg4[%c0_4, %c0_5] : memref<1x32xf32, #tpu.memory_space<vmem>>, vector<1x32xf32>
    %5 = vector.broadcast %4 : vector<1x32xf32> to vector<342x32xf32>
    %6 = arith.addf %3, %5 : vector<342x32xf32>
    %cst_6 = arith.constant 0.000000e+00 : f32
    %7 = vector.broadcast %cst_6 : f32 to vector<342x32xf32>
    %8 = arith.maximumf %6, %7 : vector<342x32xf32>
    %c0_7 = arith.constant 0 : index
    %c0_8 = arith.constant 0 : index
    %9 = vector.load %arg2[%c0_7, %c0_8] : memref<342x1xf32, #tpu.memory_space<vmem>>, vector<342x1xf32>
    %10 = vector.broadcast %9 : vector<342x1xf32> to vector<342x32xf32>
    %11 = arith.mulf %8, %10 : vector<342x32xf32>
    %12 = arith.truncf %11 : vector<342x32xf32> to vector<342x32xbf16>
    %13 = vector.extract_strided_slice %12 {offsets = [0, 0], sizes = [288, 32], strides = [1, 1]} : vector<342x32xbf16> to vector<288x32xbf16>
    %14 = vector.extract_strided_slice %12 {offsets = [1, 0], sizes = [288, 32], strides = [1, 1]} : vector<342x32xbf16> to vector<288x32xbf16>
    %15 = vector.extract_strided_slice %12 {offsets = [2, 0], sizes = [288, 32], strides = [1, 1]} : vector<342x32xbf16> to vector<288x32xbf16>
    %16 = vector.extract_strided_slice %12 {offsets = [18, 0], sizes = [288, 32], strides = [1, 1]} : vector<342x32xbf16> to vector<288x32xbf16>
    %17 = vector.extract_strided_slice %12 {offsets = [19, 0], sizes = [288, 32], strides = [1, 1]} : vector<342x32xbf16> to vector<288x32xbf16>
    %18 = vector.extract_strided_slice %12 {offsets = [20, 0], sizes = [288, 32], strides = [1, 1]} : vector<342x32xbf16> to vector<288x32xbf16>
    %19 = vector.extract_strided_slice %12 {offsets = [36, 0], sizes = [288, 32], strides = [1, 1]} : vector<342x32xbf16> to vector<288x32xbf16>
    %20 = vector.extract_strided_slice %12 {offsets = [37, 0], sizes = [288, 32], strides = [1, 1]} : vector<342x32xbf16> to vector<288x32xbf16>
    %21 = vector.extract_strided_slice %12 {offsets = [38, 0], sizes = [288, 32], strides = [1, 1]} : vector<342x32xbf16> to vector<288x32xbf16>
    %22 = tpu.concatenate %13, %14, %15, %16, %17, %18, %19, %20, %21 in 1 : vector<288x32xbf16>, vector<288x32xbf16>, vector<288x32xbf16>, vector<288x32xbf16>, vector<288x32xbf16>, vector<288x32xbf16>, vector<288x32xbf16>, vector<288x32xbf16>, vector<288x32xbf16> -> vector<288x288xbf16>
    %c0_9 = arith.constant 0 : index
    %c0_10 = arith.constant 0 : index
    %23 = vector.load %arg5[%c0_9, %c0_10] : memref<288x32xbf16, #tpu.memory_space<vmem>>, vector<288x32xbf16>
    %cst_11 = arith.constant dense<0.000000e+00> : vector<288x32xf32>
    %24 = tpu.matmul %22, %23, %cst_11 {dimension_numbers = #tpu.dot_dimension_numbers<[1], [0], [0], [1], [0, 0, 1, 1], [], []>} : vector<288x288xbf16>, vector<288x32xbf16>, vector<288x32xf32> -> vector<288x32xf32>
    %c0_12 = arith.constant 0 : index
    %c0_13 = arith.constant 0 : index
    %25 = vector.load %arg6[%c0_12, %c0_13] : memref<1x32xf32, #tpu.memory_space<vmem>>, vector<1x32xf32>
    %26 = vector.broadcast %25 : vector<1x32xf32> to vector<288x32xf32>
    %27 = arith.addf %24, %26 : vector<288x32xf32>
    %cst_14 = arith.constant 0.000000e+00 : f32
    %28 = vector.broadcast %cst_14 : f32 to vector<288x32xf32>
    %29 = arith.maximumf %27, %28 : vector<288x32xf32>
    %30 = arith.truncf %29 : vector<288x32xf32> to vector<288x32xbf16>
    %c0_15 = arith.constant 0 : index
    %c0_16 = arith.constant 0 : index
    %31 = vector.load %arg7[%c0_15, %c0_16] : memref<32x128xbf16, #tpu.memory_space<vmem>>, vector<32x128xbf16>
    %cst_17 = arith.constant dense<0.000000e+00> : vector<288x128xf32>
    %32 = tpu.matmul %30, %31, %cst_17 {dimension_numbers = #tpu.dot_dimension_numbers<[1], [0], [0], [1], [0, 0, 1, 1], [], []>} : vector<288x32xbf16>, vector<32x128xbf16>, vector<288x128xf32> -> vector<288x128xf32>
    %c0_18 = arith.constant 0 : index
    %c0_19 = arith.constant 0 : index
    %33 = vector.load %arg8[%c0_18, %c0_19] : memref<1x128xf32, #tpu.memory_space<vmem>>, vector<1x128xf32>
    %34 = vector.broadcast %33 : vector<1x128xf32> to vector<288x128xf32>
    %35 = arith.addf %32, %34 : vector<288x128xf32>
    %36 = vector.extract_strided_slice %1 {offsets = [19, 0], sizes = [288, 128], strides = [1, 1]} : vector<342x128xbf16> to vector<288x128xbf16>
    %37 = arith.extf %36 : vector<288x128xbf16> to vector<288x128xf32>
    %38 = arith.addf %35, %37 : vector<288x128xf32>
    %cst_20 = arith.constant 0.000000e+00 : f32
    %39 = vector.broadcast %cst_20 : f32 to vector<288x128xf32>
    %40 = arith.maximumf %38, %39 : vector<288x128xf32>
    %c0_21 = arith.constant 0 : index
    %c0_22 = arith.constant 0 : index
    %c0_23 = arith.constant 0 : index
    %41 = vector.load %arg9[%c0_21, %c0_22, %c0_23] : memref<1x288x128xf32, #tpu.memory_space<vmem>>, vector<1x288x128xf32>
    %42 = vector.shape_cast %41 : vector<1x288x128xf32> to vector<288x128xf32>
    %43 = vector.shape_cast %40 : vector<288x128xf32> to vector<1x288x128xf32>
    tpu.vector_store %arg9[%c0_21, %c0_22, %c0_23], %43 {strides = array<i32>} : memref<1x288x128xf32, #tpu.memory_space<vmem>>, vector<1x288x128xf32>,
    return
  }
  func.func @transform_0(%arg0: i32) -> (i32, i32, i32) {
    %c0_i32 = arith.constant 0 : i32
    %c0_i32_0 = arith.constant 0 : i32
    %c0_i32_1 = arith.constant 0 : i32
    return %arg0, %c0_i32, %c0_i32_0 : i32, i32, i32
  }
  func.func @transform_1(%arg0: i32) -> (i32, i32) {
    %c0_i32 = arith.constant 0 : i32
    %c0_i32_0 = arith.constant 0 : i32
    %c0_i32_1 = arith.constant 0 : i32
    return %c0_i32, %c0_i32_0 : i32, i32
  }
  func.func @transform_2(%arg0: i32) -> (i32, i32) {
    %c0_i32 = arith.constant 0 : i32
    %c0_i32_0 = arith.constant 0 : i32
    %c0_i32_1 = arith.constant 0 : i32
    return %c0_i32, %c0_i32_0 : i32, i32
  }
  func.func @transform_3(%arg0: i32) -> (i32, i32) {
    %c0_i32 = arith.constant 0 : i32
    %c0_i32_0 = arith.constant 0 : i32
    %c0_i32_1 = arith.constant 0 : i32
    return %c0_i32, %c0_i32_0 : i32, i32
  }
  func.func @transform_4(%arg0: i32) -> (i32, i32) {
    %c0_i32 = arith.constant 0 : i32
    %c0_i32_0 = arith.constant 0 : i32
    %c0_i32_1 = arith.constant 0 : i32
    return %c0_i32, %c0_i32_0 : i32, i32
  }
  func.func @transform_5(%arg0: i32) -> (i32, i32) {
    %c0_i32 = arith.constant 0 : i32
    %c0_i32_0 = arith.constant 0 : i32
    %c0_i32_1 = arith.constant 0 : i32
    return %c0_i32, %c0_i32_0 : i32, i32
  }
  func.func @transform_6(%arg0: i32) -> (i32, i32) {
    %c0_i32 = arith.constant 0 : i32
    %c0_i32_0 = arith.constant 0 : i32
    %c0_i32_1 = arith.constant 0 : i32
    return %c0_i32, %c0_i32_0 : i32, i32
  }
  func.func @transform_7(%arg0: i32) -> (i32, i32) {
    %c0_i32 = arith.constant 0 : i32
    %c0_i32_0 = arith.constant 0 : i32
    %c0_i32_1 = arith.constant 0 : i32
    return %c0_i32, %c0_i32_0 : i32, i32
  }
  func.func @transform_8(%arg0: i32) -> (i32, i32, i32) {
    %c0_i32 = arith.constant 0 : i32
    %c0_i32_0 = arith.constant 0 : i32
    %c0_i32_1 = arith.constant 0 : i32
    return %arg0, %c0_i32, %c0_i32_0 : i32, i32, i32
  }
}

</mosaic_0001>

<bundles_post_ra>
// kernel: tpu_custom_call.1
= control target key start
LH: loop header
LB: loop body
LE: loop exit
PB: predicated region body
PF: predicated region fallthrough
CT: control target
= control target key end

     0   :  { %13 = vsyncpa [#allocation3], 0  ;;  %s5344_s0 = inlined_call_operand.vmem [shape: bf16[2,342,128], index: 0, kind: input, shape index: {}]   ;;  %s5345_s1 = inlined_call_operand.vmem [shape: f32[342,1], index: 1, kind: input, shape index: {}]   ;;  %s5346_s2 = inlined_call_operand.vmem [shape: bf16[128,32], index: 2, kind: input, shape index: {}]   ;;  %s5347_s3 = inlined_call_operand.vmem [shape: f32[1,32], index: 3, kind: input, shape index: {}]   ;;  %s5348_s4 = inlined_call_operand.vmem [shape: bf16[288,32], index: 4, kind: input, shape index: {}]   ;;  %s5349_s5 = inlined_call_operand.vmem [shape: f32[1,32], index: 5, kind: input, shape index: {}]   ;;  %s5350_s6 = inlined_call_operand.vmem [shape: bf16[32,128], index: 6, kind: input, shape index: {}]   ;;  %s5351_s7 = inlined_call_operand.vmem [shape: f32[1,128], index: 7, kind: input, shape index: {}]   ;;  %s5352_s8 = inlined_call_operand.hbm [shape: f32[2,288,128], index: 8, kind: output, shape index: {}]  }
   0x1   :  { %15 = vsyncpa [#allocation3 + $0x1], 0  ;;  %s3634_s27 = smov 0   ;;  %s3636_s28 = smov 0  }
   0x2   :  { %s3638_s29 = smov 0   ;;  %s3640_s30 = smov 0  }
   0x3 LB: > { %s3655_s9 = sadd.s32 4294967295, %s3581_s30   ;;  %s3164_s10 = sadd.s32 4294967294, %s3581_s30   ;;  %s3581_s30 = sphi %s3640_s30, %s5422_s30   ;;  %s3577_s29 = sphi %s3638_s29, %s5421_s29   ;;  %s3573_s28 = sphi %s3636_s28, %s5420_s28   ;;  %s3569_s27 = sphi %s3634_s27, %s5419_s27  }
   0x4   : > { %s3659_s11 = sadd.s32 1, %s3581_s30   ;;  %s201_s12 = sadd.s32 1, %s3577_s29 }
   0x5   : > { %s198_s13 = ssub.s32 %s3581_s30, %s3659_s11  ;;  %p211_p0 = scmp.ne.s32.totalorder %s3577_s29, %s3573_s28 }
   0x6   : > { %p199_p1 = scmp.eq.s32.totalorder %s198_s13, 0  ;;  %p212_p2 = scmp.eq.s32.totalorder %s3655_s9, 1 }
   0x7   : > { %p217_p3 = scmp.ne.s32.totalorder %s3573_s28, %s3569_s27  ;;  %p218_p4 = scmp.eq.s32.totalorder %s3164_s10, 1 }
   0x8   : > { %s3670_s14 = scalar_select %p199_p1, %s3577_s29, %s201_s12  }
   0x9   : > { %p3672_p5 = por %p212_p2, %p211_p0  ;;  %p3676_p6 = por %p218_p4, %p217_p3 }
   0xa   : > { %p3167_p7 = scmp.ge.s32.totalorder %s3581_s30, 1  ;;  %p265_p8 = scmp.lt.s32.totalorder %s3581_s30, 3 }
   0xc   : > { %p266_p9 = pnand %p3167_p7, %p265_p8 }
   0xe   : > { %269 = sbr.rel (%p266_p9) target bundleno = 1222 (0x4c6), region = 52 }
  0x13   : > { %v3432_v0 = vld [vmem:[%s5346_s2 + $0x38] sm:$0xff]  ;;  %v3431_v1 = vld [vmem:[%s5346_s2 + $0x30] sm:$0xff]  ;;  %v3583_v2 = vmov 0   ;;  %v703_v3 = vld [vmem:[%s5345_s1] sm:$0xff]  ;;  %p299_p10 = scmp.lt.s32.totalorder %s3655_s9, 1  ;;  %vm1309_vm0 = vcmask 1046528  }
  0x14   : > { %546 = vmatpush.bf16.msra.mxu0 %v3432_v0  ;;  %3511 = vset.pattern.permute.xlu0 %v3583_v2  ;;  %v3430_v4 = vld [vmem:[%s5346_s2 + $0x28] sm:$0xff]  ;;  %v3429_v5 = vld [vmem:[%s5346_s2 + $0x20] sm:$0xff]  ;;  %v3428_v6 = vld [vmem:[%s5346_s2 + $0x18] sm:$0xff]  ;;  %vm1124_vm1 = vsmask.f32 7424  ;;  %s3584_s26 = smov 64  }
  0x15   : > { %746 = vperm.xlu0 %3511, %v703_v3   ;;  %3512 = vset.pattern.permute.xlu1 %v3583_v2  ;;  %v704_v7 = vld [vmem:[%s5345_s1 + $0x8] sm:$0xff]  ;;  %v705_v8 = vld [vmem:[%s5345_s1 + $0x10] sm:$0xff]  ;;  %s300_s22 = scalar_select %p299_p10, %s3655_s9, 1  ;;  %v3425_v11 = vld [vmem:[%s5346_s2] sm:$0xff]  ;;  %vm1429_vm2 = vsmask.f32 6400 }
  0x16   : > { %3513 = vset.pattern.permute.xlu2 %v3583_v2  ;;  %v3427_v9 = vld [vmem:[%s5346_s2 + $0x10] sm:$0xff]  ;;  %756 = vperm.xlu1 %3512, %v705_v8   ;;  %v3426_v10 = vld [vmem:[%s5346_s2 + $0x8] sm:$0xff]  ;;  %v706_v13 = vld [vmem:[%s5345_s1 + $0x18] sm:$0xff]  ;;  %s3585_s10 = smov 32   ;;  %s3586_s20 = smov 96   ;;  %vm1832_vm4 = vcmask 523264  }
  0x17   : > { %s3464_s25 = smul.u32 172, %s300_s22  ;;  %v710_v15 = vld [vmem:[%s5345_s1 + $0x38] sm:$0xff]  ;;  %v709_v16 = vld [vmem:[%s5345_s1 + $0x30] sm:$0xff]  ;;  %v712_v18 = vld [vmem:[%s5345_s1 + $0x48] sm:$0xff]  ;;  %vm1635_vm3 = vsmask.f32 5376 }
  0x18   : > { %547 = vmatpush.bf16.msra.mxu0 %v3431_v1  ;;  %v713_v17 = vld [vmem:[%s5345_s1 + $0x50] sm:$0xff]  ;;  %v716_v20 = vld [vmem:[%s5345_s1 + $0x68] sm:$0xff]  ;;  %v715_v21 = vld [vmem:[%s5345_s1 + $0x60] sm:$0xff]  ;;  %vm1795_vm5 = vcmask 261120   ;;  %vm1869_vm6 = vcmask 785408   ;;  %vm1757_vm7 = vcmask 1044480  }
  0x19   : > { %s3720_s17 = scalar_lea.vmem %s5344_s0, %s3464_s25  ;;  %v707_v22 = vld [vmem:[%s5345_s1 + $0x20] sm:$0xff]  ;;  %v718_v24 = vld [vmem:[%s5345_s1 + $0x78] sm:$0xff]  ;;  %v708_v25 = vld [vmem:[%s5345_s1 + $0x28] sm:$0xff]  ;;  %vm1515_vm8 = vcmask 1045504   ;;  %s296_s25 = sand.u32 1, %s3573_s28  }
  0x1a   : > { %v3404_v12 = vld [vmem:[%s3720_s17] sm:$0xff]  ;;  %v3405_v14 = vld [vmem:[%s3720_s17 + $0x8] sm:$0xff]  ;;  %v3406_v19 = vld [vmem:[%s3720_s17 + $0x10] sm:$0xff]  ;;  %766 = vperm.xlu2 %3513, %v707_v22   ;;  %s3463_s18 = smul.u32 288, %s296_s25 }
  0x1b   : > { %v719_v23 = vld [vmem:[%s5345_s1 + $0x80] sm:$0xff]  ;;  %v3407_v26 = vld [vmem:[%s3720_s17 + $0x18] sm:$0xff]  ;;  %v717_v30 = vld [vmem:[%s5345_s1 + $0x70] sm:$0xff]  ;;  %s3465_s21 = smul.u32 288, %s3655_s9  ;;  %s3087_s9 = scalar_lea.sflag [#allocation3], %s296_s25 }
  0x1c   : > { %548 = vmatpush.bf16.msra.mxu0 %v3430_v4  ;;  %v711_v27 = vld [vmem:[%s5345_s1 + $0x40] sm:$0xff]  ;;  %v714_v29 = vld [vmem:[%s5345_s1 + $0x58] sm:$0xff]  ;;  %v3409_v31 = vld [vmem:[%s3720_s17 + $0x28] sm:$0xff]  ;;  %s5129_s19 = scalar_lea.vmem [#allocation2], %s3463_s18  ;;  %s3539_s18 = scalar_lea.hbm %s5352_s8, 576 }
  0x1d   : > { %751 = vperm.xlu0 %3511, %v704_v7   ;;  %v3408_v28 = vld [vmem:[%s3720_s17 + $0x20] sm:$0xff]  ;;  %v720_v32 = vld [vmem:[%s5345_s1 + $0x88] sm:$0xff]  ;;  %v3410_v33 = vld [vmem:[%s3720_s17 + $0x30] sm:$0xff] }
  0x1e   : > { %761 = vperm.xlu1 %3512, %v706_v13   ;;  %v3411_v34 = vld [vmem:[%s3720_s17 + $0x38] sm:$0xff]  ;;  %v3412_v35 = vld [vmem:[%s3720_s17 + $0x40] sm:$0xff]  ;;  %v3413_v46 = vld [vmem:[%s3720_s17 + $0x48] sm:$0xff] }
  0x1f   : > { %v3779_v38 = vld [vmem:[%s5347_s3] ss:$0 sm:$0xff]  ;;  %v3414_v1 = vld [vmem:[%s3720_s17 + $0x50] sm:$0xff] }
  0x20   : > { %549 = vmatpush.bf16.msra.mxu0 %v3429_v5 }
  0x22   : > { %771 = vperm.xlu2 %3513, %v708_v25  }
  0x24   : > { %550 = vmatpush.bf16.msra.mxu0 %v3428_v6 }
  0x25   : > { %776 = vperm.xlu0 %3511, %v709_v16  }
  0x26   : > { %781 = vperm.xlu1 %3512, %v710_v15  }
  0x28   : > { %551 = vmatpush.bf16.msra.mxu0 %v3427_v9 }
  0x2a   : > { %786 = vperm.xlu2 %3513, %v711_v27  }
  0x2c   : > { %552 = vmatpush.bf16.msra.mxu0 %v3426_v10 }
  0x2d   : > { %791 = vperm.xlu0 %3511, %v712_v18  }
  0x2e   : > { %796 = vperm.xlu1 %3512, %v713_v17  }
  0x30   : > { %553 = vmatpush.bf16.msra.mxu0 %v3425_v11 }
  0x32   : > { %801 = vperm.xlu2 %3513, %v714_v29  }
  0x33   : > { %554 = vmatmul.bf16.vlgmr.msra.gmra.mxu0 %v3404_v12 }
  0x35   : > { %806 = vperm.xlu0 %3511, %v715_v21  }
  0x36   : > { %811 = vperm.xlu1 %3512, %v716_v20  }
  0x3a   : > { %816 = vperm.xlu2 %3513, %v717_v30   ;;  %v722_v30 = vld [vmem:[%s5345_s1 + $0x98] sm:$0xff] }
  0x3d   : > { %821 = vperm.xlu0 %3511, %v718_v24  }
  0x3e   : > { %826 = vperm.xlu1 %3512, %v719_v23  }
  0x42   : > { %831 = vperm.xlu2 %3513, %v720_v32   ;;  %v721_v32 = vld [vmem:[%s5345_s1 + $0x90] sm:$0xff] }
  0x43   : > { %559 = vmatmul.bf16.gmra.mxu0 %v3405_v14 }
  0x53   : > { %564 = vmatmul.bf16.gmra.mxu0 %v3406_v19 }
  0x63   : > { %569 = vmatmul.bf16.gmra.mxu0 %v3407_v26 }
  0x73   : > { %574 = vmatmul.bf16.gmra.mxu0 %v3408_v28 }
  0x74   : > { %v767_v4 = vpop.permute.xlu2 %766 }
  0x7c   : > { %v772_v25 = vpop.permute.xlu2 %771 }
  0x83   : > { %579 = vmatmul.bf16.gmra.mxu0 %v3409_v31 }
  0x87   : > { %v747_v37 = vpop.permute.xlu0 %746 }
  0x88   : > { %v757_v48 = vpop.permute.xlu1 %756 }
  0x8f   : > { %v752_v43 = vpop.permute.xlu0 %751 }
  0x90   : > { %v762_v59 = vpop.permute.xlu1 %761 }
  0x93   : > { %584 = vmatmul.bf16.gmra.mxu0 %v3410_v33  ;;  %v3415_v33 = vld [vmem:[%s3720_s17 + $0x58] sm:$0xff] }
  0xa3   : > { %589 = vmatmul.bf16.gmra.mxu0 %v3411_v34 }
  0xb0   : > { %v555_v36 = vpop.f32.mrf.mxu0 }
  0xb1   : > { %v556_v40 = vadd.f32 %v3779_v38, %v555_v36 }
  0xb3   : > { %594 = vmatmul.bf16.gmra.mxu0 %v3412_v35  ;;  %v662_v44 = vmax.f32 %v556_v40, 0.0 }
  0xb5   : > { %v949_v49 = vmul.f32 %v747_v37, %v662_v44 }
  0xb7   : > { %v990_v52 = vpack.c.bf16 %v949_v49, %v949_v49 }
  0xb8   : > { %v557_v39 = vpop.f32.mrf.mxu0 }
  0xb9   : > { %v558_v41 = vadd.f32 %v3779_v38, %v557_v39  ;;  %v1067_v56 = vunpack.c.l.b16 %v990_v52 }
  0xbb   : > { %v663_v42 = vmax.f32 %v558_v41, 0.0 }
  0xbd   : > { %v950_v45 = vmul.f32 %v752_v43, %v663_v42 }
  0xbf   : > { %v991_v51 = vpack.c.bf16 %v950_v45, %v950_v45 }
  0xc0   : > { %v560_v47 = vpop.f32.mrf.mxu0 }
  0xc1   : > { %v561_v50 = vadd.f32 %v3779_v38, %v560_v47  ;;  %v1068_v54 = vunpack.c.l.b16 %v991_v51 }
  0xc3   : > { %599 = vmatmul.bf16.gmra.mxu0 %v3413_v46  ;;  %v664_v53 = vmax.f32 %v561_v50, 0.0  ;;  %v3786_v60 = vpack.c.b16 %v1068_v54, %v1067_v56  ;;  %v777_v46 = vpop.permute.xlu0 %776 }
  0xc5   : > { %v951_v57 = vmul.f32 %v757_v48, %v664_v53  ;;  %v1128_v2 = vshll.u32 %v3786_v60, 16  ;;  %v1310_v10 = vrot.slane %v3786_v60, 1  ;;  %v1126_v11 = vshrl.u32 %v3786_v60, 16 }
  0xc7   : > { %v992_v62 = vpack.c.bf16 %v951_v57, %v951_v57  ;;  %v1130_v9 = vrot.slane %v1128_v2, 1  ;;  %v782_v57 = vpop.permute.xlu1 %781  ;;  %v3416_v2 = vld [vmem:[%s3720_s17 + $0x60] sm:$0xff] }
  0xc8   : > { %v562_v55 = vpop.f32.mrf.mxu0 }
  0xc9   : > { %v563_v58 = vadd.f32 %v3779_v38, %v562_v55  ;;  %v1069_v5 = vunpack.c.l.b16 %v992_v62  ;;  %v1131_v17 = vor.u32 %v1130_v9, %v1126_v11 }
  0xcb   : > { %v665_v61 = vmax.f32 %v563_v58, 0.0 }
  0xcd   : > { %v952_v63 = vmul.f32 %v762_v59, %v665_v61 }
  0xcf   : > { %v993_v0 = vpack.c.bf16 %v952_v63, %v952_v63 }
  0xd0   : > { %v565_v3 = vpop.f32.mrf.mxu0 }
  0xd1   : > { %v1070_v6 = vunpack.c.l.b16 %v993_v0  ;;  %v566_v7 = vadd.f32 %v3779_v38, %v565_v3 }
  0xd3   : > { %v3791_v8 = vpack.c.b16 %v1070_v6, %v1069_v5  ;;  %604 = vmatmul.bf16.gmra.mxu0 %v3414_v1  ;;  %v666_v12 = vmax.f32 %v566_v7, 0.0  ;;  %v733_v1 = vld [vmem:[%s5345_s1 + $0xf0] sm:$0xff] }
  0xd5   : > { %v1311_v13 = vrot.slane %v3791_v8, 1  ;;  %v1133_v14 = vshll.u32 %v3791_v8, 16  ;;  %v1137_v15 = vshrl.u32 %v3791_v8, 16  ;;  %v953_v22 = vmul.f32 %v767_v4, %v666_v12 }
  0xd7   : > { %v1312_v16 = vsel %vm1309_vm0, %v1310_v10, %v1311_v13  ;;  %v1135_v18 = vrot.slane %v1133_v14, 1  ;;  %v1431_v19 = vrot.slane %v1133_v14, 2  ;;  %v1430_v21 = vrot.slane %v1137_v15, 1 }
  0xd8   : > { %v567_v20 = vpop.f32.mrf.mxu0  ;;  %1347 = vrot.lane.b32.xlu1 %v1312_v16, %s3584_s26  ;;  %v994_v28 = vpack.c.bf16 %v953_v22, %v953_v22 }
  0xd9   : > { %v568_v23 = vadd.f32 %v3779_v38, %v567_v20  ;;  %v1136_v24 = vsel %vm1124_vm1, %v1131_v17, %v1135_v18  ;;  %v1432_v26 = vor.u32 %v1431_v19, %v1430_v21  ;;  %v1139_v62 = vor.u32 %v1137_v15, %v1135_v18  ;;  %v787_v15 = vpop.permute.xlu2 %786 }
  0xda   : > { %1273 = vrot.lane.b32.xlu0 %v1136_v24, %s3585_s10  ;;  %v1071_v35 = vunpack.c.l.b16 %v994_v28 }
  0xdb   : > { %v667_v27 = vmax.f32 %v568_v23, 0.0 }
  0xdd   : > { %v954_v29 = vmul.f32 %v772_v25, %v667_v27 }
  0xdf   : > { %v995_v31 = vpack.c.bf16 %v954_v29, %v954_v29 }
  0xe0   : > { %v570_v34 = vpop.f32.mrf.mxu0  ;;  %841 = vperm.xlu1 %3512, %v722_v30  }
  0xe1   : > { %v1072_v36 = vunpack.c.l.b16 %v995_v31  ;;  %v571_v37 = vadd.f32 %v3779_v38, %v570_v34  ;;  %v730_v31 = vld [vmem:[%s5345_s1 + $0xd8] sm:$0xff] }
  0xe2   : > { %836 = vperm.xlu0 %3511, %v721_v32  }
  0xe3   : > { %v3811_v39 = vpack.c.b16 %v1072_v36, %v1071_v35  ;;  %609 = vmatmul.bf16.gmra.mxu0 %v3415_v33  ;;  %v668_v40 = vmax.f32 %v571_v37, 0.0  ;;  %v3417_v35 = vld [vmem:[%s3720_s17 + $0x68] sm:$0xff] }
  0xe5   : > { %v1313_v41 = vrot.slane %v3811_v39, 1  ;;  %v3815_v42 = vshll.u32 %v3811_v39, 16  ;;  %v1145_v43 = vshrl.u32 %v3811_v39, 16  ;;  %v955_v51 = vmul.f32 %v777_v46, %v668_v40 }
  0xe7   : > { %v1314_v44 = vsel %vm1309_vm0, %v1311_v13, %v1313_v41  ;;  %v1636_v45 = vrot.slane %v1145_v43, 2  ;;  %v1637_v48 = vrot.slane %v3815_v42, 3  ;;  %v1433_v49 = vrot.slane %v1145_v43, 1 }
  0xe8   : > { %v572_v47 = vpop.f32.mrf.mxu0  ;;  %1393 = vrot.lane.b32.xlu2 %v1314_v44, %s3586_s20  ;;  %v1434_v50 = vrot.slane %v3815_v42, 2  ;;  %v1143_v56 = vrot.slane %v3815_v42, 1  ;;  %v996_v59 = vpack.c.bf16 %v955_v51, %v955_v51  ;;  %v797_v51 = vpop.permute.xlu1 %796 }
  0xe9   : > { %v573_v52 = vadd.f32 %v3779_v38, %v572_v47  ;;  %v1638_v53 = vor.u32 %v1637_v48, %v1636_v45  ;;  %v729_v45 = vld [vmem:[%s5345_s1 + $0xd0] sm:$0xff] }
  0xea   : > { %1349 = vrot.lane.b32.xlu0 %v1314_v44, %s3584_s26  ;;  %v1435_v54 = vor.u32 %v1434_v50, %v1433_v49  ;;  %v1144_v0 = vsel %vm1124_vm1, %v1139_v62, %v1143_v56  ;;  %v1073_v4 = vunpack.c.l.b16 %v996_v59  ;;  %v1147_v32 = vor.u32 %v1145_v43, %v1143_v56  ;;  %v732_v43 = vld [vmem:[%s5345_s1 + $0xe8] sm:$0xff] }
  0xeb   : > { %v669_v55 = vmax.f32 %v573_v52, 0.0 }
  0xec   : > { %v3826_v58 = vsel %vm1429_vm2, %v1432_v26, %v1435_v54  ;;  %v792_v26 = vpop.permute.xlu0 %791 }
  0xed   : > { %5369 = vst [vmem:[#allocation5_spill] sm:$0xff] %v3826_v58  ;;  %v956_v61 = vmul.f32 %v782_v57, %v669_v55 }
  0xef   : > { %v997_v63 = vpack.c.bf16 %v956_v61, %v956_v61 }
  0xf0   : > { %v575_v3 = vpop.f32.mrf.mxu0  ;;  %1275 = vrot.lane.b32.xlu2 %v1144_v0, %s3585_s10 }
  0xf1   : > { %v1074_v5 = vunpack.c.l.b16 %v997_v63  ;;  %v576_v6 = vadd.f32 %v3779_v38, %v575_v3  ;;  %v802_v63 = vpop.permute.xlu2 %801 }
  0xf2   : > { %896 = vperm.xlu0 %3511, %v733_v1  }
  0xf3   : > { %v3835_v7 = vpack.c.b16 %v1074_v5, %v1073_v4  ;;  %614 = vmatmul.bf16.gmra.mxu0 %v3416_v2  ;;  %v670_v9 = vmax.f32 %v576_v6, 0.0  ;;  %v723_v4 = vld [vmem:[%s5345_s1 + $0xa0] sm:$0xff]  ;;  %v724_v6 = vld [vmem:[%s5345_s1 + $0xa8] sm:$0xff] }
  0xf4   : > { %v731_v5 = vld [vmem:[%s5345_s1 + $0xe0] sm:$0xff] }
  0xf5   : > { %v1315_v10 = vrot.slane %v3835_v7, 1  ;;  %v3839_v11 = vshll.u32 %v3835_v7, 16  ;;  %v3842_v12 = vshrl.u32 %v3835_v7, 16  ;;  %v957_v20 = vmul.f32 %v787_v15, %v670_v9 }
  0xf7   : > { %v1316_v13 = vsel %vm1309_vm0, %v1313_v41, %v1315_v10  ;;  %v1639_v14 = vrot.slane %v3842_v12, 2  ;;  %v1640_v17 = vrot.slane %v3839_v11, 3  ;;  %v1437_v18 = vrot.slane %v3842_v12, 1 }
  0xf8   : > { %v577_v16 = vpop.f32.mrf.mxu0  ;;  %1351 = vrot.lane.b32.xlu2 %v1316_v13, %s3584_s26  ;;  %1395 = vrot.lane.b32.xlu1 %v1316_v13, %s3586_s20  ;;  %v1438_v19 = vrot.slane %v3839_v11, 2  ;;  %v1151_v25 = vrot.slane %v3839_v11, 1  ;;  %v998_v29 = vpack.c.bf16 %v957_v20, %v957_v20  ;;  %v3439_v20 = vld [vmem:[%s5348_s4 + $0x30] sm:$0xff] }
  0xf9   : > { %v578_v21 = vadd.f32 %v3779_v38, %v577_v16  ;;  %v1641_v22 = vor.u32 %v1640_v17, %v1639_v14  ;;  %v3440_v14 = vld [vmem:[%s5348_s4 + $0x38] sm:$0xff] }
  0xfa   : > { %v1439_v23 = vor.u32 %v1438_v19, %v1437_v18  ;;  %v1152_v34 = vsel %vm1124_vm1, %v1147_v32, %v1151_v25  ;;  %v1075_v37 = vunpack.c.l.b16 %v998_v29  ;;  %2270 = vmatpush.bf16.msra.mxu1 %v3440_v14  ;;  %3453 = vmatpush.bf16.msra.mxu2 %v3440_v14  ;;  %v817_v14 = vpop.permute.xlu2 %816 }
  0xfb   : > { %v671_v24 = vmax.f32 %v578_v21, 0.0  ;;  %v3854_v27 = vsel %vm1635_vm3, %v1638_v53, %v1641_v22 }
  0xfc   : > { %v3857_v28 = vsel %vm1429_vm2, %v1435_v54, %v1439_v23 }
  0xfd   : > { %5370 = vst [vmem:[#allocation6_spill] sm:$0xff] %v3857_v28  ;;  %v958_v30 = vmul.f32 %v792_v26, %v671_v24  ;;  %v1155_v26 = vor.u32 %v3842_v12, %v1151_v25 }
  0xfe   : > { %2271 = vmatpush.bf16.msra.mxu1 %v3439_v20  ;;  %3454 = vmatpush.bf16.msra.mxu2 %v3439_v20 }
  0xff   : > { %v999_v33 = vpack.c.bf16 %v958_v30, %v958_v30 }
 0x100   : > { %v580_v36 = vpop.f32.mrf.mxu0  ;;  %881 = vperm.xlu2 %3513, %v730_v31   ;;  %1277 = vrot.lane.b32.xlu1 %v1152_v34, %s3585_s10  ;;  %v807_v31 = vpop.permute.xlu0 %806 }
 0x101   : > { %v1076_v40 = vunpack.c.l.b16 %v999_v33  ;;  %v581_v41 = vadd.f32 %v3779_v38, %v580_v36  ;;  %v3438_v36 = vld [vmem:[%s5348_s4 + $0x28] sm:$0xff] }
 0x102   : > { %2272 = vmatpush.bf16.msra.mxu1 %v3438_v36  ;;  %3455 = vmatpush.bf16.msra.mxu2 %v3438_v36 }
 0x103   : > { %v3868_v42 = vpack.c.b16 %v1076_v40, %v1075_v37  ;;  %619 = vmatmul.bf16.gmra.mxu0 %v3417_v35  ;;  %v672_v44 = vmax.f32 %v581_v41, 0.0 }
 0x105   : > { %v1317_v46 = vrot.slane %v3868_v42, 1  ;;  %v3878_v47 = vshll.u32 %v3868_v42, 16  ;;  %v3881_v48 = vshrl.u32 %v3868_v42, 16  ;;  %v959_v56 = vmul.f32 %v797_v51, %v672_v44 }
 0x107   : > { %v1318_v49 = vsel %vm1309_vm0, %v1315_v10, %v1317_v46  ;;  %v1643_v50 = vrot.slane %v3881_v48, 2  ;;  %v1644_v53 = vrot.slane %v3878_v47, 3  ;;  %v1441_v54 = vrot.slane %v3881_v48, 1  ;;  %v3418_v10 = vld [vmem:[%s3720_s17 + $0x70] sm:$0xff] }
 0x108   : > { %v582_v52 = vpop.f32.mrf.mxu0  ;;  %891 = vperm.xlu2 %3513, %v732_v43   ;;  %876 = vperm.xlu1 %3512, %v729_v45   ;;  %v1442_v55 = vrot.slane %v3878_v47, 2  ;;  %v1000_v2 = vpack.c.bf16 %v959_v56, %v959_v56  ;;  %v1159_v19 = vrot.slane %v3878_v47, 1  ;;  %v812_v43 = vpop.permute.xlu1 %811  ;;  %v3437_v45 = vld [vmem:[%s5348_s4 + $0x20] sm:$0xff] }
 0x109   : > { %v583_v57 = vadd.f32 %v3779_v38, %v582_v52  ;;  %1397 = vrot.lane.b32.xlu0 %v1318_v49, %s3586_s20  ;;  %v1645_v59 = vor.u32 %v1644_v53, %v1643_v50  ;;  %v734_v52 = vld [vmem:[%s5345_s1 + $0xf8] sm:$0xff]  ;;  %2273 = vmatpush.bf16.msra.mxu1 %v3437_v45 }
 0x10a   : > { %v1443_v61 = vor.u32 %v1442_v55, %v1441_v54  ;;  %v1077_v15 = vunpack.c.l.b16 %v1000_v2  ;;  %v1160_v33 = vsel %vm1124_vm1, %v1155_v26, %v1159_v19  ;;  %v1163_v51 = vor.u32 %v3881_v48, %v1159_v19  ;;  %v3419_v55 = vld [vmem:[%s3720_s17 + $0x78] sm:$0xff]  ;;  %3456 = vmatpush.bf16.msra.mxu2 %v3437_v45 }
 0x10b   : > { %v673_v62 = vmax.f32 %v583_v57, 0.0  ;;  %v3891_v0 = vsel %vm1635_vm3, %v1641_v22, %v1645_v59  ;;  %v3436_v57 = vld [vmem:[%s5348_s4 + $0x18] sm:$0xff] }
 0x10c   : > { %v3894_v1 = vsel %vm1429_vm2, %v1439_v23, %v1443_v61 }
 0x10d   : > { %5371 = vst [vmem:[#allocation7_spill] sm:$0xff] %v3894_v1  ;;  %v960_v3 = vmul.f32 %v802_v63, %v673_v62  ;;  %2274 = vmatpush.bf16.msra.mxu1 %v3436_v57  ;;  %v3435_v63 = vld [vmem:[%s5348_s4 + $0x10] sm:$0xff] }
 0x10e   : > { %3457 = vmatpush.bf16.msra.mxu2 %v3436_v57 }
 0x10f   : > { %v1001_v9 = vpack.c.bf16 %v960_v3, %v960_v3  ;;  %v736_v3 = vld [vmem:[%s5345_s1 + $0x108] sm:$0xff] }
 0x110   : > { %v585_v13 = vpop.f32.mrf.mxu0  ;;  %846 = vperm.xlu2 %3513, %v723_v4   ;;  %886 = vperm.xlu1 %3512, %v731_v5   ;;  %v735_v4 = vld [vmem:[%s5345_s1 + $0x100] sm:$0xff]  ;;  %v827_v57 = vpop.permute.xlu1 %826 }
 0x111   : > { %v1078_v16 = vunpack.c.l.b16 %v1001_v9  ;;  %v586_v17 = vadd.f32 %v3779_v38, %v585_v13  ;;  %851 = vperm.xlu0 %3511, %v724_v6   ;;  %2275 = vmatpush.bf16.msra.mxu1 %v3435_v63 }
 0x112   : > { %3458 = vmatpush.bf16.msra.mxu2 %v3435_v63 }
 0x113   : > { %v3910_v18 = vpack.c.b16 %v1078_v16, %v1077_v15  ;;  %624 = vmatmul.bf16.gmra.mxu0 %v3418_v10  ;;  %v674_v21 = vmax.f32 %v586_v17, 0.0  ;;  %v3434_v16 = vld [vmem:[%s5348_s4 + $0x8] sm:$0xff] }
 0x115   : > { %v1319_v22 = vrot.slane %v3910_v18, 1  ;;  %v3918_v23 = vshll.u32 %v3910_v18, 16  ;;  %v3921_v24 = vshrl.u32 %v3910_v18, 16  ;;  %v961_v25 = vmul.f32 %v807_v31, %v674_v21  ;;  %2276 = vmatpush.bf16.msra.mxu1 %v3434_v16  ;;  %v822_v31 = vpop.permute.xlu0 %821 }
 0x116   : > { %3459 = vmatpush.bf16.msra.mxu2 %v3434_v16 }
 0x117   : > { %v1320_v29 = vsel %vm1309_vm0, %v1317_v46, %v1319_v22  ;;  %v1647_v30 = vrot.slane %v3921_v24, 2  ;;  %v1648_v34 = vrot.slane %v3918_v23, 3  ;;  %v1445_v11 = vrot.slane %v3921_v24, 1 }
 0x118   : > { %v587_v32 = vpop.f32.mrf.mxu0  ;;  %1399 = vrot.lane.b32.xlu2 %v1320_v29, %s3586_s20  ;;  %1353 = vrot.lane.b32.xlu1 %v1318_v49, %s3584_s26  ;;  %v1446_v12 = vrot.slane %v3918_v23, 2  ;;  %v1167_v44 = vrot.slane %v3918_v23, 1  ;;  %v1002_v49 = vpack.c.bf16 %v961_v25, %v961_v25 }
 0x119   : > { %v588_v35 = vadd.f32 %v3779_v38, %v587_v32  ;;  %1279 = vrot.lane.b32.xlu0 %v1160_v33, %s3585_s10  ;;  %v1649_v37 = vor.u32 %v1648_v34, %v1647_v30  ;;  %v3433_v32 = vld [vmem:[%s5348_s4] sm:$0xff] }
 0x11a   : > { %v1447_v40 = vor.u32 %v1446_v12, %v1445_v11  ;;  %v1168_v54 = vsel %vm1124_vm1, %v1163_v51, %v1167_v44  ;;  %v1171_v25 = vor.u32 %v3921_v24, %v1167_v44  ;;  %2277 = vmatpush.bf16.msra.mxu1 %v3433_v32  ;;  %3460 = vmatpush.bf16.msra.mxu2 %v3433_v32  ;;  %v726_v51 = vld [vmem:[%s5345_s1 + $0xb8] sm:$0xff] }
 0x11b   : > { %v675_v41 = vmax.f32 %v588_v35, 0.0  ;;  %v3944_v46 = vsel %vm1635_vm3, %v1645_v59, %v1649_v37  ;;  %v1079_v59 = vunpack.c.l.b16 %v1002_v49  ;;  %v725_v35 = vld [vmem:[%s5345_s1 + $0xb0] sm:$0xff] }
 0x11c   : > { %v3947_v47 = vsel %vm1429_vm2, %v1443_v61, %v1447_v40 }
 0x11d   : > { %5372 = vst [vmem:[#allocation8_spill] sm:$0xff] %v3947_v47  ;;  %v962_v50 = vmul.f32 %v812_v43, %v675_v41  ;;  %v3420_v43 = vld [vmem:[%s3720_s17 + $0x80] sm:$0xff] }
 0x11f   : > { %v1003_v53 = vpack.c.bf16 %v962_v50, %v962_v50  ;;  %v737_v50 = vld [vmem:[%s5345_s1 + $0x110] sm:$0xff] }
 0x120   : > { %v590_v56 = vpop.f32.mrf.mxu0  ;;  %1281 = vrot.lane.b32.xlu2 %v1168_v54, %s3585_s10  ;;  %901 = vperm.xlu1 %3512, %v734_v52  }
 0x121   : > { %v1080_v48 = vunpack.c.l.b16 %v1003_v53  ;;  %v591_v61 = vadd.f32 %v3779_v38, %v590_v56  ;;  %1355 = vrot.lane.b32.xlu0 %v1320_v29, %s3584_s26 }
 0x123   : > { %v3961_v62 = vpack.c.b16 %v1080_v48, %v1079_v59  ;;  %629 = vmatmul.bf16.gmra.mxu0 %v3419_v55  ;;  %v676_v2 = vmax.f32 %v591_v61, 0.0 }
 0x125   : > { %v1321_v5 = vrot.slane %v3961_v62, 1  ;;  %v3974_v6 = vshll.u32 %v3961_v62, 16  ;;  %v3977_v9 = vshrl.u32 %v3961_v62, 16  ;;  %v963_v21 = vmul.f32 %v817_v14, %v676_v2 }
 0x127   : > { %v1322_v10 = vsel %vm1309_vm0, %v1319_v22, %v1321_v5  ;;  %v1651_v13 = vrot.slane %v3977_v9, 2  ;;  %v1652_v17 = vrot.slane %v3974_v6, 3  ;;  %v1449_v19 = vrot.slane %v3977_v9, 1 }
 0x128   : > { %v592_v15 = vpop.f32.mrf.mxu0  ;;  %911 = vperm.xlu2 %3513, %v736_v3   ;;  %906 = vperm.xlu1 %3512, %v735_v4   ;;  %v1450_v20 = vrot.slane %v3974_v6, 2  ;;  %v1175_v30 = vrot.slane %v3974_v6, 1  ;;  %v1004_v11 = vpack.c.bf16 %v963_v21, %v963_v21  ;;  %v832_v4 = vpop.permute.xlu2 %831  ;;  %v738_v21 = vld [vmem:[%s5345_s1 + $0x118] sm:$0xff] }
 0x129   : > { %v593_v22 = vadd.f32 %v3779_v38, %v592_v15  ;;  %1401 = vrot.lane.b32.xlu0 %v1322_v10, %s3586_s20  ;;  %v1653_v23 = vor.u32 %v1652_v17, %v1651_v13 }
 0x12a   : > { %v1451_v26 = vor.u32 %v1450_v20, %v1449_v19  ;;  %v1176_v41 = vsel %vm1124_vm1, %v1171_v25, %v1175_v30  ;;  %v1179_v19 = vor.u32 %v3977_v9, %v1175_v30  ;;  %v727_v20 = vld [vmem:[%s5345_s1 + $0xc0] sm:$0xff] }
 0x12b   : > { %v677_v29 = vmax.f32 %v593_v22, 0.0  ;;  %v3994_v33 = vsel %vm1635_vm3, %v1649_v37, %v1653_v23  ;;  %v1081_v37 = vunpack.c.l.b16 %v1004_v11  ;;  %v728_v11 = vld [vmem:[%s5345_s1 + $0xc8] sm:$0xff] }
 0x12c   : > { %v3997_v34 = vsel %vm1429_vm2, %v1447_v40, %v1451_v26 }
 0x12d   : > { %5373 = vst [vmem:[#allocation9_spill] sm:$0xff] %v3997_v34  ;;  %v964_v12 = vmul.f32 %v822_v31, %v677_v29  ;;  %v3421_v29 = vld [vmem:[%s3720_s17 + $0x88] sm:$0xff] }
 0x12f   : > { %v1005_v36 = vpack.c.bf16 %v964_v12, %v964_v12 }
 0x130   : > { %v595_v45 = vpop.f32.mrf.mxu0  ;;  %1357 = vrot.lane.b32.xlu2 %v1322_v10, %s3584_s26  ;;  %1283 = vrot.lane.b32.xlu1 %v1176_v41, %s3585_s10 }
 0x131   : > { %v1082_v40 = vunpack.c.l.b16 %v1005_v36  ;;  %v596_v49 = vadd.f32 %v3779_v38, %v595_v45  ;;  %856 = vperm.xlu0 %3511, %v725_v35  }
 0x133   : > { %v4008_v24 = vpack.c.b16 %v1082_v40, %v1081_v37  ;;  %634 = vmatmul.bf16.gmra.mxu0 %v3420_v43  ;;  %v678_v44 = vmax.f32 %v596_v49, 0.0 }
 0x135   : > { %v1323_v52 = vrot.slane %v4008_v24, 1  ;;  %v4018_v53 = vshll.u32 %v4008_v24, 16  ;;  %v4021_v54 = vshrl.u32 %v4008_v24, 16  ;;  %v965_v2 = vmul.f32 %v827_v57, %v678_v44 }
 0x137   : > { %v1324_v55 = vsel %vm1309_vm0, %v1321_v5, %v1323_v52  ;;  %v1655_v56 = vrot.slane %v4021_v54, 2  ;;  %v1656_v48 = vrot.slane %v4018_v53, 3  ;;  %v1453_v61 = vrot.slane %v4021_v54, 1 }
 0x138   : > { %v597_v59 = vpop.f32.mrf.mxu0  ;;  %916 = vperm.xlu2 %3513, %v737_v50   ;;  %861 = vperm.xlu1 %3512, %v726_v51   ;;  %v1454_v63 = vrot.slane %v4018_v53, 2  ;;  %v1183_v13 = vrot.slane %v4018_v53, 1  ;;  %v1006_v16 = vpack.c.bf16 %v965_v2, %v965_v2 }
 0x139   : > { %v598_v3 = vadd.f32 %v3779_v38, %v597_v59  ;;  %1403 = vrot.lane.b32.xlu0 %v1324_v55, %s3586_s20  ;;  %v1657_v5 = vor.u32 %v1656_v48, %v1655_v56  ;;  %v740_v48 = vld [vmem:[%s5345_s1 + $0x128] sm:$0xff] }
 0x13a   : > { %v1455_v6 = vor.u32 %v1454_v63, %v1453_v61  ;;  %v1083_v31 = vunpack.c.l.b16 %v1006_v16  ;;  %v739_v61 = vld [vmem:[%s5345_s1 + $0x120] sm:$0xff] }
 0x13b   : > { %v679_v10 = vmax.f32 %v598_v3, 0.0  ;;  %v4032_v14 = vsel %vm1635_vm3, %v1653_v23, %v1657_v5  ;;  %v1184_v23 = vsel %vm1124_vm1, %v1179_v19, %v1183_v13 }
 0x13c   : > { %5374 = vst [vmem:[#allocation10_spill] sm:$0xff] %v4032_v14  ;;  %v4035_v15 = vsel %vm1429_vm2, %v1451_v26, %v1455_v6 }
 0x13d   : > { %5375 = vst [vmem:[#allocation11_spill] sm:$0xff] %v4035_v15  ;;  %v966_v17 = vmul.f32 %v832_v4, %v679_v10  ;;  %v3422_v4 = vld [vmem:[%s3720_s17 + $0x90] sm:$0xff] }
 0x13f   : > { %v1007_v22 = vpack.c.bf16 %v966_v17, %v966_v17 }
 0x140   : > { %v600_v26 = vpop.f32.mrf.mxu0  ;;  %1285 = vrot.lane.b32.xlu2 %v1184_v23, %s3585_s10  ;;  %866 = vperm.xlu1 %3512, %v727_v20   ;;  %v1187_v23 = vor.u32 %v4021_v54, %v1183_v13 }
 0x141   : > { %v1084_v9 = vunpack.c.l.b16 %v1007_v22  ;;  %921 = vperm.xlu0 %3511, %v738_v21   ;;  %v601_v2 = vadd.f32 %v3779_v38, %v600_v26 }
 0x142   : > { %v1394_v30 = vpop.permute.xlu2 %1393 }
 0x143   : > { %v4049_v32 = vpack.c.b16 %v1084_v9, %v1083_v31  ;;  %639 = vmatmul.bf16.gmra.mxu0 %v3421_v29  ;;  %v680_v16 = vmax.f32 %v601_v2, 0.0 }
 0x145   : > { %v1325_v12 = vrot.slane %v4049_v32, 1  ;;  %v4056_v25 = vshll.u32 %v4049_v32, 16  ;;  %v4059_v35 = vshrl.u32 %v4049_v32, 16 }
 0x147   : > { %v1326_v36 = vsel %vm1309_vm0, %v1323_v52, %v1325_v12  ;;  %v1659_v41 = vrot.slane %v4059_v35, 2  ;;  %v1660_v45 = vrot.slane %v4056_v25, 3  ;;  %v1457_v37 = vrot.slane %v4059_v35, 1 }
 0x148   : > { %v602_v43 = vpop.f32.mrf.mxu0  ;;  %871 = vperm.xlu2 %3513, %v728_v11   ;;  %1405 = vrot.lane.b32.xlu1 %v1326_v36, %s3586_s20  ;;  %v1458_v40 = vrot.slane %v4056_v25, 2  ;;  %v5354_v20 = vrot.slane %v4056_v25, 1 }
 0x149   : > { %1359 = vrot.lane.b32.xlu0 %v1324_v55, %s3584_s26  ;;  %v1661_v50 = vor.u32 %v1660_v45, %v1659_v41  ;;  %v603_v59 = vadd.f32 %v3779_v38, %v602_v43 }
 0x14a   : > { %v1276_v49 = vpop.permute.xlu2 %1275  ;;  %v1348_v44 = vpop.permute.xlu1 %1347  ;;  %v1459_v51 = vor.u32 %v1458_v40, %v1457_v37  ;;  %v1192_v31 = vsel %vm1124_vm1, %v1187_v23, %v5354_v20 }
 0x14b   : > { %v4069_v56 = vsel %vm1635_vm3, %v1657_v5, %v1661_v50  ;;  %v1799_v2 = vsel %vm1795_vm5, %v3791_v8, %v1276_v49 }
 0x14c   : > { %v1274_v52 = vpop.permute.xlu0 %1273  ;;  %5376 = vst [vmem:[#allocation12_spill] sm:$0xff] %v4069_v56  ;;  %v4072_v57 = vsel %vm1429_vm2, %v1455_v6, %v1459_v51  ;;  %v681_v6 = vmax.f32 %v603_v59, 0.0 }
 0x14d   : > { %5377 = vst [vmem:[#allocation13_spill] sm:$0xff] %v4072_v57  ;;  %v1797_v55 = vsel %vm1795_vm5, %v3786_v60, %v1274_v52 }
 0x14e   : > { %v1834_v63 = vsel %vm1832_vm4, %v1797_v55, %v1348_v44 }
 0x14f   : > { %v1871_v3 = vsel %vm1869_vm6, %v1834_v63, %v1394_v30 }
 0x150   : > { %v605_v5 = vpop.f32.mrf.mxu0  ;;  %931 = vperm.xlu1 %3512, %v740_v48   ;;  %2278 = vmatmul.bf16.vlgmr.msra.gmra.mxu1 %v1871_v3 }
 0x151   : > { %926 = vperm.xlu0 %3511, %v739_v61   ;;  %v606_v49 = vadd.f32 %v3779_v38, %v605_v5 }
 0x152   : > { %v1352_v60 = vpop.permute.xlu2 %1351  ;;  %v842_v10 = vpop.permute.xlu1 %841 }
 0x153   : > { %v968_v17 = vmul.f32 %v842_v10, %v681_v6  ;;  %644 = vmatmul.bf16.gmra.mxu0 %v3422_v4  ;;  %v3423_v10 = vld [vmem:[%s3720_s17 + $0x98] sm:$0xff] }
 0x154   : > { %v837_v19 = vpop.permute.xlu0 %836 }
 0x155   : > { %v1009_v21 = vpack.c.bf16 %v968_v17, %v968_v17  ;;  %v967_v22 = vmul.f32 %v837_v19, %v680_v16 }
 0x157   : > { %v1008_v29 = vpack.c.bf16 %v967_v22, %v967_v22  ;;  %v1086_v9 = vunpack.c.l.b16 %v1009_v21 }
 0x158   : > { %v607_v26 = vpop.f32.mrf.mxu0  ;;  %1361 = vrot.lane.b32.xlu1 %v1326_v36, %s3584_s26 }
 0x159   : > { %v1085_v30 = vunpack.c.l.b16 %v1008_v29  ;;  %1287 = vrot.lane.b32.xlu0 %v1192_v31, %s3585_s10 }
 0x15a   : > { %v4096_v11 = vpop.permute.xlu2 %881 }
 0x15b   : > { %v4098_v41 = vpack.c.b16 %v1086_v9, %v1085_v30 }
 0x15c   : > { %v1350_v61 = vpop.permute.xlu0 %1349 }
 0x15d   : > { %v5353_v53 = vrot.slane %v4098_v41, 1  ;;  %v4102_v54 = vshll.u32 %v4098_v41, 16  ;;  %v4105_v13 = vshrl.u32 %v4098_v41, 16  ;;  %v1836_v3 = vsel %vm1832_vm4, %v1799_v2, %v1350_v61  ;;  %v3450_v61 = vld [vmem:[%s5348_s4 + $0x88] sm:$0xff] }
 0x15e   : > { %3461 = vmatpush.bf16.msra.mxu3 %v3450_v61  ;;  %2474 = vmatpush.bf16.msrb.mxu1 %v3450_v61 }
 0x15f   : > { %v4110_v36 = vsel %vm1309_vm0, %v1325_v12, %v5353_v53  ;;  %v1663_v43 = vrot.slane %v4105_v13, 2  ;;  %v1664_v45 = vrot.slane %v4102_v54, 3  ;;  %v1461_v40 = vrot.slane %v4105_v13, 1 }
 0x160   : > { %v4114_v37 = vpop.f32.mrf.mxu0  ;;  %1407 = vrot.lane.b32.xlu2 %v4110_v36, %s3586_s20  ;;  %v1462_v44 = vrot.slane %v4102_v54, 2 }
 0x161   : > { %v4120_v52 = vor.u32 %v1664_v45, %v1663_v43  ;;  %v682_v43 = vmax.f32 %v606_v49, 0.0  ;;  %v608_v45 = vadd.f32 %v3779_v38, %v607_v26  ;;  %v3449_v26 = vld [vmem:[%s5348_s4 + $0x80] sm:$0xff] }
 0x162   : > { %v4122_v59 = vpop.permute.xlu2 %891  ;;  %v4124_v12 = vor.u32 %v1462_v44, %v1461_v40  ;;  %3462 = vmatpush.bf16.msra.mxu3 %v3449_v26  ;;  %2475 = vmatpush.bf16.msrb.mxu1 %v3449_v26 }
 0x163   : > { %v4128_v55 = vsel %vm1635_vm3, %v1661_v50, %v4120_v52  ;;  %649 = vmatmul.bf16.gmra.mxu0 %v3423_v10  ;;  %v683_v2 = vmax.f32 %v608_v45, 0.0 }
 0x164   : > { %5378 = vst [vmem:[#allocation14_spill] sm:$0xff] %v4128_v55  ;;  %v4132_v48 = vsel %vm1429_vm2, %v1459_v51, %v4124_v12  ;;  %v4143_v19 = vpop.permute.xlu0 %896 }
 0x165   : > { %5379 = vst [vmem:[#allocation15_spill] sm:$0xff] %v4132_v48 }
 0x168   : > { %v4134_v63 = vpop.f32.mrf.mxu0 }
 0x16a   : > { %v847_v4 = vpop.permute.xlu2 %846  ;;  %v1396_v6 = vpop.permute.xlu1 %1395 }
 0x16b   : > { %v1874_v16 = vsel %vm1869_vm6, %v1836_v3, %v1396_v6  ;;  %v969_v40 = vmul.f32 %v847_v4, %v682_v43 }
 0x16c   : > { %2283 = vmatmul.bf16.gmra.mxu1 %v1874_v16 }
 0x170   : > { %v4141_v50 = vpop.f32.mrf.mxu0 }
 0x172   : > { %v1400_v17 = vpop.permute.xlu2 %1399  ;;  %v1278_v51 = vpop.permute.xlu1 %1277 }
 0x173   : > { %v1801_v21 = vsel %vm1795_vm5, %v3811_v39, %v1278_v51 }
 0x174   : > { %v1838_v9 = vsel %vm1832_vm4, %v1801_v21, %v1352_v60  ;;  %v1010_v60 = vpack.c.bf16 %v969_v40, %v969_v40 }
 0x176   : > { %v1087_v21 = vunpack.c.l.b16 %v1010_v60 }
 0x178   : > { %v4147_v22 = vpop.f32.mrf.mxu0 }
 0x17a   : > { %v4150_v23 = vpop.permute.xlu2 %1281  ;;  %v877_v29 = vpop.permute.xlu1 %876 }
 0x17b   : > { %v1398_v31 = vpop.permute.xlu0 %1397  ;;  %v1805_v47 = vsel %vm1795_vm5, %v3868_v42, %v4150_v23 }
 0x17c   : > { %v1877_v30 = vsel %vm1869_vm6, %v1838_v9, %v1398_v31 }
 0x17d   : > { %2288 = vmatmul.bf16.gmra.mxu1 %v1877_v30 }
 0x180   : > { %v620_v44 = vpop.f32.mrf.mxu0 }
 0x181   : > { %v621_v5 = vadd.f32 %v3779_v38, %v620_v44 }
 0x182   : > { %v887_v3 = vpop.permute.xlu1 %886  ;;  %v4159_v10 = vpop.permute.xlu2 %911 }
 0x183   : > { %v852_v6 = vpop.permute.xlu0 %851  ;;  %v688_v4 = vmax.f32 %v621_v5, 0.0 }
 0x184   : > { %v970_v16 = vmul.f32 %v852_v6, %v683_v2 }
 0x185   : > { %v975_v9 = vmul.f32 %v877_v29, %v688_v4 }
 0x186   : > { %v1011_v51 = vpack.c.bf16 %v970_v16, %v970_v16 }
 0x187   : > { %v1016_v6 = vpack.c.bf16 %v975_v9, %v975_v9 }
 0x188   : > { %v1088_v49 = vunpack.c.l.b16 %v1011_v51  ;;  %v622_v31 = vpop.f32.mrf.mxu0 }
 0x189   : > { %v623_v30 = vadd.f32 %v3779_v38, %v622_v31  ;;  %v1093_v9 = vunpack.c.l.b16 %v1016_v6 }
 0x18a   : > { %v4165_v43 = vpack.c.b16 %v1088_v49, %v1087_v21  ;;  %v1354_v45 = vpop.permute.xlu1 %1353  ;;  %v4177_v16 = vpop.permute.xlu2 %1357 }
 0x18b   : > { %v689_v40 = vmax.f32 %v623_v30, 0.0  ;;  %v1280_v44 = vpop.permute.xlu0 %1279 }
 0x18c   : > { %v1803_v61 = vsel %vm1795_vm5, %v3835_v7, %v1280_v44  ;;  %v4170_v2 = vshll.u32 %v4165_v43, 16  ;;  %v4173_v5 = vshrl.u32 %v4165_v43, 16 }
 0x18d   : > { %v976_v60 = vmul.f32 %v4096_v11, %v689_v40  ;;  %v1840_v29 = vsel %vm1832_vm4, %v1803_v61, %v1354_v45 }
 0x18e   : > { %v1880_v26 = vsel %vm1869_vm6, %v1840_v29, %v1400_v17  ;;  %v1667_v4 = vrot.slane %v4173_v5, 2  ;;  %v1668_v21 = vrot.slane %v4170_v2, 3  ;;  %v1465_v49 = vrot.slane %v4173_v5, 1 }
 0x18f   : > { %v1017_v51 = vpack.c.bf16 %v976_v60, %v976_v60  ;;  %2293 = vmatmul.bf16.gmra.mxu1 %v1880_v26  ;;  %v1466_v30 = vrot.slane %v4170_v2, 2 }
 0x190   : > { %v625_v31 = vpop.f32.mrf.mxu0  ;;  %v4185_v45 = vor.u32 %v1668_v21, %v1667_v4 }
 0x191   : > { %v1094_v44 = vunpack.c.l.b16 %v1017_v51  ;;  %v626_v11 = vadd.f32 %v3779_v38, %v625_v31  ;;  %v4189_v17 = vor.u32 %v1466_v30, %v1465_v49 }
 0x192   : > { %v4187_v40 = vpop.permute.xlu1 %901  ;;  %v4196_v29 = vsel %vm1635_vm3, %v4120_v52, %v4185_v45  ;;  %v4209_v31 = vpop.permute.xlu2 %916 }
 0x193   : > { %v4191_v61 = vpack.c.b16 %v1094_v44, %v1093_v9  ;;  %v1356_v60 = vpop.permute.xlu0 %1355  ;;  %v4201_v6 = vsel %vm1429_vm2, %v4124_v12, %v4189_v17  ;;  %v690_v26 = vmax.f32 %v626_v11, 0.0 }
 0x194   : > { %5380 = vst [vmem:[#allocation16_spill] sm:$0xff] %v4201_v6  ;;  %v1842_v1 = vsel %vm1832_vm4, %v1805_v47, %v1356_v60 }
 0x195   : > { %v4204_v4 = vshll.u32 %v4191_v61, 16  ;;  %v1233_v51 = vshrl.u32 %v4191_v61, 16  ;;  %v977_v44 = vmul.f32 %v887_v3, %v690_v26 }
 0x197   : > { %v1680_v21 = vrot.slane %v4204_v4, 3  ;;  %v1478_v49 = vrot.slane %v4204_v4, 2  ;;  %v1679_v52 = vrot.slane %v1233_v51, 2  ;;  %v1477_v9 = vrot.slane %v1233_v51, 1 }
 0x198   : > { %v627_v30 = vpop.f32.mrf.mxu0  ;;  %v1018_v48 = vpack.c.bf16 %v977_v44, %v977_v44 }
 0x199   : > { %v628_v53 = vadd.f32 %v3779_v38, %v627_v30  ;;  %v4214_v11 = vor.u32 %v1680_v21, %v1679_v52  ;;  %v4216_v20 = vor.u32 %v1478_v49, %v1477_v9  ;;  %v611_v21 = vadd.f32 %v3779_v38, %v4114_v37  ;;  %v4229_v52 = vld [vmem:[%s5347_s3] ss:$0 sm:$0xff] }
 0x19a   : > { %v4212_v12 = vpop.permute.xlu1 %906  ;;  %v1095_v30 = vunpack.c.l.b16 %v1018_v48  ;;  %v613_v47 = vadd.f32 %v4229_v52, %v4134_v63  ;;  %v5355_v37 = vrot.slane %v4191_v61, 3  ;;  %v5359_v48 = vrot.slane %v4204_v4, 1 }
 0x19b   : > { %v691_v6 = vmax.f32 %v628_v53, 0.0  ;;  %v1402_v34 = vpop.permute.xlu0 %1401  ;;  %v684_v38 = vmax.f32 %v611_v21, 0.0  ;;  %v5356_v9 = vrot.slane %v4191_v61, 1  ;;  %v618_v21 = vadd.f32 %v4229_v52, %v4147_v22 }
 0x19c   : > { %v1883_v3 = vsel %vm1869_vm6, %v1842_v1, %v1402_v34  ;;  %v1235_v22 = vor.u32 %v1233_v51, %v5359_v48 }
 0x19d   : > { %v978_v57 = vmul.f32 %v4122_v59, %v691_v6  ;;  %v4234_v59 = vpop.permute.xlu2 %1285 }
 0x19f   : > { %v1019_v26 = vpack.c.bf16 %v978_v57, %v978_v57  ;;  %2298 = vmatmul.bf16.gmra.mxu1 %v1883_v3  ;;  %v685_v3 = vmax.f32 %v613_v47, 0.0 }
 0x1a0   : > { %v630_v49 = vpop.f32.mrf.mxu0 }
 0x1a1   : > { %v1096_v53 = vunpack.c.l.b16 %v1019_v26  ;;  %v631_v23 = vadd.f32 %v4229_v52, %v630_v49 }
 0x1a2   : > { %v1284_v1 = vpop.permute.xlu1 %1283 }
 0x1a3   : > { %v4236_v34 = vpack.c.b16 %v1096_v53, %v1095_v30  ;;  %v857_v57 = vpop.permute.xlu0 %856  ;;  %v692_v60 = vmax.f32 %v631_v23, 0.0  ;;  %v1807_v23 = vsel %vm1795_vm5, %v3910_v18, %v1284_v1 }
 0x1a4   : > { %v971_v49 = vmul.f32 %v857_v57, %v684_v38  ;;  %v1844_v56 = vsel %vm1832_vm4, %v1807_v23, %v4177_v16 }
 0x1a5   : > { %v5358_v6 = vrot.slane %v4236_v34, 3  ;;  %v5357_v44 = vrot.slane %v4236_v34, 1  ;;  %v4244_v63 = vshll.u32 %v4236_v34, 16  ;;  %v4247_v26 = vshrl.u32 %v4236_v34, 16 }
 0x1a6   : > { %v1012_v15 = vpack.c.bf16 %v971_v49, %v971_v49  ;;  %v5383_v49 = vrot.slane %v4056_v25, 1 }
 0x1a7   : > { %v1782_v30 = vsel %vm1757_vm7, %v5355_v37, %v5358_v6  ;;  %v4261_v53 = vsel %vm1309_vm0, %v5356_v9, %v5357_v44  ;;  %v1239_v57 = vrot.slane %v4244_v63, 1  ;;  %v1683_v38 = vrot.slane %v4247_v26, 2 }
 0x1a8   : > { %v632_v47 = vpop.f32.mrf.mxu0  ;;  %3368 = vmatmul.msk.bf16.vlgmr.msra.gmra.mxu3 %vm1795_vm5, %v1782_v30  ;;  %1373 = vrot.lane.b32.xlu0 %v4261_v53, %s3584_s26  ;;  %v979_v37 = vmul.f32 %v4143_v19, %v692_v60  ;;  %v1684_v44 = vrot.slane %v4244_v63, 3  ;;  %v1481_v1 = vrot.slane %v4247_v26, 1  ;;  %v1482_v28 = vrot.slane %v4244_v63, 2 }
 0x1a9   : > { %v633_v9 = vadd.f32 %v4229_v52, %v632_v47  ;;  %v1240_v30 = vsel %vm1124_vm1, %v1235_v22, %v1239_v57  ;;  %v616_v19 = vadd.f32 %v4229_v52, %v4141_v50  ;;  %v687_v60 = vmax.f32 %v618_v21, 0.0  ;;  %v872_v47 = vpop.permute.xlu2 %871 }
 0x1aa   : > { %v862_v6 = vpop.permute.xlu1 %861  ;;  %1299 = vrot.lane.b32.xlu2 %v1240_v30, %s3585_s10  ;;  %v4279_v55 = vor.u32 %v1684_v44, %v1683_v38  ;;  %v4285_v14 = vor.u32 %v1482_v28, %v1481_v1  ;;  %v1020_v22 = vpack.c.bf16 %v979_v37, %v979_v37  ;;  %v1199_v50 = vrot.slane %v4102_v54, 1 }
 0x1ab   : > { %v693_v58 = vmax.f32 %v633_v9, 0.0  ;;  %v972_v51 = vmul.f32 %v862_v6, %v685_v3  ;;  %v1404_v48 = vpop.permute.xlu0 %1403  ;;  %v974_v28 = vmul.f32 %v872_v47, %v687_v60  ;;  %v1089_v16 = vunpack.c.l.b16 %v1012_v15 }
 0x1ac   : > { %v4291_v6 = vsel %vm1635_vm3, %v4214_v11, %v4279_v55  ;;  %v1886_v44 = vsel %vm1869_vm6, %v1844_v56, %v1404_v48  ;;  %v4298_v3 = vsel %vm1429_vm2, %v4216_v20, %v4285_v14  ;;  %v1195_v56 = vor.u32 %v4059_v35, %v5383_v49  ;;  %v741_v49 = vld [vmem:[%s5345_s1 + $0x130] sm:$0xff] }
 0x1ad   : > { %v980_v63 = vmul.f32 %v4187_v40, %v693_v58  ;;  %v1013_v9 = vpack.c.bf16 %v972_v51, %v972_v51  ;;  %5381 = vst [vmem:[#allocation17_spill] sm:$0xff] %v4291_v6  ;;  %v686_v58 = vmax.f32 %v616_v19, 0.0  ;;  %v1097_v54 = vunpack.c.l.b16 %v1020_v22 }
 0x1ae   : > { %5382 = vst [vmem:[#allocation18_spill] sm:$0xff] %v4298_v3  ;;  %v1200_v15 = vsel %vm1124_vm1, %v1195_v56, %v1199_v50  ;;  %v1015_v30 = vpack.c.bf16 %v974_v28, %v974_v28  ;;  %v1243_v56 = vor.u32 %v4247_v26, %v1239_v57  ;;  %v1809_v26 = vsel %vm1795_vm5, %v3961_v62, %v4234_v59 }
 0x1af   : > { %v1021_v37 = vpack.c.bf16 %v980_v63, %v980_v63  ;;  %v1090_v21 = vunpack.c.l.b16 %v1013_v9  ;;  %2303 = vmatmul.bf16.gmra.mxu1 %v1886_v44 }
 0x1b0   : > { %v635_v40 = vpop.f32.mrf.mxu0  ;;  %1363 = vrot.lane.b32.xlu0 %v4110_v36, %s3584_s26  ;;  %v1092_v44 = vunpack.c.l.b16 %v1015_v30 }
 0x1b1   : > { %v1098_v48 = vunpack.c.l.b16 %v1021_v37  ;;  %v4305_v23 = vpack.c.b16 %v1090_v21, %v1089_v16  ;;  %v636_v38 = vadd.f32 %v4229_v52, %v635_v40  ;;  %v5384_v16 = vrot.slane %v4236_v34, 3 }
 0x1b2   : > { %v867_v1 = vpop.permute.xlu1 %866  ;;  %1289 = vrot.lane.b32.xlu2 %v1200_v15, %s3585_s10  ;;  %v5385_v21 = vrot.slane %v4236_v34, 1 }
 0x1b3   : > { %v4309_v51 = vpack.c.b16 %v1098_v48, %v1097_v54  ;;  %v973_v19 = vmul.f32 %v867_v1, %v686_v58  ;;  %v4312_v36 = vpop.permute.xlu0 %921  ;;  %v694_v25 = vmax.f32 %v636_v38, 0.0  ;;  %v4317_v22 = vshrl.u32 %v4305_v23, 16 }
 0x1b4   : > { %v4323_v9 = vshll.u32 %v4305_v23, 16 }
 0x1b5   : > { %v1014_v60 = vpack.c.bf16 %v973_v19, %v973_v19  ;;  %v5364_v35 = vrot.slane %v4309_v51, 3  ;;  %v5363_v47 = vrot.slane %v4309_v51, 1  ;;  %v4320_v63 = vshll.u32 %v4309_v51, 16 }
 0x1b6   : > { %v981_v48 = vmul.f32 %v4212_v12, %v694_v25  ;;  %v1671_v15 = vrot.slane %v4317_v22, 2  ;;  %v5361_v25 = vrot.slane %v4170_v2, 1 }
 0x1b7   : > { %v1091_v28 = vunpack.c.l.b16 %v1014_v60  ;;  %v1784_v37 = vsel %vm1757_vm7, %v5384_v16, %v5364_v35  ;;  %v4335_v58 = vsel %vm1309_vm0, %v5385_v21, %v5363_v47  ;;  %v5360_v54 = vrot.slane %v4320_v63, 1 }
 0x1b8   : > { %v637_v40 = vpop.f32.mrf.mxu0  ;;  %3369 = vmatmul.msk.bf16.gmra.mxu3 %vm1795_vm5, %v1784_v37  ;;  %1419 = vrot.lane.b32.xlu1 %v4335_v58, %s3586_s20  ;;  %v5362_v60 = vrot.slane %v4165_v43, 1  ;;  %v1672_v16 = vrot.slane %v4323_v9, 3  ;;  %v4365_v37 = vshrl.u32 %v4309_v51, 16  ;;  %v1022_v59 = vpack.c.bf16 %v981_v48, %v981_v48 }
 0x1b9   : > { %v4346_v38 = vpack.c.b16 %v1092_v44, %v1091_v28  ;;  %v638_v1 = vadd.f32 %v4229_v52, %v637_v40  ;;  %v1248_v19 = vsel %vm1124_vm1, %v1243_v56, %v5360_v54 }
 0x1ba   : > { %v1406_v30 = vpop.permute.xlu1 %1405  ;;  %936 = vperm.xlu2 %3513, %v741_v49   ;;  %1301 = vrot.lane.b32.xlu0 %v1248_v19, %s3585_s10  ;;  %v1673_v40 = vor.u32 %v1672_v16, %v1671_v15  ;;  %v1688_v15 = vrot.slane %v4320_v63, 3  ;;  %v1099_v16 = vunpack.c.l.b16 %v1022_v59 }
 0x1bb   : > { %v695_v12 = vmax.f32 %v638_v1, 0.0  ;;  %v1360_v57 = vpop.permute.xlu0 %1359  ;;  %v4361_v44 = vshrl.u32 %v4346_v38, 16  ;;  %v4368_v21 = vshll.u32 %v4346_v38, 16  ;;  %v1203_v1 = vor.u32 %v4105_v13, %v1199_v50 }
 0x1bc   : > { %v1846_v28 = vsel %vm1832_vm4, %v1809_v26, %v1360_v57  ;;  %v4375_v19 = vsel %vm1635_vm3, %v4185_v45, %v1673_v40  ;;  %v5386_v26 = vrot.slane %v4098_v41, 1  ;;  %v1687_v50 = vrot.slane %v4365_v37, 2 }
 0x1bd   : > { %v982_v49 = vmul.f32 %v4159_v10, %v695_v12  ;;  %v1889_v56 = vsel %vm1869_vm6, %v1846_v28, %v1406_v30  ;;  %v1208_v10 = vsel %vm1124_vm1, %v1203_v1, %v5361_v25  ;;  %v1675_v48 = vrot.slane %v4361_v44, 2 }
 0x1be   : > { %v4382_v57 = vsel %vm1309_vm0, %v5386_v26, %v5362_v60  ;;  %v1676_v45 = vrot.slane %v4368_v21, 3  ;;  %v1469_v30 = vrot.slane %v4317_v22, 1  ;;  %v1689_v26 = vor.u32 %v1688_v15, %v1687_v50 }
 0x1bf   : > { %v1023_v54 = vpack.c.bf16 %v982_v49, %v982_v49  ;;  %2308 = vmatmul.bf16.gmra.mxu1 %v1889_v56  ;;  %v1470_v49 = vrot.slane %v4323_v9, 2  ;;  %v1473_v25 = vrot.slane %v4361_v44, 1  ;;  %v1474_v60 = vrot.slane %v4368_v21, 2 }
 0x1c0   : > { %v640_v13 = vpop.f32.mrf.mxu0  ;;  %1409 = vrot.lane.b32.xlu1 %v4382_v57, %s3586_s20  ;;  %v1677_v1 = vor.u32 %v1676_v45, %v1675_v48  ;;  %v4414_v48 = vsel %vm1635_vm3, %v4279_v55, %v1689_v26  ;;  %v5391_v55 = vrot.slane %v4309_v51, 3 }
 0x1c1   : > { %v1100_v12 = vunpack.c.l.b16 %v1023_v54  ;;  %v641_v28 = vadd.f32 %v4229_v52, %v640_v13  ;;  %v1471_v59 = vor.u32 %v1470_v49, %v1469_v30  ;;  %5388 = vst [vmem:[#allocation20_spill] sm:$0xff] %v4414_v48  ;;  %v1475_v45 = vor.u32 %v1474_v60, %v1473_v25 }
 0x1c2   : > { %v4396_v56 = vpop.permute.xlu1 %931  ;;  %1291 = vrot.lane.b32.xlu0 %v1208_v10, %s3585_s10  ;;  %v4406_v54 = vsel %vm1635_vm3, %v1673_v40, %v1677_v1  ;;  %v4410_v13 = vsel %vm1635_vm3, %v1677_v1, %v4214_v11  ;;  %v5392_v25 = vrot.slane %v4309_v51, 1 }
 0x1c3   : > { %v4400_v47 = vpack.c.b16 %v1100_v12, %v1099_v16  ;;  %v4403_v35 = vpop.permute.xlu0 %926  ;;  %5387 = vst [vmem:[#allocation19_spill] sm:$0xff] %v4410_v13  ;;  %v696_v50 = vmax.f32 %v641_v28, 0.0  ;;  %v4422_v40 = vsel %vm1429_vm2, %v4189_v17, %v1471_v59  ;;  %v4425_v11 = vsel %vm1429_vm2, %v1471_v59, %v1475_v45 }
 0x1c4   : > { %5389 = vst [vmem:[#allocation21_spill] sm:$0xff] %v4422_v40  ;;  %v5393_v28 = vrot.slane %v4320_v63, 1  ;;  %v1486_v40 = vrot.slane %v4320_v63, 2 }
 0x1c5   : > { %v5365_v15 = vrot.slane %v4400_v47, 3  ;;  %v5366_v10 = vrot.slane %v4400_v47, 1  ;;  %v1253_v16 = vshll.u32 %v4400_v47, 16  ;;  %v1257_v30 = vshrl.u32 %v4400_v47, 16  ;;  %5390 = vst [vmem:[#allocation22_spill] sm:$0xff] %v4425_v11 }
 0x1c6   : > { %v1251_v17 = vor.u32 %v4365_v37, %v5393_v28 }
 0x1c7   : > { %v1786_v60 = vsel %vm1757_vm7, %v5391_v55, %v5365_v15  ;;  %v4437_v12 = vsel %vm1309_vm0, %v5392_v25, %v5366_v10  ;;  %v1255_v49 = vrot.slane %v1253_v16, 1  ;;  %v1691_v59 = vrot.slane %v1257_v30, 2 }
 0x1c8   : > { %v642_v1 = vpop.f32.mrf.mxu0  ;;  %3370 = vmatmul.msk.bf16.gmra.mxu3 %vm1795_vm5, %v1786_v60  ;;  %1421 = vrot.lane.b32.xlu2 %v4437_v12, %s3586_s20  ;;  %v1692_v55 = vrot.slane %v1253_v16, 3  ;;  %v4447_v15 = vsel %vm1429_vm2, %v1475_v45, %v4216_v20  ;;  %v1485_v25 = vrot.slane %v4365_v37, 1  ;;  %v983_v10 = vmul.f32 %v4209_v31, %v696_v50 }
 0x1c9   : > { %v643_v3 = vadd.f32 %v4229_v52, %v642_v1  ;;  %1375 = vrot.lane.b32.xlu1 %v4335_v58, %s3584_s26  ;;  %v1256_v60 = vsel %vm1124_vm1, %v1251_v17, %v1255_v49  ;;  %v1489_v48 = vrot.slane %v1257_v30, 1  ;;  %v1490_v6 = vrot.slane %v1253_v16, 2  ;;  %v1408_v17 = vpop.permute.xlu2 %1407 }
 0x1ca   : > { %v1362_v28 = vpop.permute.xlu1 %1361  ;;  %v1693_v11 = vor.u32 %v1692_v55, %v1691_v59  ;;  %1303 = vrot.lane.b32.xlu0 %v1256_v60, %s3585_s10  ;;  %v1331_v37 = vrot.slane %v4305_v23, 1  ;;  %v1487_v58 = vor.u32 %v1486_v40, %v1485_v25  ;;  %v1024_v1 = vpack.c.bf16 %v983_v10, %v983_v10 }
 0x1cb   : > { %v697_v13 = vmax.f32 %v643_v3, 0.0  ;;  %v1288_v20 = vpop.permute.xlu0 %1287  ;;  %v1491_v50 = vor.u32 %v1490_v6, %v1489_v48  ;;  %v1215_v59 = vrot.slane %v4323_v9, 1  ;;  %v5394_v6 = vrot.slane %v4165_v43, 1 }
 0x1cc   : > { %v1811_v31 = vsel %vm1795_vm5, %v4008_v24, %v1288_v20  ;;  %v4461_v45 = vsel %vm1635_vm3, %v1689_v26, %v1693_v11  ;;  %v4469_v55 = vsel %vm1429_vm2, %v4285_v14, %v1487_v58  ;;  %v1101_v10 = vunpack.c.l.b16 %v1024_v1 }
 0x1cd   : > { %v984_v63 = vmul.f32 %v4312_v36, %v697_v13  ;;  %v1848_v16 = vsel %vm1832_vm4, %v1811_v31, %v1362_v28  ;;  %v4472_v60 = vsel %vm1429_vm2, %v1487_v58, %v1491_v50  ;;  %v1332_v48 = vsel %vm1309_vm0, %v5394_v6, %v1331_v37 }
 0x1ce   : > { %v1892_v3 = vsel %vm1869_vm6, %v1848_v16, %v1408_v17  ;;  %v5395_v13 = vrot.slane %v4170_v2, 1  ;;  %v1259_v17 = vor.u32 %v1257_v30, %v1255_v49 }
 0x1cf   : > { %v1025_v26 = vpack.c.bf16 %v984_v63, %v984_v63  ;;  %2313 = vmatmul.bf16.gmra.mxu1 %v1892_v3  ;;  %v5396_v63 = vrot.slane %v4400_v47, 3  ;;  %v5397_v3 = vrot.slane %v4400_v47, 1 }
 0x1d0   : > { %v645_v36 = vpop.f32.mrf.mxu0  ;;  %1411 = vrot.lane.b32.xlu2 %v1332_v48, %s3586_s20  ;;  %v1211_v9 = vor.u32 %v4173_v5, %v5395_v13 }
 0x1d1   : > { %v1102_v40 = vunpack.c.l.b16 %v1025_v26  ;;  %v646_v14 = vadd.f32 %v4229_v52, %v645_v36  ;;  %1365 = vrot.lane.b32.xlu1 %v4382_v57, %s3584_s26 }
 0x1d2   : > { %v1216_v25 = vsel %vm1124_vm1, %v1211_v9, %v1215_v59 }
 0x1d3   : > { %v4485_v28 = vpack.c.b16 %v1102_v40, %v1101_v10  ;;  %v698_v20 = vmax.f32 %v646_v14, 0.0  ;;  %1293 = vrot.lane.b32.xlu0 %v1216_v25, %s3585_s10 }
 0x1d5   : > { %v985_v31 = vmul.f32 %v4403_v35, %v698_v20  ;;  %v1787_v2 = vrot.slane %v4485_v28, 3  ;;  %v4491_v5 = vrot.slane %v4485_v28, 1  ;;  %v1261_v58 = vshll.u32 %v4485_v28, 16 }
 0x1d6   : > { %v1265_v1 = vshrl.u32 %v4485_v28, 16  ;;  %v1333_v20 = vrot.slane %v4346_v38, 1 }
 0x1d7   : > { %v1026_v57 = vpack.c.bf16 %v985_v31, %v985_v31  ;;  %v1788_v16 = vsel %vm1757_vm7, %v5396_v63, %v1787_v2  ;;  %v1344_v35 = vsel %vm1309_vm0, %v5397_v3, %v4491_v5  ;;  %v1263_v26 = vrot.slane %v1261_v58, 1 }
 0x1d8   : > { %v647_v6 = vpop.f32.mrf.mxu0  ;;  %3371 = vmatmul.msk.bf16.gmra.mxu3 %vm1795_vm5, %v1788_v16  ;;  %1423 = vrot.lane.b32.xlu2 %v1344_v35, %s3586_s20  ;;  %v1695_v36 = vrot.slane %v1265_v1, 2  ;;  %v1696_v30 = vrot.slane %v1261_v58, 3  ;;  %v1493_v49 = vrot.slane %v1265_v1, 1  ;;  %v1494_v14 = vrot.slane %v1261_v58, 2 }
 0x1d9   : > { %v648_v13 = vadd.f32 %v4229_v52, %v647_v6  ;;  %1377 = vrot.lane.b32.xlu1 %v4437_v12, %s3584_s26  ;;  %v1264_v9 = vsel %vm1124_vm1, %v1259_v17, %v1263_v26  ;;  %v1122_v10 = vunpack.c.l.b16 %v1026_v57  ;;  %v1223_v6 = vrot.slane %v4368_v21, 1 }
 0x1da   : > { %v1697_v40 = vor.u32 %v1696_v30, %v1695_v36  ;;  %v1495_v63 = vor.u32 %v1494_v14, %v1493_v49  ;;  %v1334_v58 = vsel %vm1309_vm0, %v1331_v37, %v1333_v20  ;;  %v1219_v57 = vor.u32 %v4317_v22, %v1215_v59 }
 0x1db   : > { %v699_v25 = vmax.f32 %v648_v13, 0.0  ;;  %1305 = vrot.lane.b32.xlu0 %v1264_v9, %s3585_s10  ;;  %v1123_v3 = vpack.c.b16 %v1122_v10, %v1122_v10  ;;  %v1267_v9 = vor.u32 %v1265_v1, %v1263_v26  ;;  %v1227_v26 = vor.u32 %v4361_v44, %v1223_v6 }
 0x1dc   : > { %v4511_v31 = vsel %vm1635_vm3, %v1693_v11, %v1697_v40  ;;  %v4516_v12 = vsel %vm1429_vm2, %v1491_v50, %v1495_v63  ;;  %v1224_v11 = vsel %vm1124_vm1, %v1219_v57, %v1223_v6  ;;  %v1516_v6 = vrot.slane %v3791_v8, 2 }
 0x1dd   : > { %v986_v16 = vmul.f32 %v4396_v56, %v699_v25  ;;  %v1269_v30 = vshll.u32 %v1123_v3, 16 }
 0x1df   : > { %v1027_v17 = vpack.c.bf16 %v986_v16, %v986_v16  ;;  %v1271_v49 = vrot.slane %v1269_v30, 1 }
 0x1e0   : > { %1413 = vrot.lane.b32.xlu2 %v1334_v58, %s3586_s20 }
 0x1e1   : > { %v1385_v36 = vunpack.c.l.b16 %v1027_v17  ;;  %1367 = vrot.lane.b32.xlu1 %v1332_v48, %s3584_s26  ;;  %v1272_v16 = vsel %vm1124_vm1, %v1267_v9, %v1271_v49 }
 0x1e3   : > { %v4523_v56 = vpack.c.b16 %v1385_v36, %v1122_v10  ;;  %1295 = vrot.lane.b32.xlu0 %v1224_v11, %s3585_s10  ;;  %v5399_v11 = vrot.slane %v4204_v4, 1  ;;  %v1519_v4 = vrot.slane %v3835_v7, 2 }
 0x1e5   : > { %v1789_v21 = vrot.slane %v4523_v56, 3  ;;  %v1389_v50 = vrot.slane %v4523_v56, 1  ;;  %v1498_v37 = vshrl.u32 %v4523_v56, 16  ;;  %v1501_v13 = vshll.u32 %v4523_v56, 16 }
 0x1e6   : > { %v1232_v30 = vsel %vm1124_vm1, %v1227_v26, %v5399_v11  ;;  %v4587_v26 = vpop.f32.mrf.mxu1 }
 0x1e7   : > { %v1790_v22 = vsel %vm1757_vm7, %v1787_v2, %v1789_v21  ;;  %v1390_v59 = vsel %vm1309_vm0, %v4491_v5, %v1389_v50  ;;  %v1699_v48 = vrot.slane %v1498_v37, 2  ;;  %v1700_v10 = vrot.slane %v1501_v13, 3 }
 0x1e8   : > { %3372 = vmatmul.msk.bf16.gmra.mxu3 %vm1795_vm5, %v1790_v22  ;;  %1425 = vrot.lane.b32.xlu2 %v1390_v59, %s3586_s20  ;;  %v1500_v14 = vrot.slane %v1498_v37, 1  ;;  %v1503_v25 = vrot.slane %v1501_v13, 2  ;;  %v1521_v37 = vrot.slane %v3868_v42, 2  ;;  %v1523_v22 = vrot.slane %v3910_v18, 2 }
 0x1e9   : > { %1379 = vrot.lane.b32.xlu1 %v1344_v35, %s3584_s26  ;;  %v4541_v17 = vor.u32 %v1700_v10, %v1699_v48  ;;  %v5398_v35 = vrot.slane %v4191_v61, 1 }
 0x1ea   : > { %v4543_v2 = vor.u32 %v1503_v25, %v1500_v14  ;;  %v1522_v8 = vsel %vm1515_vm8, %v1519_v4, %v1521_v37  ;;  %v1524_v48 = vsel %vm1515_vm8, %v1521_v37, %v1523_v22  ;;  %v1525_v14 = vrot.slane %v3961_v62, 2 }
 0x1eb   : > { %1307 = vrot.lane.b32.xlu0 %v1272_v16, %s3585_s10  ;;  %v4548_v57 = vsel %vm1635_vm3, %v1697_v40, %v4541_v17  ;;  %v1336_v36 = vsel %vm1309_vm0, %v1333_v20, %v5398_v35  ;;  %v1345_v40 = vrot.slane %v1123_v3, 1  ;;  %v3424_v16 = vld [vmem:[%s3720_s17 + $0xa0] sm:$0xff] }
 0x1ec   : > { %v4552_v1 = vsel %vm1429_vm2, %v1495_v63, %v4543_v2  ;;  %v1517_v63 = vrot.slane %v3811_v39, 2  ;;  %v1526_v35 = vsel %vm1515_vm8, %v1523_v22, %v1525_v14  ;;  %654 = vmatmul.bf16.gmra.mxu0 %v3424_v16 }
 0x1ed   : > { %v1346_v44 = vsel %vm1309_vm0, %v4491_v5, %v1345_v40  ;;  %v650_v5 = vpop.f32.mrf.mxu0  ;;  %v3448_v40 = vld [vmem:[%s5348_s4 + $0x78] sm:$0xff] }
 0x1ee   : > { %v1518_v20 = vsel %vm1515_vm8, %v1516_v6, %v1517_v63  ;;  %v1520_v3 = vsel %vm1515_vm8, %v1517_v63, %v1519_v4  ;;  %v651_v13 = vadd.f32 %v4229_v52, %v650_v5  ;;  %v4600_v63 = vrot.slane %v4523_v56, 2  ;;  %2369 = vmatpush.bf16.msrb.mxu2 %v3448_v40 }
 0x1f0   : > { %1415 = vrot.lane.b32.xlu2 %v1336_v36, %s3586_s20  ;;  %v700_v59 = vmax.f32 %v651_v13, 0.0 }
 0x1f1   : > { %1369 = vrot.lane.b32.xlu1 %v1334_v58, %s3584_s26 }
 0x1f3   : > { %1297 = vrot.lane.b32.xlu0 %v1232_v30, %s3585_s10  ;;  %v1527_v30 = vrot.slane %v4008_v24, 2 }
 0x1f5   : > { %v1528_v13 = vsel %vm1515_vm8, %v1525_v14, %v1527_v30 }
 0x1f9   : > { %1381 = vrot.lane.b32.xlu1 %v1346_v44, %s3584_s26 }
 0x1fb   : > { %1553 = vrot.lane.b32.xlu0 %v1518_v20, %s3585_s10 }
 0x201   : > { %1371 = vrot.lane.b32.xlu1 %v1336_v36, %s3584_s26 }
 0x203   : > { %1555 = vrot.lane.b32.xlu0 %v1520_v3, %s3585_s10 }
 0x204   : > { %v1300_v58 = vpop.permute.xlu2 %1299 }
 0x205   : > { %v1823_v14 = vsel %vm1795_vm5, %v4191_v61, %v1300_v58  ;;  %v3446_v58 = vld [vmem:[%s5348_s4 + $0x68] sm:$0xff] }
 0x209   : > { %1599 = vrot.lane.b32.xlu1 %v1520_v3, %s3584_s26 }
 0x20b   : > { %1557 = vrot.lane.b32.xlu0 %v1522_v8, %s3585_s10 }
 0x20c   : > { %v1290_v49 = vpop.permute.xlu2 %1289 }
 0x211   : > { %1601 = vrot.lane.b32.xlu1 %v1522_v8, %s3584_s26 }
 0x213   : > { %1559 = vrot.lane.b32.xlu0 %v1524_v48, %s3585_s10 }
 0x214   : > { %v937_v9 = vpop.permute.xlu2 %936 }
 0x215   : > { %v987_v10 = vmul.f32 %v937_v9, %v700_v59  ;;  %v4613_v59 = vpop.f32.mrf.mxu1  ;;  %v1529_v9 = vrot.slane %v4049_v32, 2 }
 0x217   : > { %v1028_v25 = vpack.c.bf16 %v987_v10, %v987_v10  ;;  %v3447_v10 = vld [vmem:[%s5348_s4 + $0x70] sm:$0xff]  ;;  %v1530_v16 = vsel %vm1515_vm8, %v1527_v30, %v1529_v9 }
 0x218   : > { %2370 = vmatpush.bf16.msrb.mxu2 %v3447_v10  ;;  %v1535_v10 = vrot.slane %v4305_v23, 2 }
 0x219   : > { %1603 = vrot.lane.b32.xlu1 %v1524_v48, %s3584_s26  ;;  %v4589_v52 = vunpack.c.l.b16 %v1028_v25 }
 0x21a   : > { %v1374_v36 = vpop.permute.xlu0 %1373 }
 0x21b   : > { %1561 = vrot.lane.b32.xlu0 %v1526_v35, %s3585_s10  ;;  %v1388_v11 = vpack.c.b16 %v4589_v52, %v4589_v52  ;;  %v1860_v25 = vsel %vm1832_vm4, %v1823_v14, %v1374_v36  ;;  %v1813_v36 = vsel %vm1795_vm5, %v4049_v32, %v1290_v49 }
 0x21c   : > { %2371 = vmatpush.bf16.msrb.mxu2 %v3446_v58 }
 0x21d   : > { %v1391_v44 = vrot.slane %v1388_v11, 1  ;;  %v1551_v6 = vrot.slane %v1388_v11, 2  ;;  %v1507_v20 = vshrl.u32 %v1388_v11, 16  ;;  %v1510_v4 = vshll.u32 %v1388_v11, 16  ;;  %v4632_v11 = vpop.f32.mrf.mxu1 }
 0x21f   : > { %v1392_v3 = vsel %vm1309_vm0, %v1389_v50, %v1391_v44  ;;  %v4607_v37 = vsel %vm1515_vm8, %v4600_v63, %v1551_v6  ;;  %v1509_v8 = vrot.slane %v1507_v20, 1  ;;  %v1512_v5 = vrot.slane %v1510_v4, 2 }
 0x220   : > { %1427 = vrot.lane.b32.xlu2 %v1392_v3, %s3586_s20  ;;  %v1531_v4 = vrot.slane %v4098_v41, 2 }
 0x221   : > { %1605 = vrot.lane.b32.xlu1 %v1526_v35, %s3584_s26  ;;  %v1513_v22 = vor.u32 %v1512_v5, %v1509_v8 }
 0x222   : > { %v1364_v48 = vpop.permute.xlu0 %1363  ;;  %v1422_v30 = vpop.permute.xlu2 %1421  ;;  %v1532_v49 = vsel %vm1515_vm8, %v1529_v9, %v1531_v4 }
 0x223   : > { %1563 = vrot.lane.b32.xlu0 %v1528_v13, %s3585_s10  ;;  %v4617_v50 = vsel %vm1429_vm2, %v4543_v2, %v1513_v22  ;;  %v1850_v44 = vsel %vm1832_vm4, %v1813_v36, %v1364_v48  ;;  %v743_v36 = vld [vmem:[%s5345_s1 + $0x140] sm:$0xff] }
 0x225   : > { %v4648_v8 = vpop.f32.mrf.mxu1 }
 0x228   : > { %1417 = vrot.lane.b32.xlu2 %v4261_v53, %s3586_s20  ;;  %v742_v53 = vld [vmem:[%s5345_s1 + $0x138] sm:$0xff] }
 0x229   : > { %1607 = vrot.lane.b32.xlu1 %v1528_v13, %s3584_s26 }
 0x22a   : > { %v1420_v2 = vpop.permute.xlu1 %1419  ;;  %v1412_v22 = vpop.permute.xlu2 %1411 }
 0x22b   : > { %1565 = vrot.lane.b32.xlu0 %v1530_v16, %s3585_s10  ;;  %v1910_v35 = vsel %vm1869_vm6, %v1860_v25, %v1420_v2  ;;  %v1533_v25 = vrot.slane %v4165_v43, 2 }
 0x22c   : > { %2343 = vmatmul.bf16.vlgmr.msra.gmra.mxu2 %v1910_v35  ;;  %v1302_v40 = vpop.permute.xlu0 %1301 }
 0x22d   : > { %v1825_v5 = vsel %vm1795_vm5, %v4236_v34, %v1302_v40  ;;  %v4666_v14 = vpop.f32.mrf.mxu1 }
 0x230   : > { %1721 = vrot.lane.b32.xlu2 %v3854_v27, %s3586_s20  ;;  %v3445_v27 = vld [vmem:[%s5348_s4 + $0x60] sm:$0xff] }
 0x231   : > { %1609 = vrot.lane.b32.xlu1 %v1530_v16, %s3584_s26  ;;  %2372 = vmatpush.bf16.msrb.mxu2 %v3445_v27 }
 0x232   : > { %v1410_v6 = vpop.permute.xlu1 %1409 }
 0x233   : > { %941 = vperm.xlu0 %3511, %v742_v53   ;;  %v1895_v20 = vsel %vm1869_vm6, %v1850_v44, %v1410_v6  ;;  %v1424_v53 = vpop.permute.xlu2 %1423 }
 0x234   : > { %2318 = vmatmul.bf16.gmra.mxu1 %v1895_v20  ;;  %v1292_v3 = vpop.permute.xlu0 %1291 }
 0x235   : > { %v1815_v2 = vsel %vm1795_vm5, %v4098_v41, %v1292_v3  ;;  %v4692_v44 = vpop.f32.mrf.mxu1 }
 0x238   : > { %1723 = vrot.lane.b32.xlu2 %v3891_v0, %s3586_s20 }
 0x239   : > { %1611 = vrot.lane.b32.xlu1 %v1532_v49, %s3584_s26 }
 0x23b   : > { %v1376_v13 = vpop.permute.xlu1 %1375  ;;  %1735 = vrot.lane.b32.xlu0 %v4196_v29, %s3586_s20  ;;  %v4675_v29 = vsel %vm1515_vm8, %v1533_v25, %v1535_v10 }
 0x23c   : > { %v1862_v48 = vsel %vm1832_vm4, %v1825_v5, %v1376_v13  ;;  %v1304_v9 = vpop.permute.xlu0 %1303  ;;  %v1414_v13 = vpop.permute.xlu2 %1413 }
 0x23d   : > { %v1913_v0 = vsel %vm1869_vm6, %v1862_v48, %v1422_v30  ;;  %v1537_v30 = vrot.slane %v4346_v38, 2  ;;  %v1827_v20 = vsel %vm1795_vm5, %v4309_v51, %v1304_v9  ;;  %v5400_v48 = vld [vmem:[#allocation10_spill] sm:$0xff]  ;;  %v4711_v9 = vpop.f32.mrf.mxu1 }
 0x23e   : > { %2348 = vmatmul.bf16.gmra.mxu2 %v1913_v0 }
 0x23f   : > { %v4695_v6 = vsel %vm1515_vm8, %v1535_v10, %v1537_v30 }
 0x240   : > { %1725 = vrot.lane.b32.xlu2 %v3944_v46, %s3586_s20  ;;  %v3444_v46 = vld [vmem:[%s5348_s4 + $0x58] sm:$0xff] }
 0x241   : > { %1567 = vrot.lane.b32.xlu1 %v1532_v49, %s3585_s10  ;;  %2373 = vmatpush.bf16.msrb.mxu2 %v3444_v46 }
 0x243   : > { %v1366_v16 = vpop.permute.xlu1 %1365  ;;  %1615 = vrot.lane.b32.xlu0 %v4675_v29, %s3584_s26 }
 0x244   : > { %v1852_v35 = vsel %vm1832_vm4, %v1815_v2, %v1366_v16 }
 0x245   : > { %v1294_v40 = vpop.permute.xlu0 %1293  ;;  %v1898_v58 = vsel %vm1869_vm6, %v1852_v35, %v1412_v22  ;;  %v1539_v22 = vrot.slane %v4191_v61, 2 }
 0x246   : > { %2323 = vmatmul.bf16.gmra.mxu1 %v1898_v58  ;;  %v1817_v10 = vsel %vm1795_vm5, %v4165_v43, %v1294_v40  ;;  %v3442_v58 = vld [vmem:[%s5348_s4 + $0x48] sm:$0xff]  ;;  %v1426_v40 = vpop.permute.xlu2 %1425 }
 0x247   : > { %v4714_v0 = vsel %vm1515_vm8, %v1537_v30, %v1539_v22 }
 0x248   : > { %1727 = vrot.lane.b32.xlu2 %v3994_v33, %s3586_s20  ;;  %v3443_v33 = vld [vmem:[%s5348_s4 + $0x50] sm:$0xff] }
 0x249   : > { %946 = vperm.xlu1 %3512, %v743_v36   ;;  %2374 = vmatpush.bf16.msrb.mxu2 %v3443_v33  ;;  %v5402_v33 = vld [vmem:[#allocation14_spill] sm:$0xff] }
 0x24b   : > { %v1378_v3 = vpop.permute.xlu1 %1377  ;;  %1617 = vrot.lane.b32.xlu0 %v4695_v6, %s3584_s26 }
 0x24c   : > { %v1864_v49 = vsel %vm1832_vm4, %v1827_v20, %v1378_v3 }
 0x24d   : > { %v1306_v27 = vpop.permute.xlu0 %1305  ;;  %v1916_v5 = vsel %vm1869_vm6, %v1864_v49, %v1424_v53  ;;  %2375 = vmatpush.bf16.msrb.mxu2 %v3442_v58  ;;  %v5401_v53 = vld [vmem:[#allocation12_spill] sm:$0xff] }
 0x24e   : > { %2353 = vmatmul.bf16.gmra.mxu2 %v1916_v5  ;;  %v1829_v30 = vsel %vm1795_vm5, %v4400_v47, %v1306_v27  ;;  %v3441_v27 = vld [vmem:[%s5348_s4 + $0x40] sm:$0xff] }
 0x250   : > { %1729 = vrot.lane.b32.xlu2 %v5400_v48, %s3586_s20 }
 0x251   : > { %1737 = vrot.lane.b32.xlu1 %v4375_v19, %s3586_s20  ;;  %v1541_v19 = vrot.slane %v4236_v34, 2  ;;  %v4737_v34 = vpop.f32.mrf.mxu1  ;;  %2376 = vmatpush.bf16.msrb.mxu2 %v3441_v27 }
 0x253   : > { %v1368_v2 = vpop.permute.xlu1 %1367  ;;  %1619 = vrot.lane.b32.xlu0 %v4714_v0, %s3584_s26  ;;  %v4731_v36 = vsel %vm1515_vm8, %v1539_v22, %v1541_v19 }
 0x254   : > { %v1854_v16 = vsel %vm1832_vm4, %v1817_v10, %v1368_v2 }
 0x255   : > { %v1296_v35 = vpop.permute.xlu0 %1295  ;;  %v1901_v46 = vsel %vm1869_vm6, %v1854_v16, %v1414_v13  ;;  %v5403_v13 = vld [vmem:[#allocation19_spill] sm:$0xff] }
 0x256   : > { %2328 = vmatmul.bf16.gmra.mxu1 %v1901_v46  ;;  %v1819_v48 = vsel %vm1795_vm5, %v4305_v23, %v1296_v35  ;;  %v1534_v35 = vsel %vm1515_vm8, %v1531_v4, %v1533_v25  ;;  %v5405_v4 = vld [vmem:[#allocation20_spill] sm:$0xff] }
 0x258   : > { %1731 = vrot.lane.b32.xlu2 %v5401_v53, %s3586_s20  ;;  %v5404_v53 = vld [vmem:[#allocation17_spill] sm:$0xff] }
 0x259   : > { %1739 = vrot.lane.b32.xlu1 %v4406_v54, %s3586_s20  ;;  %v1543_v54 = vrot.slane %v4309_v51, 2  ;;  %v1416_v51 = vpop.permute.xlu2 %1415  ;;  %v4758_v58 = vpop.f32.mrf.mxu1 }
 0x25b   : > { %v1380_v20 = vpop.permute.xlu1 %1379  ;;  %1621 = vrot.lane.b32.xlu0 %v4731_v36, %s3584_s26  ;;  %v4750_v22 = vsel %vm1515_vm8, %v1541_v19, %v1543_v54  ;;  %v1545_v19 = vrot.slane %v4400_v47, 2  ;;  %v1547_v47 = vrot.slane %v4485_v28, 2 }
 0x25c   : > { %v1866_v3 = vsel %vm1832_vm4, %v1829_v30, %v1380_v20 }
 0x25d   : > { %v1308_v49 = vpop.permute.xlu0 %1307  ;;  %v1919_v5 = vsel %vm1869_vm6, %v1866_v3, %v1426_v40  ;;  %v4770_v40 = vsel %vm1515_vm8, %v1543_v54, %v1545_v19  ;;  %v4781_v25 = vsel %vm1515_vm8, %v1545_v19, %v1547_v47  ;;  %v4795_v27 = vsel %vm1515_vm8, %v1547_v47, %v4600_v63 }
 0x25e   : > { %2358 = vmatmul.bf16.gmra.mxu2 %v1919_v5 }
 0x260   : > { %1733 = vrot.lane.b32.xlu2 %v5402_v33, %s3586_s20 }
 0x261   : > { %1741 = vrot.lane.b32.xlu1 %v5403_v13, %s3586_s20  ;;  %v4775_v3 = vpop.f32.mrf.mxu1  ;;  %v1831_v13 = vsel %vm1795_vm5, %v4485_v28, %v1308_v49 }
 0x263   : > { %v1370_v10 = vpop.permute.xlu1 %1369  ;;  %1623 = vrot.lane.b32.xlu0 %v4750_v22, %s3584_s26 }
 0x264   : > { %v1856_v2 = vsel %vm1832_vm4, %v1819_v48, %v1370_v10 }
 0x265   : > { %v1298_v16 = vpop.permute.xlu0 %1297  ;;  %v1904_v46 = vsel %vm1869_vm6, %v1856_v2, %v1416_v51 }
 0x266   : > { %2333 = vmatmul.bf16.gmra.mxu1 %v1904_v46  ;;  %v1821_v28 = vsel %vm1795_vm5, %v4346_v38, %v1298_v16 }
 0x268   : > { %1613 = vrot.lane.b32.xlu2 %v1534_v35, %s3584_s26 }
 0x269   : > { %1743 = vrot.lane.b32.xlu1 %v5404_v53, %s3586_s20  ;;  %v4789_v33 = vpop.f32.mrf.mxu1 }
 0x26b   : > { %v1382_v30 = vpop.permute.xlu1 %1381  ;;  %1625 = vrot.lane.b32.xlu0 %v4770_v40, %s3584_s26 }
 0x26c   : > { %v1868_v48 = vsel %vm1832_vm4, %v1831_v13, %v1382_v30 }
 0x26d   : > { %v1554_v20 = vpop.permute.xlu0 %1553 }
 0x270   : > { %1569 = vrot.lane.b32.xlu2 %v1534_v35, %s3585_s10 }
 0x271   : > { %1745 = vrot.lane.b32.xlu1 %v5405_v4, %s3586_s20  ;;  %v4808_v19 = vpop.f32.mrf.mxu1 }
 0x273   : > { %v1372_v5 = vpop.permute.xlu1 %1371  ;;  %1627 = vrot.lane.b32.xlu0 %v4781_v25, %s3584_s26 }
 0x274   : > { %v1858_v49 = vsel %vm1832_vm4, %v1821_v28, %v1372_v5  ;;  %v5407_v28 = vld [vmem:[#allocation11_spill] sm:$0xff] }
 0x275   : > { %v1556_v54 = vpop.permute.xlu0 %1555 }
 0x278   : > { %1571 = vrot.lane.b32.xlu2 %v4675_v29, %s3585_s10 }
 0x279   : > { %1747 = vrot.lane.b32.xlu1 %v4461_v45, %s3586_s20  ;;  %v4823_v13 = vpop.f32.mrf.mxu1 }
 0x27a   : > { %v1428_v10 = vpop.permute.xlu2 %1427 }
 0x27b   : > { %v1600_v51 = vpop.permute.xlu1 %1599  ;;  %1629 = vrot.lane.b32.xlu0 %v4795_v27, %s3584_s26  ;;  %v1922_v29 = vsel %vm1869_vm6, %v1868_v48, %v1428_v10  ;;  %v652_v48 = vpop.f32.mrf.mxu0 }
 0x27c   : > { %2363 = vmatmul.bf16.gmra.mxu2 %v1922_v29 }
 0x27d   : > { %v1558_v45 = vpop.permute.xlu0 %1557 }
 0x280   : > { %1573 = vrot.lane.b32.xlu2 %v4695_v6, %s3585_s10 }
 0x281   : > { %1749 = vrot.lane.b32.xlu1 %v4511_v31, %s3586_s20  ;;  %v5406_v31 = vld [vmem:[#allocation5_spill] sm:$0xff] }
 0x282   : > { %v1418_v2 = vpop.permute.xlu2 %1417  ;;  %v1926_v6 = vsel %vm1795_vm5, %v5406_v31, %v1554_v20  ;;  %v1758_v20 = vrot.slane %v3811_v39, 3  ;;  %v5408_v39 = vld [vmem:[#allocation6_spill] sm:$0xff] }
 0x283   : > { %v1602_v46 = vpop.permute.xlu1 %1601  ;;  %v1907_v35 = vsel %vm1869_vm6, %v1858_v49, %v1418_v2  ;;  %v1979_v16 = vsel %vm1832_vm4, %v1926_v6, %v1600_v51  ;;  %v655_v49 = vpop.f32.mrf.mxu0 }
 0x284   : > { %2338 = vmatmul.bf16.gmra.mxu1 %v1907_v35  ;;  %v4840_v2 = vpop.f32.mrf.mxu1 }
 0x285   : > { %v4811_v53 = vpop.permute.xlu0 %1559 }
 0x288   : > { %1575 = vrot.lane.b32.xlu2 %v4714_v0, %s3585_s10  ;;  %v1759_v0 = vrot.slane %v3835_v7, 3 }
 0x289   : > { %1751 = vrot.lane.b32.xlu1 %v4548_v57, %s3586_s20  ;;  %v3452_v57 = vld [vmem:[%s5350_s6 + $0x8] sm:$0xff] }
 0x28a   : > { %v1722_v30 = vpop.permute.xlu2 %1721  ;;  %2701 = vmatpush.bf16.msrb.mxu3 %v3452_v57  ;;  %v1760_v51 = vsel %vm1757_vm7, %v1758_v20, %v1759_v0 }
 0x28b   : > { %v1604_v47 = vpop.permute.xlu1 %1603  ;;  %v2015_v4 = vsel %vm1869_vm6, %v1979_v16, %v1722_v30  ;;  %v657_v20 = vpop.f32.mrf.mxu0 }
 0x28c   : > { %2377 = vmatmul.bf16.vlgmr.msrb.gmra.mxu2 %v2015_v4  ;;  %v5409_v4 = vld [vmem:[#allocation13_spill] sm:$0xff] }
 0x28d   : > { %v4821_v5 = vpop.permute.xlu0 %1561 }
 0x290   : > { %1577 = vrot.lane.b32.xlu2 %v4731_v36, %s3585_s10  ;;  %v1929_v36 = vsel %vm1795_vm5, %v5408_v39, %v1556_v54  ;;  %v1761_v54 = vrot.slane %v3868_v42, 3  ;;  %v5410_v42 = vld [vmem:[#allocation7_spill] sm:$0xff] }
 0x291   : > { %v1981_v31 = vsel %vm1832_vm4, %v1929_v36, %v1602_v46  ;;  %v4860_v46 = vpop.f32.mrf.mxu1 }
 0x292   : > { %v1724_v35 = vpop.permute.xlu2 %1723 }
 0x293   : > { %v4832_v10 = vpop.permute.xlu1 %1605  ;;  %v2018_v16 = vsel %vm1869_vm6, %v1981_v31, %v1724_v35  ;;  %v1762_v35 = vsel %vm1757_vm7, %v1759_v0, %v1761_v54 }
 0x294   : > { %3357 = vmatmul.msk.bf16.vlgmr.msrb.gmra.mxu1 %vm1795_vm5, %v1760_v51 }
 0x295   : > { %v1564_v29 = vpop.permute.xlu0 %1563 }
 0x296   : > { %v4838_v7 = vsel %vm1795_vm5, %v5407_v28, %v1564_v29 }
 0x298   : > { %1579 = vrot.lane.b32.xlu2 %v4750_v22, %s3585_s10  ;;  %v3518_v22 = vld [vmem:[%s5347_s3] ss:$0 sm:$0xff] }
 0x299   : > { %v653_v51 = vadd.f32 %v3518_v22, %v652_v48  ;;  %v1932_v48 = vsel %vm1795_vm5, %v5410_v42, %v1558_v45  ;;  %v4873_v20 = vpop.f32.mrf.mxu1 }
 0x29b   : > { %v4847_v6 = vpop.permute.xlu1 %1607  ;;  %v701_v28 = vmax.f32 %v653_v51, 0.0 }
 0x29c   : > { %2382 = vmatmul.bf16.gmra.mxu2 %v2018_v16  ;;  %v1726_v16 = vpop.permute.xlu2 %1725 }
 0x29d   : > { %v1566_v30 = vpop.permute.xlu0 %1565 }
 0x29e   : > { %v4852_v57 = vsel %vm1795_vm5, %v5409_v4, %v1566_v30  ;;  %v1983_v30 = vsel %vm1832_vm4, %v1932_v48, %v1604_v47  ;;  %v1763_v47 = vrot.slane %v3910_v18, 3 }
 0x29f   : > { %v2021_v51 = vsel %vm1869_vm6, %v1983_v30, %v1726_v16 }
 0x2a0   : > { %1581 = vrot.lane.b32.xlu2 %v4770_v40, %s3585_s10  ;;  %v1764_v18 = vsel %vm1757_vm7, %v1761_v54, %v1763_v47 }
 0x2a3   : > { %v4862_v29 = vpop.permute.xlu1 %1609 }
 0x2a4   : > { %3358 = vmatmul.msk.bf16.gmra.mxu1 %vm1795_vm5, %v1762_v35 }
 0x2a5   : > { %v942_v39 = vpop.permute.xlu0 %941 }
 0x2a6   : > { %v988_v36 = vmul.f32 %v942_v39, %v701_v28 }
 0x2a8   : > { %v1029_v31 = vpack.c.bf16 %v988_v36, %v988_v36  ;;  %1583 = vrot.lane.b32.xlu2 %v4781_v25, %s3585_s10 }
 0x2aa   : > { %v1591_v40 = vunpack.c.l.b16 %v1029_v31 }
 0x2ab   : > { %v4871_v4 = vpop.permute.xlu1 %1611 }
 0x2ac   : > { %v1593_v0 = vpack.c.b16 %v1591_v40, %v4589_v52  ;;  %2387 = vmatmul.bf16.gmra.mxu2 %v2021_v51  ;;  %v656_v40 = vadd.f32 %v3518_v22, %v655_v49  ;;  %v5412_v51 = vld [vmem:[#allocation8_spill] sm:$0xff] }
 0x2ae   : > { %v1791_v28 = vrot.slane %v1593_v0, 3  ;;  %v1595_v35 = vrot.slane %v1593_v0, 2  ;;  %v1704_v39 = vshrl.u32 %v1593_v0, 16  ;;  %v1707_v36 = vshll.u32 %v1593_v0, 16  ;;  %v1728_v0 = vpop.permute.xlu2 %1727 }
 0x2af   : > { %v4886_v16 = vpop.f32.mrf.mxu2  ;;  %v702_v30 = vmax.f32 %v656_v40, 0.0 }
 0x2b0   : > { %v1792_v25 = vsel %vm1757_vm7, %v1789_v21, %v1791_v28  ;;  %v1596_v45 = vsel %vm1515_vm8, %v4600_v63, %v1595_v35  ;;  %v1706_v31 = vrot.slane %v1704_v39, 2  ;;  %1585 = vrot.lane.b32.xlu2 %v4795_v27, %s3585_s10  ;;  %v1709_v52 = vrot.slane %v1707_v36, 3  ;;  %v5411_v21 = vld [vmem:[#allocation15_spill] sm:$0xff] }
 0x2b1   : > { %3373 = vmatmul.msk.bf16.gmra.mxu3 %vm1795_vm5, %v1792_v25  ;;  %1631 = vrot.lane.b32.xlu0 %v1596_v45, %s3584_s26  ;;  %v4889_v48 = vpop.f32.mrf.mxu1  ;;  %v1935_v39 = vsel %vm1795_vm5, %v5412_v51, %v4811_v53 }
 0x2b2   : > { %v1710_v56 = vor.u32 %v1709_v52, %v1706_v31  ;;  %v1985_v54 = vsel %vm1832_vm4, %v1935_v39, %v4832_v10 }
 0x2b3   : > { %v1568_v42 = vpop.permute.xlu1 %1567 }
 0x2b4   : > { %v4893_v63 = vsel %vm1795_vm5, %v5411_v21, %v1568_v42  ;;  %3359 = vmatmul.msk.bf16.gmra.mxu1 %vm1795_vm5, %v1764_v18  ;;  %v1711_v27 = vsel %vm1635_vm3, %v4541_v17, %v1710_v56  ;;  %v2024_v17 = vsel %vm1869_vm6, %v1985_v54, %v1728_v0  ;;  %v5413_v54 = vld [vmem:[#allocation9_spill] sm:$0xff] }
 0x2b5   : > { %1753 = vrot.lane.b32.xlu1 %v1711_v27, %s3586_s20 }
 0x2b7   : > { %v4907_v22 = vpop.f32.mrf.mxu2 }
 0x2b8   : > { %1587 = vrot.lane.b32.xlu2 %v4607_v37, %s3585_s10  ;;  %v1765_v37 = vrot.slane %v3961_v62, 3  ;;  %s3098_s10 = scalar_lea.hbm %s5352_s8, %s3465_s21 }
 0x2b9   : > { %v4910_v25 = vpop.f32.mrf.mxu1  ;;  %s3101_s24 = sshll.u32 %s3098_s10, 4  ;;  %s3102_s24 = int_to_ptr.hbm [resolvable:$true] %s3101_s24 }
 0x2ba   : > { %v1766_v53 = vsel %vm1757_vm7, %v1763_v47, %v1765_v37  ;;  %v1730_v47 = vpop.permute.xlu2 %1729 }
 0x2bb   : > { %v947_v49 = vpop.permute.xlu1 %946 }
 0x2bc   : > { %v989_v36 = vmul.f32 %v947_v49, %v702_v30  ;;  %2392 = vmatmul.bf16.gmra.mxu2 %v2024_v17  ;;  %v1938_v49 = vsel %vm1795_vm5, %v5413_v54, %v4821_v5 }
 0x2bd   : > { %v1987_v17 = vsel %vm1832_vm4, %v1938_v49, %v4847_v6  ;;  %v1989_v6 = vsel %vm1832_vm4, %v4838_v7, %v4862_v29  ;;  %v1991_v7 = vsel %vm1832_vm4, %v4852_v57, %v4871_v4  ;;  %v1736_v4 = vpop.permute.xlu0 %1735 }
 0x2be   : > { %v1030_v45 = vpack.c.bf16 %v989_v36, %v989_v36 }
 0x2c0   : > { %v1592_v31 = vunpack.c.l.b16 %v1030_v45 }
 0x2c1   : > { %v4915_v40 = vpop.f32.mrf.mxu2 }
 0x2c2   : > { %v1594_v52 = vpack.c.b16 %v1592_v31, %v1592_v31  ;;  %v1767_v31 = vrot.slane %v4008_v24, 3  ;;  %v1769_v24 = vrot.slane %v4049_v32, 3  ;;  %v1771_v32 = vrot.slane %v4098_v41, 3 }
 0x2c3   : > { %v4920_v62 = vpop.f32.mrf.mxu1  ;;  %v1773_v41 = vrot.slane %v4165_v43, 3 }
 0x2c4   : > { %v1713_v42 = vshrl.u32 %v1594_v52, 16  ;;  %v1716_v21 = vshll.u32 %v1594_v52, 16  ;;  %v1793_v18 = vrot.slane %v1594_v52, 3  ;;  %3360 = vmatmul.msk.bf16.gmra.mxu1 %vm1795_vm5, %v1766_v53  ;;  %v1597_v10 = vrot.slane %v1594_v52, 2  ;;  %v1732_v52 = vpop.permute.xlu2 %1731 }
 0x2c5   : > { %v2030_v53 = vsel %vm1869_vm6, %v1989_v6, %v1732_v52 }
 0x2c6   : > { %v1794_v27 = vsel %vm1757_vm7, %v1791_v28, %v1793_v18  ;;  %v1715_v30 = vrot.slane %v1713_v42, 2  ;;  %v1718_v0 = vrot.slane %v1716_v21, 3  ;;  %v1598_v51 = vsel %vm1515_vm8, %v1595_v35, %v1597_v10  ;;  %v3451_v28 = vld [vmem:[%s5350_s6] sm:$0xff] }
 0x2c7   : > { %3374 = vmatmul.msk.bf16.gmra.mxu3 %vm1795_vm5, %v1794_v27  ;;  %1633 = vrot.lane.b32.xlu0 %v1598_v51, %s3584_s26  ;;  %v2027_v35 = vsel %vm1869_vm6, %v1987_v17, %v1730_v47  ;;  %v1772_v51 = vsel %vm1757_vm7, %v1769_v24, %v1771_v32  ;;  %s3533_s26 = sshra.s32 %s3102_s24, 4  ;;  %s3534_s26 = int_to_ptr.hbm [resolvable:$true] %s3533_s26 }
 0x2c8   : > { %v1719_v39 = vor.u32 %v1718_v0, %v1715_v30  ;;  %2702 = vmatpush.bf16.msrb.mxu3 %v3451_v28  ;;  %p3540_p0 = scmp.lt.s32.totalorder %s3534_s26, %s5352_s8 }
 0x2c9   : > { %v4934_v45 = vpop.f32.mrf.mxu2 }
 0x2ca   : > { %v1720_v36 = vsel %vm1635_vm3, %v1710_v56, %v1719_v39  ;;  %v1768_v56 = vsel %vm1757_vm7, %v1765_v37, %v1767_v31  ;;  %v1770_v37 = vsel %vm1757_vm7, %v1767_v31, %v1769_v24  ;;  %v5414_v31 = vld [vmem:[#allocation16_spill] sm:$0xff]  ;;  %v1738_v24 = vpop.permute.xlu1 %1737 }
 0x2cb   : > { %1755 = vrot.lane.b32.xlu1 %v1720_v36, %s3586_s20  ;;  %v4937_v5 = vpop.f32.mrf.mxu1  ;;  %s3535_s20 = scalar_lea.hbm %s3534_s26, 288 }
 0x2cc   : > { %2397 = vmatmul.bf16.gmra.mxu2 %v2027_v35  ;;  %v1734_v27 = vpop.permute.xlu2 %1733  ;;  %v1774_v35 = vsel %vm1757_vm7, %v1771_v32, %v1773_v41  ;;  %p3536_p11 = scmp.ne.s32.totalorder %s3534_s26, %s3535_s20  ;;  %p3541_p1 = scmp.lt.s32.totalorder %s3539_s18, %s3535_s20 }
 0x2cd   : > { %v2033_v29 = vsel %vm1869_vm6, %v1991_v7, %v1734_v27  ;;  %v1775_v7 = vrot.slane %v4305_v23, 3 }
 0x2ce   : > { %p3537_p12 = pnand %p3536_p11, %p3672_p5  ;;  %p3542_p2 = por %p3541_p1, %p3540_p0 }
 0x2d0   : > { %p3538_p13 = pneg %p3537_p12 }
 0x2d1   : > { %v4941_v42 = vpop.f32.mrf.mxu2 }
 0x2d2   : > { %p3543_p3 = pnand %p3542_p2, %p3538_p13 }
 0x2d3   : > { %v4946_v21 = vpop.f32.mrf.mxu1 }
 0x2d4   : > { %3361 = vmatmul.msk.bf16.gmra.mxu1 %vm1795_vm5, %v1768_v56  ;;  %v1614_v39 = vpop.permute.xlu2 %1613  ;;  %v1616_v56 = vpop.permute.xlu0 %1615 }
 0x2d5   : > { %v1993_v54 = vsel %vm1832_vm4, %v4893_v63, %v1614_v39  ;;  %v1776_v39 = vsel %vm1757_vm7, %v1773_v41, %v1775_v7 }
 0x2d6   : > { %v2036_v49 = vsel %vm1869_vm6, %v1993_v54, %v1736_v4  ;;  %v5415_v4 = vld [vmem:[#allocation21_spill] sm:$0xff] }
 0x2d9   : > { %v4950_v18 = vpop.f32.mrf.mxu2 }
 0x2db   : > { %v4954_v10 = vpop.f32.mrf.mxu1 }
 0x2dc   : > { %2402 = vmatmul.bf16.gmra.mxu2 %v2030_v53  ;;  %v1570_v17 = vpop.permute.xlu2 %1569 }
 0x2dd   : > { %v1950_v63 = vsel %vm1795_vm5, %v5414_v31, %v1570_v17 }
 0x2de   : > { %v1995_v6 = vsel %vm1832_vm4, %v1950_v63, %v1616_v56 }
 0x2df   : > { %v2039_v43 = vsel %vm1869_vm6, %v1995_v6, %v1738_v24 }
 0x2e1   : > { %v4960_v30 = vpop.f32.mrf.mxu2 }
 0x2e3   : > { %v4962_v0 = vpop.f32.mrf.mxu1 }
 0x2e4   : > { %3362 = vmatmul.msk.bf16.gmra.mxu1 %vm1795_vm5, %v1770_v37  ;;  %v4992_v37 = vld [vmem:[%s5349_s5] ss:$0 sm:$0xff] }
 0x2e5   : > { %v2280_v32 = vadd.f32 %v4992_v37, %v4587_v26  ;;  %v2282_v17 = vadd.f32 %v4992_v37, %v4613_v59  ;;  %v1740_v26 = vpop.permute.xlu1 %1739  ;;  %v1777_v59 = vrot.slane %v4346_v38, 3 }
 0x2e9   : > { %v4967_v47 = vpop.f32.mrf.mxu2 }
 0x2eb   : > { %v4971_v57 = vpop.f32.mrf.mxu1 }
 0x2ec   : > { %2407 = vmatmul.bf16.gmra.mxu2 %v2033_v29 }
 0x2f4   : > { %3363 = vmatmul.msk.bf16.gmra.mxu1 %vm1795_vm5, %v1772_v51  ;;  %v1572_v51 = vpop.permute.xlu2 %1571 }
 0x2fc   : > { %2412 = vmatmul.bf16.gmra.mxu2 %v2036_v49  ;;  %v1953_v49 = vsel %vm1795_vm5, %v5415_v4, %v1572_v51  ;;  %v1574_v4 = vpop.permute.xlu2 %1573 }
 0x2ff   : > { %v4974_v36 = vpop.f32.mrf.mxu2 }
 0x301   : > { %v4977_v28 = vpop.f32.mrf.mxu1 }
 0x304   : > { %3364 = vmatmul.msk.bf16.gmra.mxu1 %vm1795_vm5, %v1774_v35  ;;  %v1618_v35 = vpop.permute.xlu0 %1617 }
 0x305   : > { %v1997_v56 = vsel %vm1832_vm4, %v1953_v49, %v1618_v35  ;;  %v1778_v49 = vsel %vm1757_vm7, %v1775_v7, %v1777_v59  ;;  %v5416_v35 = vld [vmem:[#allocation22_spill] sm:$0xff] }
 0x306   : > { %v2042_v41 = vsel %vm1869_vm6, %v1997_v56, %v1740_v26 }
 0x307   : > { %v4983_v52 = vpop.f32.mrf.mxu2 }
 0x309   : > { %v4986_v53 = vpop.f32.mrf.mxu1 }
 0x30c   : > { %2417 = vmatmul.bf16.gmra.mxu2 %v2039_v43  ;;  %v5005_v43 = vpop.f32.mrf.mxu3  ;;  %v1620_v38 = vpop.permute.xlu0 %1619 }
 0x30f   : > { %v2378_v27 = vpop.f32.mrf.mxu2 }
 0x310   : > { %v2379_v54 = vadd.f32 %v2378_v27, %v2280_v32 }
 0x311   : > { %v2477_v29 = vpop.f32.mrf.mxu1 }
 0x312   : > { %v2478_v63 = vadd.f32 %v2477_v29, %v2379_v54  ;;  %v2285_v54 = vadd.f32 %v4992_v37, %v4632_v11 }
 0x314   : > { %3365 = vmatmul.msk.bf16.gmra.mxu1 %vm1795_vm5, %v1776_v39  ;;  %v2567_v27 = vmax.f32 %v2478_v63, 0.0  ;;  %v2287_v63 = vadd.f32 %v4992_v37, %v4648_v8 }
 0x317   : > { %v2380_v31 = vpop.f32.mrf.mxu2 }
 0x318   : > { %v2381_v23 = vadd.f32 %v2380_v31, %v2282_v17  ;;  %v1956_v31 = vsel %vm1795_vm5, %v5416_v35, %v1574_v4 }
 0x319   : > { %v2479_v6 = vpop.f32.mrf.mxu1  ;;  %v1999_v11 = vsel %vm1832_vm4, %v1956_v31, %v1620_v38  ;;  %v2292_v38 = vadd.f32 %v4992_v37, %v4692_v44 }
 0x31a   : > { %v2480_v24 = vadd.f32 %v2479_v6, %v2381_v23  ;;  %v5017_v23 = vpop.f32.mrf.mxu3 }
 0x31c   : > { %v2568_v32 = vmax.f32 %v2480_v24, 0.0  ;;  %2422 = vmatmul.bf16.gmra.mxu2 %v2042_v41  ;;  %v1742_v41 = vpop.permute.xlu1 %1741 }
 0x31e   : > { %v2603_v51 = vpack.c.bf16 %v2568_v32, %v2567_v27  ;;  %v2045_v27 = vsel %vm1869_vm6, %v1999_v11, %v1742_v41 }
 0x31f   : > { %v2383_v39 = vpop.f32.mrf.mxu2 }
 0x320   : > { %3383 = vmatmul.msk.bf16.vlgmr.msrb.gmra.mxu3 %vm1795_vm5, %v2603_v51  ;;  %v2384_v17 = vadd.f32 %v2383_v39, %v2285_v54 }
 0x321   : > { %v2482_v29 = vpop.f32.mrf.mxu1 }
 0x322   : > { %v2483_v6 = vadd.f32 %v2482_v29, %v2384_v17  ;;  %v5021_v4 = vpop.f32.mrf.mxu3  ;;  %v2290_v29 = vadd.f32 %v4992_v37, %v4666_v14  ;;  %v5417_v17 = vrot.slane %v4191_v61, 3 }
 0x324   : > { %3366 = vmatmul.msk.bf16.gmra.mxu1 %vm1795_vm5, %v1778_v49  ;;  %v2569_v32 = vmax.f32 %v2483_v6, 0.0  ;;  %v1576_v49 = vpop.permute.xlu2 %1575  ;;  %v1780_v35 = vsel %vm1757_vm7, %v1777_v59, %v5417_v17  ;;  %v1744_v61 = vpop.permute.xlu1 %1743 }
 0x327   : > { %v2385_v56 = vpop.f32.mrf.mxu2 }
 0x328   : > { %v2386_v26 = vadd.f32 %v2385_v56, %v2287_v63  ;;  %v1959_v63 = vsel %vm1795_vm5, %v4447_v15, %v1576_v49  ;;  %v1622_v56 = vpop.permute.xlu0 %1621  ;;  %v5418_v49 = vld [vmem:[#allocation18_spill] sm:$0xff] }
 0x329   : > { %v2484_v24 = vpop.f32.mrf.mxu1  ;;  %v2001_v14 = vsel %vm1832_vm4, %v1959_v63, %v1622_v56 }
 0x32a   : > { %v2485_v7 = vadd.f32 %v2484_v24, %v2386_v26  ;;  %v5035_v41 = vpop.f32.mrf.mxu3 }
 0x32c   : > { %v2570_v51 = vmax.f32 %v2485_v7, 0.0  ;;  %2427 = vmatmul.bf16.gmra.mxu2 %v2045_v27  ;;  %v2048_v7 = vsel %vm1869_vm6, %v2001_v14, %v1744_v61 }
 0x32e   : > { %v2604_v39 = vpack.c.bf16 %v2570_v51, %v2569_v32 }
 0x32f   : > { %v2388_v54 = vpop.f32.mrf.mxu2 }
 0x330   : > { %3384 = vmatmul.msk.bf16.gmra.mxu3 %vm1795_vm5, %v2604_v39  ;;  %v2389_v31 = vadd.f32 %v2388_v54, %v2290_v29  ;;  %v2295_v39 = vadd.f32 %v4992_v37, %v4711_v9  ;;  %v1578_v54 = vpop.permute.xlu2 %1577 }
 0x331   : > { %v2487_v8 = vpop.f32.mrf.mxu1  ;;  %v1962_v17 = vsel %vm1795_vm5, %v5418_v49, %v1578_v54 }
 0x332   : > { %v2488_v26 = vadd.f32 %v2487_v8, %v2389_v31  ;;  %v5041_v8 = vpop.f32.mrf.mxu3  ;;  %v1624_v31 = vpop.permute.xlu0 %1623 }
 0x334   : > { %3367 = vmatmul.msk.bf16.gmra.mxu1 %vm1795_vm5, %v1780_v35  ;;  %v2571_v27 = vmax.f32 %v2488_v26, 0.0  ;;  %v2297_v35 = vadd.f32 %v4992_v37, %v4737_v34 }
 0x337   : > { %v2390_v6 = vpop.f32.mrf.mxu2 }
 0x338   : > { %v2391_v11 = vadd.f32 %v2390_v6, %v2292_v38  ;;  %v2003_v6 = vsel %vm1832_vm4, %v1962_v17, %v1624_v31 }
 0x339   : > { %v2489_v24 = vpop.f32.mrf.mxu1 }
 0x33a   : > { %v2490_v59 = vadd.f32 %v2489_v24, %v2391_v11  ;;  %v1746_v11 = vpop.permute.xlu1 %1745  ;;  %v1626_v54 = vpop.permute.xlu0 %1625 }
 0x33b   : > { %v2051_v9 = vsel %vm1869_vm6, %v2003_v6, %v1746_v11 }
 0x33c   : > { %v2572_v32 = vmax.f32 %v2490_v59, 0.0  ;;  %2432 = vmatmul.bf16.gmra.mxu2 %v2048_v7  ;;  %v5049_v59 = vpop.f32.mrf.mxu3 }
 0x33e   : > { %v2605_v15 = vpack.c.bf16 %v2572_v32, %v2571_v27  ;;  %v2300_v32 = vadd.f32 %v4992_v37, %v4758_v58 }
 0x33f   : > { %v2393_v51 = vpop.f32.mrf.mxu2 }
 0x340   : > { %3385 = vmatmul.msk.bf16.gmra.mxu3 %vm1795_vm5, %v2605_v15  ;;  %v2394_v29 = vadd.f32 %v2393_v51, %v2295_v39  ;;  %v1580_v15 = vpop.permute.xlu2 %1579  ;;  %v2302_v39 = vadd.f32 %v4992_v37, %v4775_v3 }
 0x341   : > { %v2492_v44 = vpop.f32.mrf.mxu1 }
 0x342   : > { %v2493_v38 = vadd.f32 %v2492_v44, %v2394_v29  ;;  %v1965_v44 = vsel %vm1795_vm5, %v4469_v55, %v1580_v15 }
 0x343   : > { %v2005_v31 = vsel %vm1832_vm4, %v1965_v44, %v1626_v54 }
 0x344   : > { %v2573_v24 = vmax.f32 %v2493_v38, 0.0  ;;  %v5058_v49 = vpop.f32.mrf.mxu3  ;;  %v1748_v38 = vpop.permute.xlu1 %1747 }
 0x345   : > { %v2054_v58 = vsel %vm1869_vm6, %v2005_v31, %v1748_v38  ;;  %v2310_v38 = vadd.f32 %v4992_v37, %v4823_v13 }
 0x347   : > { %v2395_v63 = vpop.f32.mrf.mxu2 }
 0x348   : > { %v2396_v56 = vadd.f32 %v2395_v63, %v2297_v35 }
 0x349   : > { %v2494_v26 = vpop.f32.mrf.mxu1 }
 0x34a   : > { %v2495_v14 = vadd.f32 %v2494_v26, %v2396_v56 }
 0x34c   : > { %v2574_v61 = vmax.f32 %v2495_v14, 0.0  ;;  %2437 = vmatmul.bf16.gmra.mxu2 %v2051_v9  ;;  %v2305_v14 = vadd.f32 %v4992_v37, %v4789_v33  ;;  %v5065_v9 = vpop.f32.mrf.mxu3  ;;  %v1750_v54 = vpop.permute.xlu1 %1749 }
 0x34e   : > { %v2606_v7 = vpack.c.bf16 %v2574_v61, %v2573_v24  ;;  %v1582_v24 = vpop.permute.xlu2 %1581 }
 0x34f   : > { %v2398_v27 = vpop.f32.mrf.mxu2 }
 0x350   : > { %3386 = vmatmul.msk.bf16.gmra.mxu3 %vm1795_vm5, %v2606_v7  ;;  %v2399_v51 = vadd.f32 %v2398_v27, %v2300_v32  ;;  %v1968_v7 = vsel %vm1795_vm5, %v4472_v60, %v1582_v24  ;;  %v2307_v27 = vadd.f32 %v4992_v37, %v4808_v19 }
 0x351   : > { %v2497_v34 = vpop.f32.mrf.mxu1 }
 0x352   : > { %v2498_v17 = vadd.f32 %v2497_v34, %v2399_v51  ;;  %v1628_v34 = vpop.permute.xlu0 %1627 }
 0x353   : > { %v2007_v44 = vsel %vm1832_vm4, %v1968_v7, %v1628_v34 }
 0x354   : > { %v2575_v6 = vmax.f32 %v2498_v17, 0.0  ;;  %v2057_v33 = vsel %vm1869_vm6, %v2007_v44, %v1750_v54  ;;  %v5073_v17 = vpop.f32.mrf.mxu3 }
 0x357   : > { %v2400_v29 = vpop.f32.mrf.mxu2 }
 0x358   : > { %v2401_v35 = vadd.f32 %v2400_v29, %v2302_v39 }
 0x359   : > { %v2499_v63 = vpop.f32.mrf.mxu1 }
 0x35a   : > { %v2500_v56 = vadd.f32 %v2499_v63, %v2401_v35 }
 0x35c   : > { %v2576_v26 = vmax.f32 %v2500_v56, 0.0  ;;  %2442 = vmatmul.bf16.gmra.mxu2 %v2054_v58  ;;  %v1584_v56 = vpop.permute.xlu2 %1583 }
 0x35e   : > { %v2607_v55 = vpack.c.bf16 %v2576_v26, %v2575_v6  ;;  %v1971_v6 = vsel %vm1795_vm5, %v4516_v12, %v1584_v56  ;;  %v2312_v26 = vadd.f32 %v4992_v37, %v4840_v2 }
 0x35f   : > { %v2403_v11 = vpop.f32.mrf.mxu2 }
 0x360   : > { %3387 = vmatmul.msk.bf16.gmra.mxu3 %vm1795_vm5, %v2607_v55  ;;  %v2404_v61 = vadd.f32 %v2403_v11, %v2305_v14  ;;  %v5082_v55 = vpop.f32.mrf.mxu3  ;;  %v1630_v11 = vpop.permute.xlu0 %1629 }
 0x361   : > { %v2502_v3 = vpop.f32.mrf.mxu1 }
 0x362   : > { %v2503_v15 = vadd.f32 %v2502_v3, %v2404_v61  ;;  %v2009_v61 = vsel %vm1832_vm4, %v1971_v6, %v1630_v11 }
 0x364   : > { %v2577_v35 = vmax.f32 %v2503_v15, 0.0 }
 0x367   : > { %v2405_v32 = vpop.f32.mrf.mxu2 }
 0x368   : > { %v2406_v51 = vadd.f32 %v2405_v32, %v2307_v27  ;;  %v1752_v27 = vpop.permute.xlu1 %1751 }
 0x369   : > { %v2504_v39 = vpop.f32.mrf.mxu1  ;;  %v2060_v13 = vsel %vm1869_vm6, %v2009_v61, %v1752_v27  ;;  %v2322_v27 = vadd.f32 %v4992_v37, %v4910_v25 }
 0x36a   : > { %v2505_v29 = vadd.f32 %v2504_v39, %v2406_v51  ;;  %v5086_v51 = vpop.f32.mrf.mxu3  ;;  %v2315_v39 = vadd.f32 %v4992_v37, %v4860_v46 }
 0x36c   : > { %v2578_v31 = vmax.f32 %v2505_v29, 0.0  ;;  %2447 = vmatmul.bf16.gmra.mxu2 %v2057_v33  ;;  %v2317_v29 = vadd.f32 %v4992_v37, %v4873_v20  ;;  %v1586_v33 = vpop.permute.xlu2 %1585 }
 0x36e   : > { %v2608_v60 = vpack.c.bf16 %v2578_v31, %v2577_v35  ;;  %v1632_v35 = vpop.permute.xlu0 %1631 }
 0x36f   : > { %v2408_v63 = vpop.f32.mrf.mxu2 }
 0x370   : > { %3388 = vmatmul.msk.bf16.gmra.mxu3 %vm1795_vm5, %v2608_v60  ;;  %v2409_v58 = vadd.f32 %v2408_v63, %v2310_v38  ;;  %v1754_v60 = vpop.permute.xlu1 %1753  ;;  %v1974_v38 = vsel %vm1795_vm5, %v4552_v1, %v1586_v33  ;;  %v2320_v1 = vadd.f32 %v4992_v37, %v4889_v48 }
 0x371   : > { %v2507_v19 = vpop.f32.mrf.mxu1  ;;  %v2011_v6 = vsel %vm1832_vm4, %v1974_v38, %v1632_v35 }
 0x372   : > { %v2508_v14 = vadd.f32 %v2507_v19, %v2409_v58  ;;  %v5095_v56 = vpop.f32.mrf.mxu3  ;;  %v2063_v46 = vsel %vm1869_vm6, %v2011_v6, %v1754_v60  ;;  %v5118_v6 = vld [vmem:[%s5351_s7] ss:$0 sm:$0xff] }
 0x374   : > { %v2579_v32 = vmax.f32 %v2508_v14, 0.0 }
 0x377   : > { %v2410_v3 = vpop.f32.mrf.mxu2 }
 0x378   : > { %v2411_v24 = vadd.f32 %v2410_v3, %v2312_v26 }
 0x379   : > { %v2509_v7 = vpop.f32.mrf.mxu1 }
 0x37a   : > { %v2510_v34 = vadd.f32 %v2509_v7, %v2411_v24  ;;  %v5100_v24 = vpop.f32.mrf.mxu3 }
 0x37c   : > { %v2580_v15 = vmax.f32 %v2510_v34, 0.0  ;;  %2452 = vmatmul.bf16.gmra.mxu2 %v2060_v13  ;;  %v1588_v34 = vpop.permute.xlu2 %1587  ;;  %v1634_v13 = vpop.permute.xlu0 %1633 }
 0x37e   : > { %v2609_v12 = vpack.c.bf16 %v2580_v15, %v2579_v32  ;;  %v1756_v15 = vpop.permute.xlu1 %1755 }
 0x37f   : > { %v2413_v2 = vpop.f32.mrf.mxu2 }
 0x380   : > { %3389 = vmatmul.msk.bf16.gmra.mxu3 %vm1795_vm5, %v2609_v12  ;;  %v2414_v54 = vadd.f32 %v2413_v2, %v2315_v39  ;;  %v1977_v39 = vsel %vm1795_vm5, %v4617_v50, %v1588_v34 }
 0x381   : > { %v2512_v44 = vpop.f32.mrf.mxu1 }
 0x382   : > { %v2513_v63 = vadd.f32 %v2512_v44, %v2414_v54  ;;  %v307_v44 = vld [vmem:[%s3720_s17 + $0x8] sm:$0xff]   ;;  %v5110_v33 = vpop.f32.mrf.mxu3 }
 0x383   : > { %v2794_v35 = vunpack.c.l.bf16 %v307_v44 }
 0x384   : > { %v2581_v11 = vmax.f32 %v2513_v63, 0.0 }
 0x387   : > { %v2415_v31 = vpop.f32.mrf.mxu2 }
 0x388   : > { %v2416_v19 = vadd.f32 %v2415_v31, %v2317_v29  ;;  %v2013_v29 = vsel %vm1832_vm4, %v1977_v39, %v1634_v13  ;;  %v2795_v31 = vunpack.c.h.bf16 %v307_v44 }
 0x389   : > { %v2514_v58 = vpop.f32.mrf.mxu1  ;;  %v2066_v25 = vsel %vm1869_vm6, %v2013_v29, %v1756_v15 }
 0x38a   : > { %v2515_v26 = vadd.f32 %v2514_v58, %v2416_v19  ;;  %v2869_v58 = vrot.slane %v2794_v35, 3  ;;  %v2870_v50 = vrot.slane %v2795_v31, 3 }
 0x38c   : > { %v2582_v3 = vmax.f32 %v2515_v26, 0.0  ;;  %2457 = vmatmul.bf16.gmra.mxu2 %v2063_v46  ;;  %v309_v26 = vld [vmem:[%s3720_s17 + $0x10] sm:$0xff]  }
 0x38e   : > { %v2610_v20 = vpack.c.bf16 %v2582_v3, %v2581_v11  ;;  %v2325_v11 = vadd.f32 %v4992_v37, %v4920_v62 }
 0x38f   : > { %v2418_v14 = vpop.f32.mrf.mxu2 }
 0x390   : > { %3390 = vmatmul.msk.bf16.gmra.mxu3 %vm1795_vm5, %v2610_v20  ;;  %v2419_v7 = vadd.f32 %v2418_v14, %v2320_v1  ;;  %v2871_v20 = vsel %vm1757_vm7, %v2869_v58, %v2870_v50  ;;  %v2796_v14 = vunpack.c.l.bf16 %v309_v26  ;;  %v2330_v58 = vadd.f32 %v4992_v37, %v4946_v21 }
 0x391   : > { %v2517_v61 = vpop.f32.mrf.mxu1 }
 0x392   : > { %v2518_v12 = vadd.f32 %v2517_v61, %v2419_v7  ;;  %v2327_v7 = vadd.f32 %v4992_v37, %v4937_v5  ;;  %v2872_v13 = vrot.slane %v2796_v14, 3 }
 0x394   : > { %v2583_v60 = vmax.f32 %v2518_v12, 0.0  ;;  %v2873_v39 = vsel %vm1757_vm7, %v2870_v50, %v2872_v13 }
 0x397   : > { %v2420_v32 = vpop.f32.mrf.mxu2 }
 0x398   : > { %v2421_v2 = vadd.f32 %v2420_v32, %v2322_v27 }
 0x399   : > { %v2519_v54 = vpop.f32.mrf.mxu1 }
 0x39a   : > { %v2520_v48 = vadd.f32 %v2519_v54, %v2421_v2  ;;  %v2797_v54 = vunpack.c.h.bf16 %v309_v26 }
 0x39c   : > { %v2584_v63 = vmax.f32 %v2520_v48, 0.0  ;;  %2462 = vmatmul.bf16.gmra.mxu2 %v2066_v25 }
 0x39e   : > { %v2611_v19 = vpack.c.bf16 %v2584_v63, %v2583_v60  ;;  %v2874_v60 = vrot.slane %v2797_v54, 3 }
 0x39f   : > { %v2423_v38 = vpop.f32.mrf.mxu2 }
 0x3a0   : > { %3391 = vmatmul.msk.bf16.gmra.mxu3 %vm1795_vm5, %v2611_v19  ;;  %v2424_v61 = vadd.f32 %v2423_v38, %v2325_v11  ;;  %v311_v19 = vld [vmem:[%s3720_s17 + $0x18] sm:$0xff]   ;;  %v2875_v26 = vsel %vm1757_vm7, %v2872_v13, %v2874_v60 }
 0x3a1   : > { %v2522_v46 = vpop.f32.mrf.mxu1 }
 0x3a2   : > { %v2523_v32 = vadd.f32 %v2522_v46, %v2424_v61  ;;  %v2798_v46 = vunpack.c.l.bf16 %v311_v19 }
 0x3a3   : > { %v2704_v3 = vpop.f32.mrf.mxu3 }
 0x3a4   : > { %v2705_v1 = vadd.f32 %v5118_v6, %v2704_v3  ;;  %v2585_v29 = vmax.f32 %v2523_v32, 0.0 }
 0x3a6   : > { %v2978_v27 = vadd.f32 %v2871_v20, %v2705_v1  ;;  %v2332_v20 = vadd.f32 %v4992_v37, %v4954_v10  ;;  %v2876_v1 = vrot.slane %v2798_v46, 3 }
 0x3a7   : > { %v2425_v34 = vpop.f32.mrf.mxu2 }
 0x3a8   : > { %v3014_v15 = vmax.f32 %v2978_v27, 0.0  ;;  %v2426_v12 = vadd.f32 %v2425_v34, %v2327_v7  ;;  %v2877_v13 = vsel %vm1757_vm7, %v2874_v60, %v2876_v1 }
 0x3a9   : > { %v2524_v2 = vpop.f32.mrf.mxu1 }
 0x3aa   : > { %3050 = vst [vmem:[%s5129_s19] sm:$0xff] %v3014_v15  ;;  %v2525_v62 = vadd.f32 %v2524_v2, %v2426_v12  ;;  %v2799_v12 = vunpack.c.h.bf16 %v311_v19 }
 0x3ab   : > { %v2706_v44 = vpop.f32.mrf.mxu3 }
 0x3ac   : > { %v2586_v5 = vmax.f32 %v2525_v62, 0.0  ;;  %v2707_v48 = vadd.f32 %v5118_v6, %v2706_v44 }
 0x3ae   : > { %v2612_v25 = vpack.c.bf16 %v2586_v5, %v2585_v29  ;;  %v2979_v35 = vadd.f32 %v2873_v39, %v2707_v48  ;;  %v2878_v29 = vrot.slane %v2799_v12, 3  ;;  %v313_v48 = vld [vmem:[%s3720_s17 + $0x20] sm:$0xff]  }
 0x3af   : > { %v2428_v31 = vpop.f32.mrf.mxu2  ;;  %v2800_v60 = vunpack.c.l.bf16 %v313_v48 }
 0x3b0   : > { %v3015_v63 = vmax.f32 %v2979_v35, 0.0  ;;  %3392 = vmatmul.msk.bf16.gmra.mxu3 %vm1795_vm5, %v2612_v25  ;;  %v2429_v11 = vadd.f32 %v2428_v31, %v2330_v58  ;;  %v2335_v25 = vadd.f32 %v4992_v37, %v4962_v0  ;;  %v2879_v31 = vsel %vm1757_vm7, %v2876_v1, %v2878_v29 }
 0x3b1   : > { %v2527_v38 = vpop.f32.mrf.mxu1 }
 0x3b2   : > { %3051 = vst [vmem:[%s5129_s19 + $0x8] sm:$0xff] %v3015_v63  ;;  %v2528_v7 = vadd.f32 %v2527_v38, %v2429_v11  ;;  %v2337_v38 = vadd.f32 %v4992_v37, %v4971_v57 }
 0x3b3   : > { %v2709_v50 = vpop.f32.mrf.mxu3 }
 0x3b4   : > { %v2710_v3 = vadd.f32 %v5118_v6, %v2709_v50  ;;  %v2587_v2 = vmax.f32 %v2528_v7, 0.0 }
 0x3b6   : > { %v2980_v14 = vadd.f32 %v2875_v26, %v2710_v3  ;;  %v2880_v26 = vrot.slane %v2800_v60, 3 }
 0x3b7   : > { %v2430_v61 = vpop.f32.mrf.mxu2 }
 0x3b8   : > { %v3016_v27 = vmax.f32 %v2980_v14, 0.0  ;;  %v2431_v34 = vadd.f32 %v2430_v61, %v2332_v20  ;;  %v2881_v14 = vsel %vm1757_vm7, %v2878_v29, %v2880_v26  ;;  %v2801_v61 = vunpack.c.h.bf16 %v313_v48 }
 0x3b9   : > { %v2529_v32 = vpop.f32.mrf.mxu1 }
 0x3ba   : > { %3052 = vst [vmem:[%s5129_s19 + $0x10] sm:$0xff] %v3016_v27  ;;  %v2530_v21 = vadd.f32 %v2529_v32, %v2431_v34 }
 0x3bb   : > { %v2711_v15 = vpop.f32.mrf.mxu3 }
 0x3bc   : > { %v2588_v62 = vmax.f32 %v2530_v21, 0.0  ;;  %v2712_v44 = vadd.f32 %v5118_v6, %v2711_v15  ;;  %v2882_v21 = vrot.slane %v2801_v61, 3  ;;  %v315_v15 = vld [vmem:[%s3720_s17 + $0x28] sm:$0xff]   ;;  %v2347_v61 = vadd.f32 %v4992_v37, %v4907_v22 }
 0x3bd   : > { %v2803_v60 = vunpack.c.h.bf16 %v315_v15 }
 0x3be   : > { %v2613_v10 = vpack.c.bf16 %v2588_v62, %v2587_v2  ;;  %v2981_v39 = vadd.f32 %v2877_v13, %v2712_v44  ;;  %v2883_v12 = vsel %vm1757_vm7, %v2880_v26, %v2882_v21  ;;  %v2802_v2 = vunpack.c.l.bf16 %v315_v15 }
 0x3bf   : > { %v2433_v54 = vpop.f32.mrf.mxu2  ;;  %v2886_v26 = vrot.slane %v2803_v60, 3 }
 0x3c0   : > { %v3017_v5 = vmax.f32 %v2981_v39, 0.0  ;;  %3393 = vmatmul.msk.bf16.gmra.mxu3 %vm1795_vm5, %v2613_v10  ;;  %v2434_v63 = vadd.f32 %v2433_v54, %v2335_v25  ;;  %v2342_v10 = vadd.f32 %v4992_v37, %v4986_v53  ;;  %v2884_v29 = vrot.slane %v2802_v2, 3 }
 0x3c2   : > { %3053 = vst [vmem:[%s5129_s19 + $0x18] sm:$0xff] %v3017_v5  ;;  %v2533_v46 = vadd.f32 %v5005_v43, %v2434_v63 }
 0x3c3   : > { %v2714_v35 = vpop.f32.mrf.mxu3 }
 0x3c4   : > { %v2715_v19 = vadd.f32 %v5118_v6, %v2714_v35  ;;  %v2589_v1 = vmax.f32 %v2533_v46, 0.0  ;;  %v317_v46 = vld [vmem:[%s3720_s17 + $0x30] sm:$0xff]  }
 0x3c5   : > { %v2805_v15 = vunpack.c.h.bf16 %v317_v46 }
 0x3c6   : > { %v2982_v58 = vadd.f32 %v2879_v31, %v2715_v19  ;;  %v2885_v31 = vsel %vm1757_vm7, %v2882_v21, %v2884_v29 }
 0x3c7   : > { %v2435_v50 = vpop.f32.mrf.mxu2 }
 0x3c8   : > { %v3018_v11 = vmax.f32 %v2982_v58, 0.0  ;;  %v2436_v3 = vadd.f32 %v2435_v50, %v2337_v38 }
 0x3ca   : > { %3054 = vst [vmem:[%s5129_s19 + $0x20] sm:$0xff] %v3018_v11  ;;  %v2535_v0 = vadd.f32 %v5017_v23, %v2436_v3  ;;  %v2340_v23 = vadd.f32 %v4992_v37, %v4977_v28  ;;  %v2887_v3 = vsel %vm1757_vm7, %v2884_v29, %v2886_v26 }
 0x3cb   : > { %v2716_v20 = vpop.f32.mrf.mxu3 }
 0x3cc   : > { %v2590_v7 = vmax.f32 %v2535_v0, 0.0  ;;  %v2717_v57 = vadd.f32 %v5118_v6, %v2716_v20  ;;  %v2804_v0 = vunpack.c.l.bf16 %v317_v46 }
 0x3ce   : > { %v2614_v27 = vpack.c.bf16 %v2590_v7, %v2589_v1  ;;  %v2983_v34 = vadd.f32 %v2881_v14, %v2717_v57  ;;  %v2888_v57 = vrot.slane %v2804_v0, 3 }
 0x3cf   : > { %v2438_v32 = vpop.f32.mrf.mxu2 }
 0x3d0   : > { %v3019_v43 = vmax.f32 %v2983_v34, 0.0  ;;  %3394 = vmatmul.msk.bf16.gmra.mxu3 %vm1795_vm5, %v2614_v27  ;;  %v2439_v62 = vadd.f32 %v2438_v32, %v2340_v23 }
 0x3d2   : > { %3055 = vst [vmem:[%s5129_s19 + $0x28] sm:$0xff] %v3019_v43  ;;  %v2538_v5 = vadd.f32 %v5021_v4, %v2439_v62  ;;  %v2889_v43 = vsel %vm1757_vm7, %v2886_v26, %v2888_v57 }
 0x3d3   : > { %v2719_v13 = vpop.f32.mrf.mxu3 }
 0x3d4   : > { %v2720_v44 = vadd.f32 %v5118_v6, %v2719_v13  ;;  %v2591_v63 = vmax.f32 %v2538_v5, 0.0 }
 0x3d6   : > { %v2984_v39 = vadd.f32 %v2883_v12, %v2720_v44  ;;  %v2890_v44 = vrot.slane %v2805_v15, 3 }
 0x3d7   : > { %v2440_v54 = vpop.f32.mrf.mxu2 }
 0x3d8   : > { %v3020_v48 = vmax.f32 %v2984_v39, 0.0  ;;  %v2441_v25 = vadd.f32 %v2440_v54, %v2342_v10  ;;  %v319_v10 = vld [vmem:[%s3720_s17 + $0x38] sm:$0xff]   ;;  %v2891_v54 = vsel %vm1757_vm7, %v2888_v57, %v2890_v44 }
 0x3d9   : > { %v2806_v29 = vunpack.c.l.bf16 %v319_v10 }
 0x3da   : > { %3056 = vst [vmem:[%s5129_s19 + $0x30] sm:$0xff] %v3020_v48  ;;  %v2540_v28 = vadd.f32 %v5035_v41, %v2441_v25  ;;  %v2345_v41 = vadd.f32 %v4992_v37, %v4886_v16  ;;  %v2352_v25 = vadd.f32 %v4992_v37, %v4934_v45 }
 0x3db   : > { %v2721_v35 = vpop.f32.mrf.mxu3 }
 0x3dc   : > { %v2592_v19 = vmax.f32 %v2540_v28, 0.0  ;;  %v2722_v53 = vadd.f32 %v5118_v6, %v2721_v35 }
 0x3de   : > { %v2615_v38 = vpack.c.bf16 %v2592_v19, %v2591_v63  ;;  %v2985_v58 = vadd.f32 %v2885_v31, %v2722_v53  ;;  %v2892_v31 = vrot.slane %v2806_v29, 3 }
 0x3df   : > { %v2443_v50 = vpop.f32.mrf.mxu2 }
 0x3e0   : > { %v3021_v4 = vmax.f32 %v2985_v58, 0.0  ;;  %3395 = vmatmul.msk.bf16.gmra.mxu3 %vm1795_vm5, %v2615_v38  ;;  %v2444_v20 = vadd.f32 %v2443_v50, %v2345_v41  ;;  %v2893_v38 = vsel %vm1757_vm7, %v2890_v44, %v2892_v31  ;;  %v2807_v58 = vunpack.c.h.bf16 %v319_v10 }
 0x3e2   : > { %3057 = vst [vmem:[%s5129_s19 + $0x38] sm:$0xff] %v3021_v4  ;;  %v2543_v27 = vadd.f32 %v5041_v8, %v2444_v20 }
 0x3e3   : > { %v2724_v11 = vpop.f32.mrf.mxu3 }
 0x3e4   : > { %v2725_v14 = vadd.f32 %v5118_v6, %v2724_v11  ;;  %v2593_v23 = vmax.f32 %v2543_v27, 0.0  ;;  %v2894_v11 = vrot.slane %v2807_v58, 3 }
 0x3e6   : > { %v2986_v1 = vadd.f32 %v2887_v3, %v2725_v14  ;;  %v321_v3 = vld [vmem:[%s3720_s17 + $0x40] sm:$0xff]   ;;  %v2895_v20 = vsel %vm1757_vm7, %v2892_v31, %v2894_v11 }
 0x3e7   : > { %v2445_v7 = vpop.f32.mrf.mxu2  ;;  %v2808_v14 = vunpack.c.l.bf16 %v321_v3 }
 0x3e8   : > { %v3022_v34 = vmax.f32 %v2986_v1, 0.0  ;;  %v2446_v32 = vadd.f32 %v2445_v7, %v2347_v61  ;;  %v2357_v7 = vadd.f32 %v4992_v37, %v4950_v18 }
 0x3ea   : > { %3058 = vst [vmem:[%s5129_s19 + $0x40] sm:$0xff] %v3022_v34  ;;  %v2545_v16 = vadd.f32 %v5049_v59, %v2446_v32  ;;  %v2350_v59 = vadd.f32 %v4992_v37, %v4915_v40  ;;  %v2896_v34 = vrot.slane %v2808_v14, 3  ;;  %v2367_v14 = vadd.f32 %v4992_v37, %v4983_v52 }
 0x3eb   : > { %v2726_v21 = vpop.f32.mrf.mxu3 }
 0x3ec   : > { %v2594_v13 = vmax.f32 %v2545_v16, 0.0  ;;  %v2727_v22 = vadd.f32 %v5118_v6, %v2726_v21  ;;  %v2897_v15 = vsel %vm1757_vm7, %v2894_v11, %v2896_v34  ;;  %v2365_v11 = vadd.f32 %v4992_v37, %v4974_v36 }
 0x3ee   : > { %v2616_v12 = vpack.c.bf16 %v2594_v13, %v2593_v23  ;;  %v2987_v2 = vadd.f32 %v2889_v43, %v2727_v22  ;;  %v2809_v23 = vunpack.c.h.bf16 %v321_v3 }
 0x3ef   : > { %v2448_v62 = vpop.f32.mrf.mxu2 }
 0x3f0   : > { %v3023_v8 = vmax.f32 %v2987_v2, 0.0  ;;  %3396 = vmatmul.msk.bf16.gmra.mxu3 %vm1795_vm5, %v2616_v12  ;;  %v2449_v5 = vadd.f32 %v2448_v62, %v2350_v59  ;;  %v2898_v44 = vrot.slane %v2809_v23, 3 }
 0x3f2   : > { %3059 = vst [vmem:[%s5129_s19 + $0x48] sm:$0xff] %v3023_v8  ;;  %v2548_v60 = vadd.f32 %v5058_v49, %v2449_v5  ;;  %v323_v8 = vld [vmem:[%s3720_s17 + $0x48] sm:$0xff]   ;;  %v2899_v59 = vsel %vm1757_vm7, %v2896_v34, %v2898_v44  ;;  %v2362_v5 = vadd.f32 %v4992_v37, %v4967_v47 }
 0x3f3   : > { %v2729_v39 = vpop.f32.mrf.mxu3 }
 0x3f4   : > { %v2730_v48 = vadd.f32 %v5118_v6, %v2729_v39  ;;  %v2595_v50 = vmax.f32 %v2548_v60, 0.0  ;;  %v2810_v39 = vunpack.c.l.bf16 %v323_v8 }
 0x3f6   : > { %v2988_v28 = vadd.f32 %v2891_v54, %v2730_v48 }
 0x3f7   : > { %v2450_v35 = vpop.f32.mrf.mxu2 }
 0x3f8   : > { %v3024_v63 = vmax.f32 %v2988_v28, 0.0  ;;  %v2451_v19 = vadd.f32 %v2450_v35, %v2352_v25  ;;  %v2900_v28 = vrot.slane %v2810_v39, 3 }
 0x3fa   : > { %3060 = vst [vmem:[%s5129_s19 + $0x50] sm:$0xff] %v3024_v63  ;;  %v2550_v40 = vadd.f32 %v5065_v9, %v2451_v19  ;;  %v2355_v9 = vadd.f32 %v4992_v37, %v4941_v42  ;;  %v347_v63 = vld [vmem:[%s3720_s17 + $0xa8] sm:$0x7] }
 0x3fb   : > { %v2731_v53 = vpop.f32.mrf.mxu3 }
 0x3fc   : > { %v2596_v26 = vmax.f32 %v2550_v40, 0.0  ;;  %v2732_v45 = vadd.f32 %v5118_v6, %v2731_v53  ;;  %v2901_v40 = vsel %vm1757_vm7, %v2898_v44, %v2900_v28  ;;  %v2811_v53 = vunpack.c.h.bf16 %v323_v8 }
 0x3fe   : > { %v2617_v4 = vpack.c.bf16 %v2596_v26, %v2595_v50  ;;  %v2989_v46 = vadd.f32 %v2893_v38, %v2732_v45  ;;  %v453_v38 = vunpack.c.l.b16 %v347_v63 }
 0x3ff   : > { %v2453_v41 = vpop.f32.mrf.mxu2 }
 0x400   : > { %v3025_v49 = vmax.f32 %v2989_v46, 0.0  ;;  %3397 = vmatmul.msk.bf16.gmra.mxu3 %vm1795_vm5, %v2617_v4  ;;  %v2454_v61 = vadd.f32 %v2453_v41, %v2355_v9  ;;  %v475_v26 = vpack.c.b16 %v453_v38, %v453_v38  ;;  %v2902_v46 = vrot.slane %v2811_v53, 3 }
 0x402   : > { %3061 = vst [vmem:[%s5129_s19 + $0x58] sm:$0xff] %v3025_v49  ;;  %v2553_v32 = vadd.f32 %v5073_v17, %v2454_v61  ;;  %658 = vmatmul.bf16.gmra.mxu0 %v475_v26  ;;  %v2903_v3 = vsel %vm1757_vm7, %v2900_v28, %v2902_v46 }
 0x403   : > { %v2734_v0 = vpop.f32.mrf.mxu3 }
 0x404   : > { %v2735_v1 = vadd.f32 %v5118_v6, %v2734_v0  ;;  %v2597_v13 = vmax.f32 %v2553_v32, 0.0 }
 0x406   : > { %v2990_v57 = vadd.f32 %v2895_v20, %v2735_v1 }
 0x407   : > { %v2455_v27 = vpop.f32.mrf.mxu2 }
 0x408   : > { %v3026_v16 = vmax.f32 %v2990_v57, 0.0  ;;  %v2456_v21 = vadd.f32 %v2455_v27, %v2357_v7 }
 0x40a   : > { %3062 = vst [vmem:[%s5129_s19 + $0x60] sm:$0xff] %v3026_v16  ;;  %v2555_v42 = vadd.f32 %v5082_v55, %v2456_v21  ;;  %v2360_v55 = vadd.f32 %v4992_v37, %v4960_v30 }
 0x40b   : > { %v2736_v43 = vpop.f32.mrf.mxu3 }
 0x40c   : > { %v2598_v22 = vmax.f32 %v2555_v42, 0.0  ;;  %v2737_v18 = vadd.f32 %v5118_v6, %v2736_v43 }
 0x40e   : > { %v2618_v12 = vpack.c.bf16 %v2598_v22, %v2597_v13  ;;  %v2991_v2 = vadd.f32 %v2897_v15, %v2737_v18  ;;  %v327_v13 = vld [vmem:[%s3720_s17 + $0x58] sm:$0xff]  }
 0x40f   : > { %v2458_v62 = vpop.f32.mrf.mxu2  ;;  %v2814_v18 = vunpack.c.l.bf16 %v327_v13 }
 0x410   : > { %v3027_v17 = vmax.f32 %v2991_v2, 0.0  ;;  %3398 = vmatmul.msk.bf16.gmra.mxu3 %vm1795_vm5, %v2618_v12  ;;  %v2459_v54 = vadd.f32 %v2458_v62, %v2360_v55  ;;  %v2815_v55 = vunpack.c.h.bf16 %v327_v13 }
 0x411   : > { %v2908_v62 = vrot.slane %v2814_v18, 3 }
 0x412   : > { %3063 = vst [vmem:[%s5129_s19 + $0x68] sm:$0xff] %v3027_v17  ;;  %v2558_v35 = vadd.f32 %v5086_v51, %v2459_v54  ;;  %v2910_v39 = vrot.slane %v2815_v55, 3 }
 0x413   : > { %v2739_v10 = vpop.f32.mrf.mxu3 }
 0x414   : > { %v2740_v29 = vadd.f32 %v5118_v6, %v2739_v10  ;;  %v2599_v58 = vmax.f32 %v2558_v35, 0.0 }
 0x416   : > { %v2992_v48 = vadd.f32 %v2899_v59, %v2740_v29  ;;  %v329_v29 = vld [vmem:[%s3720_s17 + $0x60] sm:$0xff]  }
 0x417   : > { %v2460_v25 = vpop.f32.mrf.mxu2 }
 0x418   : > { %v3028_v31 = vmax.f32 %v2992_v48, 0.0  ;;  %v2461_v60 = vadd.f32 %v2460_v25, %v2362_v5  ;;  %v2911_v48 = vsel %vm1757_vm7, %v2908_v62, %v2910_v39  ;;  %v2816_v25 = vunpack.c.l.bf16 %v329_v29 }
 0x41a   : > { %3064 = vst [vmem:[%s5129_s19 + $0x70] sm:$0xff] %v3028_v31  ;;  %v2560_v30 = vadd.f32 %v5095_v56, %v2461_v60  ;;  %v325_v56 = vld [vmem:[%s3720_s17 + $0x50] sm:$0xff]   ;;  %v2912_v31 = vrot.slane %v2816_v25, 3 }
 0x41b   : > { %v2741_v19 = vpop.f32.mrf.mxu3  ;;  %v2812_v9 = vunpack.c.l.bf16 %v325_v56  ;;  %v2813_v21 = vunpack.c.h.bf16 %v325_v56 }
 0x41c   : > { %v2600_v47 = vmax.f32 %v2560_v30, 0.0  ;;  %v2742_v50 = vadd.f32 %v5118_v6, %v2741_v19  ;;  %v2913_v63 = vsel %vm1757_vm7, %v2910_v39, %v2912_v31  ;;  %v2817_v19 = vunpack.c.h.bf16 %v329_v29 }
 0x41d   : > { %v2904_v7 = vrot.slane %v2812_v9, 3  ;;  %v2906_v23 = vrot.slane %v2813_v21, 3 }
 0x41e   : > { %v2619_v45 = vpack.c.bf16 %v2600_v47, %v2599_v58  ;;  %v2993_v51 = vadd.f32 %v2901_v40, %v2742_v50  ;;  %v2914_v38 = vrot.slane %v2817_v19, 3  ;;  %v331_v47 = vld [vmem:[%s3720_s17 + $0x68] sm:$0xff]  }
 0x41f   : > { %v2463_v4 = vpop.f32.mrf.mxu2  ;;  %v2905_v16 = vsel %vm1757_vm7, %v2902_v46, %v2904_v7  ;;  %v2909_v8 = vsel %vm1757_vm7, %v2906_v23, %v2908_v62 }
 0x420   : > { %v3029_v41 = vmax.f32 %v2993_v51, 0.0  ;;  %3399 = vmatmul.msk.bf16.gmra.mxu3 %vm1795_vm5, %v2619_v45  ;;  %v2464_v0 = vadd.f32 %v2463_v4, %v2365_v11  ;;  %v2915_v26 = vsel %vm1757_vm7, %v2912_v31, %v2914_v38  ;;  %v2818_v45 = vunpack.c.l.bf16 %v331_v47 }
 0x422   : > { %3065 = vst [vmem:[%s5129_s19 + $0x78] sm:$0xff] %v3029_v41  ;;  %v2563_v57 = vadd.f32 %v5100_v24, %v2464_v0  ;;  %v2916_v46 = vrot.slane %v2818_v45, 3 }
 0x423   : > { %v2744_v49 = vpop.f32.mrf.mxu3 }
 0x424   : > { %v2745_v20 = vadd.f32 %v5118_v6, %v2744_v49  ;;  %v2601_v42 = vmax.f32 %v2563_v57, 0.0  ;;  %v2917_v11 = vsel %vm1757_vm7, %v2914_v38, %v2916_v46  ;;  %v2819_v49 = vunpack.c.h.bf16 %v331_v47 }
 0x426   : > { %v2994_v61 = vadd.f32 %v2903_v3, %v2745_v20  ;;  %v2918_v0 = vrot.slane %v2819_v49, 3 }
 0x427   : > { %v2465_v1 = vpop.f32.mrf.mxu2 }
 0x428   : > { %v3030_v27 = vmax.f32 %v2994_v61, 0.0  ;;  %v2466_v36 = vadd.f32 %v2465_v1, %v2367_v14  ;;  %v333_v14 = vld [vmem:[%s3720_s17 + $0x70] sm:$0xff]   ;;  %v2919_v1 = vsel %vm1757_vm7, %v2916_v46, %v2918_v0 }
 0x429   : > { %v2821_v21 = vunpack.c.h.bf16 %v333_v14 }
 0x42a   : > { %3066 = vst [vmem:[%s5129_s19 + $0x80] sm:$0xff] %v3030_v27  ;;  %v2565_v34 = vadd.f32 %v5110_v33, %v2466_v36  ;;  %v2907_v33 = vsel %vm1757_vm7, %v2904_v7, %v2906_v23  ;;  %v2820_v7 = vunpack.c.l.bf16 %v333_v14 }
 0x42b   : > { %v2746_v32 = vpop.f32.mrf.mxu3 }
 0x42c   : > { %v2602_v43 = vmax.f32 %v2565_v34, 0.0  ;;  %v2747_v52 = vadd.f32 %v5118_v6, %v2746_v32  ;;  %v2920_v36 = vrot.slane %v2820_v7, 3 }
 0x42e   : > { %v2620_v37 = vpack.c.bf16 %v2602_v43, %v2601_v42  ;;  %v2995_v15 = vadd.f32 %v2905_v16, %v2747_v52  ;;  %v2921_v16 = vsel %vm1757_vm7, %v2918_v0, %v2920_v36  ;;  %v2922_v52 = vrot.slane %v2821_v21, 3  ;;  %v341_v0 = vld [vmem:[%s3720_s17 + $0x90] sm:$0xff]  }
 0x430   : > { %v3031_v24 = vmax.f32 %v2995_v15, 0.0  ;;  %3400 = vmatmul.msk.bf16.gmra.mxu3 %vm1795_vm5, %v2620_v37  ;;  %v335_v15 = vld [vmem:[%s3720_s17 + $0x78] sm:$0xff]  }
 0x431   : > { %v2822_v13 = vunpack.c.l.bf16 %v335_v15 }
 0x432   : > { %3067 = vst [vmem:[%s5129_s19 + $0x88] sm:$0xff] %v3031_v24  ;;  %v2923_v24 = vsel %vm1757_vm7, %v2920_v36, %v2922_v52 }
 0x433   : > { %v2749_v22 = vpop.f32.mrf.mxu3  ;;  %v2924_v18 = vrot.slane %v2822_v13, 3 }
 0x434   : > { %v2750_v12 = vadd.f32 %v5118_v6, %v2749_v22 }
 0x435   : > { %v2925_v62 = vsel %vm1757_vm7, %v2922_v52, %v2924_v18 }
 0x436   : > { %v2996_v2 = vadd.f32 %v2907_v33, %v2750_v12 }
 0x438   : > { %v3032_v44 = vmax.f32 %v2996_v2, 0.0 }
 0x43a   : > { %3068 = vst [vmem:[%s5129_s19 + $0x90] sm:$0xff] %v3032_v44  ;;  %v2823_v44 = vunpack.c.h.bf16 %v335_v15 }
 0x43b   : > { %v2751_v17 = vpop.f32.mrf.mxu3 }
 0x43c   : > { %v2752_v10 = vadd.f32 %v5118_v6, %v2751_v17  ;;  %v2926_v55 = vrot.slane %v2823_v44, 3 }
 0x43e   : > { %v2997_v59 = vadd.f32 %v2909_v8, %v2752_v10 }
 0x440   : > { %v3033_v54 = vmax.f32 %v2997_v59, 0.0  ;;  %v337_v59 = vld [vmem:[%s3720_s17 + $0x80] sm:$0xff]  }
 0x441   : > { %v2824_v29 = vunpack.c.l.bf16 %v337_v59 }
 0x442   : > { %3069 = vst [vmem:[%s5129_s19 + $0x98] sm:$0xff] %v3033_v54  ;;  %v2927_v54 = vsel %vm1757_vm7, %v2924_v18, %v2926_v55 }
 0x443   : > { %v2754_v5 = vpop.f32.mrf.mxu3  ;;  %v2928_v25 = vrot.slane %v2824_v29, 3 }
 0x444   : > { %v2755_v28 = vadd.f32 %v5118_v6, %v2754_v5 }
 0x445   : > { %v2929_v31 = vsel %vm1757_vm7, %v2926_v55, %v2928_v25 }
 0x446   : > { %v2998_v35 = vadd.f32 %v2911_v48, %v2755_v28 }
 0x448   : > { %v3034_v60 = vmax.f32 %v2998_v35, 0.0 }
 0x44a   : > { %3070 = vst [vmem:[%s5129_s19 + $0xa0] sm:$0xff] %v3034_v60  ;;  %v2825_v60 = vunpack.c.h.bf16 %v337_v59 }
 0x44b   : > { %v2756_v30 = vpop.f32.mrf.mxu3 }
 0x44c   : > { %v2757_v40 = vadd.f32 %v5118_v6, %v2756_v30  ;;  %v2930_v19 = vrot.slane %v2825_v60, 3 }
 0x44e   : > { %v2999_v53 = vadd.f32 %v2913_v63, %v2757_v40 }
 0x450   : > { %v3035_v58 = vmax.f32 %v2999_v53, 0.0  ;;  %v339_v53 = vld [vmem:[%s3720_s17 + $0x88] sm:$0xff]  }
 0x451   : > { %v2826_v47 = vunpack.c.l.bf16 %v339_v53 }
 0x452   : > { %3071 = vst [vmem:[%s5129_s19 + $0xa8] sm:$0xff] %v3035_v58  ;;  %v2931_v58 = vsel %vm1757_vm7, %v2928_v25, %v2930_v19 }
 0x453   : > { %v2759_v50 = vpop.f32.mrf.mxu3  ;;  %v2932_v45 = vrot.slane %v2826_v47, 3 }
 0x454   : > { %v2760_v51 = vadd.f32 %v5118_v6, %v2759_v50 }
 0x455   : > { %v2933_v46 = vsel %vm1757_vm7, %v2930_v19, %v2932_v45 }
 0x456   : > { %v3000_v4 = vadd.f32 %v2915_v26, %v2760_v51 }
 0x458   : > { %v3036_v41 = vmax.f32 %v3000_v4, 0.0 }
 0x45a   : > { %3072 = vst [vmem:[%s5129_s19 + $0xb0] sm:$0xff] %v3036_v41  ;;  %v2827_v41 = vunpack.c.h.bf16 %v339_v53 }
 0x45b   : > { %v2761_v56 = vpop.f32.mrf.mxu3 }
 0x45c   : > { %v2762_v3 = vadd.f32 %v5118_v6, %v2761_v56 }
 0x45e   : > { %v3001_v9 = vadd.f32 %v2917_v11, %v2762_v3  ;;  %v2934_v3 = vrot.slane %v2827_v41, 3 }
 0x460   : > { %v3037_v20 = vmax.f32 %v3001_v9, 0.0  ;;  %v2935_v14 = vsel %vm1757_vm7, %v2932_v45, %v2934_v3 }
 0x462   : > { %3073 = vst [vmem:[%s5129_s19 + $0xb8] sm:$0xff] %v3037_v20 }
 0x463   : > { %v2764_v61 = vpop.f32.mrf.mxu3 }
 0x464   : > { %v2765_v57 = vadd.f32 %v5118_v6, %v2764_v61  ;;  %v2828_v61 = vunpack.c.l.bf16 %v341_v0 }
 0x466   : > { %v3002_v27 = vadd.f32 %v2919_v1, %v2765_v57 }
 0x468   : > { %v3038_v34 = vmax.f32 %v3002_v27, 0.0  ;;  %v2936_v27 = vrot.slane %v2828_v61, 3 }
 0x46a   : > { %3074 = vst [vmem:[%s5129_s19 + $0xc0] sm:$0xff] %v3038_v34 }
 0x46b   : > { %v2766_v32 = vpop.f32.mrf.mxu3 }
 0x46c   : > { %v2767_v42 = vadd.f32 %v5118_v6, %v2766_v32  ;;  %v2937_v32 = vsel %vm1757_vm7, %v2934_v3, %v2936_v27 }
 0x46e   : > { %v3003_v43 = vadd.f32 %v2921_v16, %v2767_v42  ;;  %v2829_v16 = vunpack.c.h.bf16 %v341_v0 }
 0x470   : > { %v3039_v37 = vmax.f32 %v3003_v43, 0.0  ;;  %v2938_v43 = vrot.slane %v2829_v16, 3 }
 0x472   : > { %3075 = vst [vmem:[%s5129_s19 + $0xc8] sm:$0xff] %v3039_v37  ;;  %v343_v37 = vld [vmem:[%s3720_s17 + $0x98] sm:$0xf]  ;;  %s3099_s17 = sshll.u32 %s5129_s19, 4  ;;  %s3100_s17 = int_to_ptr.vmem [resolvable:$true] %s3099_s17 }
 0x473   : > { %v2769_v23 = vpop.f32.mrf.mxu3 }
 0x474   : > { %v2770_v22 = vadd.f32 %v5118_v6, %v2769_v23  ;;  %v2939_v23 = vsel %vm1757_vm7, %v2936_v27, %v2938_v43 }
 0x476   : > { %v3004_v33 = vadd.f32 %v2923_v24, %v2770_v22  ;;  %v2830_v24 = vunpack.c.l.bf16 %v343_v37 }
 0x478   : > { %v3040_v12 = vmax.f32 %v3004_v33, 0.0  ;;  %v2940_v33 = vrot.slane %v2830_v24, 3 }
 0x47a   : > { %3076 = vst [vmem:[%s5129_s19 + $0xd0] sm:$0xff] %v3040_v12 }
 0x47b   : > { %v2771_v2 = vpop.f32.mrf.mxu3 }
 0x47c   : > { %v2772_v17 = vadd.f32 %v5118_v6, %v2771_v2  ;;  %v2941_v2 = vsel %vm1757_vm7, %v2938_v43, %v2940_v33 }
 0x47e   : > { %v3005_v8 = vadd.f32 %v2925_v62, %v2772_v17 }
 0x47f   : > { %v659_v11 = vpop.f32.mrf.mxu0 }
 0x480   : > { %v3041_v10 = vmax.f32 %v3005_v8, 0.0 }
 0x482   : > { %3077 = vst [vmem:[%s5129_s19 + $0xd8] sm:$0xff] %v3041_v10 }
 0x483   : > { %v2774_v39 = vpop.f32.mrf.mxu3 }
 0x484   : > { %v2775_v5 = vadd.f32 %v5118_v6, %v2774_v39 }
 0x486   : > { %v3006_v48 = vadd.f32 %v2927_v54, %v2775_v5 }
 0x487   : > { %v660_v7 = vpop.f32.mrf.mxu0 }
 0x488   : > { %v3042_v28 = vmax.f32 %v3006_v48, 0.0 }
 0x48a   : > { %3078 = vst [vmem:[%s5129_s19 + $0xe0] sm:$0xff] %v3042_v28 }
 0x48b   : > { %v2776_v35 = vpop.f32.mrf.mxu3 }
 0x48c   : > { %v2777_v30 = vadd.f32 %v5118_v6, %v2776_v35 }
 0x48e   : > { %v3007_v63 = vadd.f32 %v2929_v31, %v2777_v30 }
 0x490   : > { %v3043_v40 = vmax.f32 %v3007_v63, 0.0 }
 0x492   : > { %3079 = vst [vmem:[%s5129_s19 + $0xe8] sm:$0xff] %v3043_v40 }
 0x493   : > { %v2779_v38 = vpop.f32.mrf.mxu3 }
 0x494   : > { %v2780_v50 = vadd.f32 %v5118_v6, %v2779_v38 }
 0x496   : > { %v3008_v26 = vadd.f32 %v2931_v58, %v2780_v50 }
 0x498   : > { %v3044_v51 = vmax.f32 %v3008_v26, 0.0 }
 0x49a   : > { %3080 = vst [vmem:[%s5129_s19 + $0xf0] sm:$0xff] %v3044_v51 }
 0x49b   : > { %v2781_v4 = vpop.f32.mrf.mxu3 }
 0x49c   : > { %v2782_v56 = vadd.f32 %v5118_v6, %v2781_v4 }
 0x49e   : > { %v3009_v49 = vadd.f32 %v2933_v46, %v2782_v56 }
 0x4a0   : > { %v3045_v9 = vmax.f32 %v3009_v49, 0.0 }
 0x4a2   : > { %3081 = vst [vmem:[%s5129_s19 + $0xf8] sm:$0xff] %v3045_v9 }
 0x4a3   : > { %v2784_v20 = vpop.f32.mrf.mxu3 }
 0x4a4   : > { %v2785_v1 = vadd.f32 %v5118_v6, %v2784_v20 }
 0x4a6   : > { %v3010_v57 = vadd.f32 %v2935_v14, %v2785_v1 }
 0x4a8   : > { %v3046_v36 = vmax.f32 %v3010_v57, 0.0 }
 0x4aa   : > { %3082 = vst [vmem:[%s5129_s19 + $0x100] sm:$0xff] %v3046_v36 }
 0x4ab   : > { %v2786_v34 = vpop.f32.mrf.mxu3 }
 0x4ac   : > { %v2787_v21 = vadd.f32 %v5118_v6, %v2786_v34 }
 0x4ae   : > { %v3011_v42 = vadd.f32 %v2937_v32, %v2787_v21 }
 0x4b0   : > { %v3047_v52 = vmax.f32 %v3011_v42, 0.0 }
 0x4b2   : > { %3083 = vst [vmem:[%s5129_s19 + $0x108] sm:$0xff] %v3047_v52 }
 0x4b3   : > { %v2789_v15 = vpop.f32.mrf.mxu3 }
 0x4b4   : > { %v2790_v13 = vadd.f32 %v5118_v6, %v2789_v15 }
 0x4b6   : > { %v3012_v22 = vadd.f32 %v2939_v23, %v2790_v13 }
 0x4b8   : > { %v3048_v18 = vmax.f32 %v3012_v22, 0.0 }
 0x4ba   : > { %3084 = vst [vmem:[%s5129_s19 + $0x110] sm:$0xff] %v3048_v18 }
 0x4bb   : > { %v2791_v12 = vpop.f32.mrf.mxu3 }
 0x4bc   : > { %v2792_v62 = vadd.f32 %v5118_v6, %v2791_v12 }
 0x4be   : > { %v3013_v44 = vadd.f32 %v2941_v2, %v2792_v62 }
 0x4c0   : > { %v3049_v17 = vmax.f32 %v3013_v44, 0.0 }
 0x4c2   : > { %3085 = vst [vmem:[%s5129_s19 + $0x118] sm:$0xff] %v3049_v17 }
 0x4c3   : > { %3546 = shalt.err (!%p3543_p3)
}
 0x4c4   : > { %s3587_s25 = smov 128   ;;  %s3588_s19 = smov 8  }
 0x4c5   : > { %3466 = dma.vmem_to_hbm [thread:$0]  (%p3672_p5), %s3100_s17, 4608, %s3102_s24, %s3087_s9, %s3587_s25, %s3587_s25, %s3588_s19  }
 0x4c6 PF: > { %p3472_p4 = scmp.ge.s32.totalorder %s3581_s30, 2  ;;  %s3116_s23 = sand.u32 1, %s3569_s27  }
 0x4c7   : > { %s3117_s10 = scalar_lea.sflag [#allocation3], %s3116_s23 }
 0x4c8   : > { %p3469_p7 = pnand %p3472_p4, %p3676_p6 }
 0x4ca   : > { %p3470_p8 = pneg %p3469_p7 }
 0x4cc   : > { %3564 = dma.done.wait (%p3470_p8), %s3117_s10, 4608  }
 0x4cd   : > { %3566 = vsyncadd (%p3470_p8), %s3117_s10, 4294962688  ;;  %p18_p9 = scmp.ge.s32.totalorder %s3659_s11, 4   ;;  %s5419_s27 = smov %s3573_s28 }
 0x4ce   : > { %s5420_s28 = smov %s3577_s29  ;;  %s5421_s29 = smov %s3670_s14 }
 0x4cf   : > { %s5422_s30 = smov %s3659_s11  ;;  %20 = sbr.rel (!%p18_p9) target bundleno = 3 (0x3), region = 87 }
 0x4d4   :  { %3123 = vsyncpa [#allocation3], 1 }
 0x4d5   :  { %3125 = vsyncpa [#allocation3 + $0x1], 1 }

</bundles_post_ra>
